<compile_context>
chip_gen: v6e
topology: v6e:2x2x1
jax: 0.10.0
libtpu: 0.0.40
codegen_flags: <defaults>
</compile_context>

<pallas_src>
import jax
import jax.numpy as jnp
from jax.experimental import pallas as pl
from jax.experimental.pallas import tpu as pltpu


def _lasas_kernel(a_ref, x_ref, wa_ref, ba_ref, wt_ref, bt_ref,
                  sfull_ref, wrfull_ref, b2_ref, o_ref):
    """One tile of B*T rows: full LASAS hot path (4 MXU matmuls, f32 accum)."""
    # Per-head acoustic / text projections, all heads fused along lanes.
    ap = jnp.dot(a_ref[...], wa_ref[...],
                 preferred_element_type=jnp.float32) + ba_ref[...]   # (tm, NH*H)
    tp = jnp.dot(x_ref[...], wt_ref[...],
                 preferred_element_type=jnp.float32) + bt_ref[...]   # (tm, NH*H)
    prod = ap * tp                                                   # (tm, NH*H)

    # Fused head-wise reduction (scale folded into S_full) + text_dim_reduction,
    # both accumulated into one full-width (tm, hidden_dim) slab:
    #   out[:, :NH] = prod @ (scale * S)          out[:, NH:] = x @ Wr + br
    out = jnp.dot(prod, sfull_ref[...], preferred_element_type=jnp.float32)
    out = out + jnp.dot(x_ref[...], wrfull_ref[...],
                        preferred_element_type=jnp.float32)
    out = out + b2_ref[...]
    o_ref[...] = out.astype(o_ref.dtype)                             # (tm, H)


def lasas_block(acoustic, text, params, *, num_heads, tm=512):
    """JAX wrapper around the Pallas kernel.

    acoustic: (B, T, acoustic_dim)   text: (B, T, text_dim)
    params: dict with wa (Da, NH*H), ba (NH*H,), wt (V, NH*H), bt (NH*H,),
            wr (V, H-NH), br (H-NH,)  -- (in, out) layout, y = x @ W + b.
    returns: (B, T, hidden_dim)
    """
    assert tm % 8 == 0, "row tile must be a multiple of 8 (sublane)"
    B, T, Da = acoustic.shape
    _, _, V = text.shape
    wa, ba = params["wa"], params["ba"]
    wt, bt = params["wt"], params["bt"]
    wr, br = params["wr"], params["br"]

    nhh = wa.shape[1]                      # num_heads * hidden_dim
    hidden_dim = nhh // num_heads
    red_dim = wr.shape[1]                  # hidden_dim - num_heads
    out_dim = num_heads + red_dim          # == hidden_dim

    M = B * T
    num_tiles = pl.cdiv(M, tm)
    Mp = num_tiles * tm

    a2 = acoustic.reshape(M, Da)
    x2 = text.reshape(M, V)
    if Mp != M:                            # pad rows; padded outputs are discarded
        a2 = jnp.pad(a2, ((0, Mp - M), (0, 0)))
        x2 = jnp.pad(x2, ((0, Mp - M), (0, 0)))

    # Scale folded into the head-sum matrix:  S_full[h*H + i, h] = scale.
    scale = 1.0 / ((hidden_dim / num_heads) ** 0.5)
    head_ids = jnp.repeat(jnp.arange(num_heads), hidden_dim)                 # (NH*H,)
    s_block = (head_ids[:, None] == jnp.arange(num_heads)[None, :])
    s_full = jnp.concatenate(
        [s_block.astype(jnp.float32) * scale,
         jnp.zeros((nhh, red_dim), jnp.float32)], axis=1)                    # (NH*H, H)

    # text_dim_reduction weight zero-padded into the full output width.
    wr_full = jnp.concatenate(
        [jnp.zeros((V, num_heads), jnp.float32), wr.astype(jnp.float32)], axis=1)  # (V, H)
    b2 = jnp.concatenate(
        [jnp.zeros((num_heads,), jnp.float32), br.astype(jnp.float32)]).reshape(1, out_dim)

    ba2 = ba.astype(jnp.float32).reshape(1, nhh)
    bt2 = bt.astype(jnp.float32).reshape(1, nhh)

    itemsize = jnp.dtype(acoustic.dtype).itemsize
    flops = 2 * Mp * (Da * nhh + V * nhh + nhh * out_dim + V * out_dim)
    bytes_accessed = (Mp * (Da + V + out_dim) * itemsize
                      + 4 * (Da * nhh + V * nhh + nhh * out_dim + V * out_dim
                             + 2 * nhh + out_dim))
    cost = pl.CostEstimate(flops=flops, transcendentals=0,
                           bytes_accessed=bytes_accessed)

    out = pl.pallas_call(
        _lasas_kernel,
        out_shape=jax.ShapeDtypeStruct((Mp, out_dim), acoustic.dtype),
        grid_spec=pltpu.PrefetchScalarGridSpec(
            num_scalar_prefetch=0,
            grid=(num_tiles,),
            in_specs=[
                pl.BlockSpec((tm, Da), lambda i: (i, 0)),          # acoustic rows
                pl.BlockSpec((tm, V), lambda i: (i, 0)),           # text rows
                pl.BlockSpec((Da, nhh), lambda i: (0, 0)),         # Wa (all heads)
                pl.BlockSpec((1, nhh), lambda i: (0, 0)),          # ba
                pl.BlockSpec((V, nhh), lambda i: (0, 0)),          # Wt (all heads)
                pl.BlockSpec((1, nhh), lambda i: (0, 0)),          # bt
                pl.BlockSpec((nhh, out_dim), lambda i: (0, 0)),    # scale*S (padded)
                pl.BlockSpec((V, out_dim), lambda i: (0, 0)),      # Wr (padded)
                pl.BlockSpec((1, out_dim), lambda i: (0, 0)),      # [0, br]
            ],
            out_specs=pl.BlockSpec((tm, out_dim), lambda i: (i, 0)),
        ),
        compiler_params=pltpu.CompilerParams(
            dimension_semantics=("parallel",)),
        cost_estimate=cost,
    )(a2, x2, wa, ba2, wt, bt2, s_full, wr_full, b2)

    return out[:M].reshape(B, T, out_dim)


def lasas_reference(acoustic, text, params, *, num_heads):
    """Pure-JAX reference matching the PyTorch forward exactly."""
    wa, ba = params["wa"], params["ba"]
    wt, bt = params["wt"], params["bt"]
    wr, br = params["wr"], params["br"]
    nhh = wa.shape[1]
    hidden_dim = nhh // num_heads
    scale = (hidden_dim / num_heads) ** 0.5

    sims = []
    for h in range(num_heads):
        sl = slice(h * hidden_dim, (h + 1) * hidden_dim)
        ap = acoustic @ wa[:, sl] + ba[sl]
        tp = text @ wt[:, sl] + bt[sl]
        sims.append(jnp.sum(tp * ap, axis=-1, keepdims=True) / scale)
    accent_shift = jnp.concatenate(sims, axis=-1)
    reduced_text = text @ wr + br
    return jnp.concatenate([accent_shift, reduced_text], axis=-1)


def _make_params(key, acoustic_dim, text_dim, hidden_dim, num_heads):
    keys = jax.random.split(key, 6)
    return {
        "wa": 0.1 * jax.random.normal(keys[0], (acoustic_dim, num_heads * hidden_dim), jnp.float32),
        "ba": 0.1 * jax.random.normal(keys[1], (num_heads * hidden_dim,), jnp.float32),
        "wt": 0.1 * jax.random.normal(keys[2], (text_dim, num_heads * hidden_dim), jnp.float32),
        "bt": 0.1 * jax.random.normal(keys[3], (num_heads * hidden_dim,), jnp.float32),
        "wr": 0.1 * jax.random.normal(keys[4], (text_dim, hidden_dim - num_heads), jnp.float32),
        "br": 0.1 * jax.random.normal(keys[5], (hidden_dim - num_heads,), jnp.float32),
    }


if __name__ == "__main__":
    acoustic_dim = 16
    text_dim = 64          # "vocab"
    hidden_dim = 32
    num_heads = 8

    key = jax.random.PRNGKey(0)
    kp, ka, kx, ka2, kx2 = jax.random.split(key, 5)
    params = _make_params(kp, acoustic_dim, text_dim, hidden_dim, num_heads)

    # Small demo shapes (single padded tile).
    B, T = 2, 8
    acoustic = jax.random.normal(ka, (B, T, acoustic_dim), dtype=jnp.float32)
    text = jax.random.normal(kx, (B, T, text_dim), dtype=jnp.float32)

    out = lasas_block(acoustic, text, params, num_heads=num_heads)
    out = jax.block_until_ready(out)
    ref = lasas_reference(acoustic, text, params, num_heads=num_heads)
    assert out.shape == (B, T, hidden_dim), out.shape
    assert jnp.allclose(out, ref, atol=1e-4, rtol=1e-4), float(jnp.abs(out - ref).max())

    # Multi-tile + padding path check (M = 1200 rows, tm = 512 -> 3 grid steps).
    B2, T2 = 2, 600
    acoustic2 = jax.random.normal(ka2, (B2, T2, acoustic_dim), dtype=jnp.float32)
    text2 = jax.random.normal(kx2, (B2, T2, text_dim), dtype=jnp.float32)
    out2 = jax.block_until_ready(
        lasas_block(acoustic2, text2, params, num_heads=num_heads, tm=512))
    ref2 = lasas_reference(acoustic2, text2, params, num_heads=num_heads)
    assert out2.shape == (B2, T2, hidden_dim), out2.shape
    assert jnp.allclose(out2, ref2, atol=1e-4, rtol=1e-4), float(jnp.abs(out2 - ref2).max())

    print("KERNEL_OK")
</pallas_src>

<mosaic_0001>
module attributes {stable_mosaic.version = 11 : i64} {
  func.func @_lasas_kernel(%arg0: i32, %arg1: memref<512x16xf32, #tpu.memory_space<vmem>>, %arg2: memref<512x64xf32, #tpu.memory_space<vmem>>, %arg3: memref<16x256xf32, #tpu.memory_space<vmem>>, %arg4: memref<1x256xf32, #tpu.memory_space<vmem>>, %arg5: memref<64x256xf32, #tpu.memory_space<vmem>>, %arg6: memref<1x256xf32, #tpu.memory_space<vmem>>, %arg7: memref<256x32xf32, #tpu.memory_space<vmem>>, %arg8: memref<64x32xf32, #tpu.memory_space<vmem>>, %arg9: memref<1x32xf32, #tpu.memory_space<vmem>>, %arg10: memref<512x32xf32, #tpu.memory_space<vmem>>) attributes {dimension_semantics = [#tpu.dimension_semantics<parallel>], iteration_bounds = array<i64: 1>, scalar_prefetch = 0 : i64, scratch_operands = 0 : i64, tpu.core_type = #tpu.core_type<tc>, window_params = [{transform_indices = @transform_0, window_bounds = array<i64: 512, 16>}, {transform_indices = @transform_1, window_bounds = array<i64: 512, 64>}, {pipeline_mode = #tpu.pipeline_mode<synchronous>, transform_indices = @transform_2, window_bounds = array<i64: 16, 256>}, {pipeline_mode = #tpu.pipeline_mode<synchronous>, transform_indices = @transform_3, window_bounds = array<i64: 1, 256>}, {pipeline_mode = #tpu.pipeline_mode<synchronous>, transform_indices = @transform_4, window_bounds = array<i64: 64, 256>}, {pipeline_mode = #tpu.pipeline_mode<synchronous>, transform_indices = @transform_5, window_bounds = array<i64: 1, 256>}, {pipeline_mode = #tpu.pipeline_mode<synchronous>, transform_indices = @transform_6, window_bounds = array<i64: 256, 32>}, {pipeline_mode = #tpu.pipeline_mode<synchronous>, transform_indices = @transform_7, window_bounds = array<i64: 64, 32>}, {pipeline_mode = #tpu.pipeline_mode<synchronous>, transform_indices = @transform_8, window_bounds = array<i64: 1, 32>}, {transform_indices = @transform_9, window_bounds = array<i64: 512, 32>}]} {
    %c0 = arith.constant 0 : index
    %c0_0 = arith.constant 0 : index
    %0 = vector.load %arg1[%c0, %c0_0] : memref<512x16xf32, #tpu.memory_space<vmem>>, vector<512x16xf32>
    %c0_1 = arith.constant 0 : index
    %c0_2 = arith.constant 0 : index
    %1 = vector.load %arg3[%c0_1, %c0_2] : memref<16x256xf32, #tpu.memory_space<vmem>>, vector<16x256xf32>
    %cst = arith.constant dense<0.000000e+00> : vector<512x256xf32>
    %2 = tpu.matmul %0, %1, %cst {dimension_numbers = #tpu.dot_dimension_numbers<[1], [0], [0], [1], [0, 0, 1, 1], [], []>} : vector<512x16xf32>, vector<16x256xf32>, vector<512x256xf32> -> vector<512x256xf32>
    %c0_3 = arith.constant 0 : index
    %c0_4 = arith.constant 0 : index
    %3 = vector.load %arg4[%c0_3, %c0_4] : memref<1x256xf32, #tpu.memory_space<vmem>>, vector<1x256xf32>
    %4 = vector.broadcast %3 : vector<1x256xf32> to vector<512x256xf32>
    %5 = arith.addf %2, %4 : vector<512x256xf32>
    %c0_5 = arith.constant 0 : index
    %c0_6 = arith.constant 0 : index
    %6 = vector.load %arg2[%c0_5, %c0_6] : memref<512x64xf32, #tpu.memory_space<vmem>>, vector<512x64xf32>
    %c0_7 = arith.constant 0 : index
    %c0_8 = arith.constant 0 : index
    %7 = vector.load %arg5[%c0_7, %c0_8] : memref<64x256xf32, #tpu.memory_space<vmem>>, vector<64x256xf32>
    %cst_9 = arith.constant dense<0.000000e+00> : vector<512x256xf32>
    %8 = tpu.matmul %6, %7, %cst_9 {dimension_numbers = #tpu.dot_dimension_numbers<[1], [0], [0], [1], [0, 0, 1, 1], [], []>} : vector<512x64xf32>, vector<64x256xf32>, vector<512x256xf32> -> vector<512x256xf32>
    %c0_10 = arith.constant 0 : index
    %c0_11 = arith.constant 0 : index
    %9 = vector.load %arg6[%c0_10, %c0_11] : memref<1x256xf32, #tpu.memory_space<vmem>>, vector<1x256xf32>
    %10 = vector.broadcast %9 : vector<1x256xf32> to vector<512x256xf32>
    %11 = arith.addf %8, %10 : vector<512x256xf32>
    %12 = arith.mulf %5, %11 : vector<512x256xf32>
    %c0_12 = arith.constant 0 : index
    %c0_13 = arith.constant 0 : index
    %13 = vector.load %arg7[%c0_12, %c0_13] : memref<256x32xf32, #tpu.memory_space<vmem>>, vector<256x32xf32>
    %cst_14 = arith.constant dense<0.000000e+00> : vector<512x32xf32>
    %14 = tpu.matmul %12, %13, %cst_14 {dimension_numbers = #tpu.dot_dimension_numbers<[1], [0], [0], [1], [0, 0, 1, 1], [], []>} : vector<512x256xf32>, vector<256x32xf32>, vector<512x32xf32> -> vector<512x32xf32>
    %c0_15 = arith.constant 0 : index
    %c0_16 = arith.constant 0 : index
    %15 = vector.load %arg2[%c0_15, %c0_16] : memref<512x64xf32, #tpu.memory_space<vmem>>, vector<512x64xf32>
    %c0_17 = arith.constant 0 : index
    %c0_18 = arith.constant 0 : index
    %16 = vector.load %arg8[%c0_17, %c0_18] : memref<64x32xf32, #tpu.memory_space<vmem>>, vector<64x32xf32>
    %cst_19 = arith.constant dense<0.000000e+00> : vector<512x32xf32>
    %17 = tpu.matmul %15, %16, %cst_19 {dimension_numbers = #tpu.dot_dimension_numbers<[1], [0], [0], [1], [0, 0, 1, 1], [], []>} : vector<512x64xf32>, vector<64x32xf32>, vector<512x32xf32> -> vector<512x32xf32>
    %18 = arith.addf %14, %17 : vector<512x32xf32>
    %c0_20 = arith.constant 0 : index
    %c0_21 = arith.constant 0 : index
    %19 = vector.load %arg9[%c0_20, %c0_21] : memref<1x32xf32, #tpu.memory_space<vmem>>, vector<1x32xf32>
    %20 = vector.broadcast %19 : vector<1x32xf32> to vector<512x32xf32>
    %21 = arith.addf %18, %20 : vector<512x32xf32>
    %c0_22 = arith.constant 0 : index
    %c0_23 = arith.constant 0 : index
    %22 = vector.load %arg10[%c0_22, %c0_23] : memref<512x32xf32, #tpu.memory_space<vmem>>, vector<512x32xf32>
    tpu.vector_store %arg10[%c0_22, %c0_23], %21 {strides = array<i32>} : memref<512x32xf32, #tpu.memory_space<vmem>>, vector<512x32xf32>,
    return
  }
  func.func @transform_0(%arg0: i32) -> (i32, i32) {
    %c0_i32 = arith.constant 0 : i32
    %c0_i32_0 = arith.constant 0 : i32
    return %arg0, %c0_i32 : i32, i32
  }
  func.func @transform_1(%arg0: i32) -> (i32, i32) {
    %c0_i32 = arith.constant 0 : i32
    %c0_i32_0 = arith.constant 0 : i32
    return %arg0, %c0_i32 : i32, i32
  }
  func.func @transform_2(%arg0: i32) -> (i32, i32) {
    %c0_i32 = arith.constant 0 : i32
    %c0_i32_0 = arith.constant 0 : i32
    %c0_i32_1 = arith.constant 0 : i32
    return %c0_i32, %c0_i32_0 : i32, i32
  }
  func.func @transform_3(%arg0: i32) -> (i32, i32) {
    %c0_i32 = arith.constant 0 : i32
    %c0_i32_0 = arith.constant 0 : i32
    %c0_i32_1 = arith.constant 0 : i32
    return %c0_i32, %c0_i32_0 : i32, i32
  }
  func.func @transform_4(%arg0: i32) -> (i32, i32) {
    %c0_i32 = arith.constant 0 : i32
    %c0_i32_0 = arith.constant 0 : i32
    %c0_i32_1 = arith.constant 0 : i32
    return %c0_i32, %c0_i32_0 : i32, i32
  }
  func.func @transform_5(%arg0: i32) -> (i32, i32) {
    %c0_i32 = arith.constant 0 : i32
    %c0_i32_0 = arith.constant 0 : i32
    %c0_i32_1 = arith.constant 0 : i32
    return %c0_i32, %c0_i32_0 : i32, i32
  }
  func.func @transform_6(%arg0: i32) -> (i32, i32) {
    %c0_i32 = arith.constant 0 : i32
    %c0_i32_0 = arith.constant 0 : i32
    %c0_i32_1 = arith.constant 0 : i32
    return %c0_i32, %c0_i32_0 : i32, i32
  }
  func.func @transform_7(%arg0: i32) -> (i32, i32) {
    %c0_i32 = arith.constant 0 : i32
    %c0_i32_0 = arith.constant 0 : i32
    %c0_i32_1 = arith.constant 0 : i32
    return %c0_i32, %c0_i32_0 : i32, i32
  }
  func.func @transform_8(%arg0: i32) -> (i32, i32) {
    %c0_i32 = arith.constant 0 : i32
    %c0_i32_0 = arith.constant 0 : i32
    %c0_i32_1 = arith.constant 0 : i32
    return %c0_i32, %c0_i32_0 : i32, i32
  }
  func.func @transform_9(%arg0: i32) -> (i32, i32) {
    %c0_i32 = arith.constant 0 : i32
    %c0_i32_0 = arith.constant 0 : i32
    return %arg0, %c0_i32 : i32, i32
  }
}

</mosaic_0001>

<bundles_post_ra>
// kernel: tpu_custom_call.1
= control target key start
LH: loop header
LB: loop body
LE: loop exit
PB: predicated region body
PF: predicated region fallthrough
CT: control target
= control target key end

     0   :  { %v5454_v3 = vmov 0.0   ;;  %vm112_vm0 = vcmask 130048   ;;  %vm846_vm1 = vcmask 523264   ;;  %vm2497_vm2 = vcmask 261120   ;;  %s5444_s2 = inlined_call_operand.vmem [shape: f32[16,256], index: 2, kind: input, shape index: {}]   ;;  %s5445_s0 = inlined_call_operand.vmem [shape: f32[512,16], index: 0, kind: input, shape index: {}]   ;;  %s5446_s4 = inlined_call_operand.vmem [shape: f32[64,256], index: 4, kind: input, shape index: {}]   ;;  %s5447_s1 = inlined_call_operand.vmem [shape: f32[512,64], index: 1, kind: input, shape index: {}]   ;;  %s5448_s6 = inlined_call_operand.vmem [shape: f32[256,32], index: 6, kind: input, shape index: {}]   ;;  %s5449_s7 = inlined_call_operand.vmem [shape: f32[64,32], index: 7, kind: input, shape index: {}]   ;;  %s5450_s3 = inlined_call_operand.vmem [shape: f32[1,256], index: 3, kind: input, shape index: {}]   ;;  %s5451_s5 = inlined_call_operand.vmem [shape: f32[1,256], index: 5, kind: input, shape index: {}]   ;;  %s5452_s8 = inlined_call_operand.vmem [shape: f32[1,32], index: 8, kind: input, shape index: {}]   ;;  %s5453_s9 = inlined_call_operand.vmem [shape: f32[512,32], index: 9, kind: output, shape index: {}]  }
   0x1   :  { %v99_v0 = vld [vmem:[%s5444_s2 + $0x18] sm:$0xff]  ;;  %v98_v1 = vld [vmem:[%s5444_s2 + $0x10] sm:$0xff]  ;;  %v97_v2 = vld [vmem:[%s5444_s2 + $0x8] sm:$0xff]  ;;  %369 = vmatprep.mubr.f32.mxu0 %v5454_v3  ;;  %1205 = vmatprep.mubr.f32.mxu1 %v5454_v3 }
   0x2   :  { %333 = vmatprep.subr.mxu0 %v99_v0  ;;  %v96_v4 = vld [vmem:[%s5444_s2] sm:$0xff]  ;;  %v833_v5 = vld [vmem:[%s5446_s4 + $0x78] sm:$0xff]  ;;  %v832_v7 = vld [vmem:[%s5446_s4 + $0x70] sm:$0xff] }
   0x3   :  { %334 = vmatpush1.msra.mxu0 %v98_v1  ;;  %v32_v6 = vld [vmem:[%s5445_s0] sm:$0xff]  ;;  %2943 = vmatprep.subr.mxu1 %v833_v5  ;;  %v831_v8 = vld [vmem:[%s5446_s4 + $0x68] sm:$0xff]  ;;  %v829_v11 = vld [vmem:[%s5446_s4 + $0x58] sm:$0xff] }
   0x4   :  { %335 = vmatprep.subr.mxu0 %v97_v2  ;;  %2951 = vmatpush1.msra.mxu1 %v832_v7  ;;  %v830_v9 = vld [vmem:[%s5446_s4 + $0x60] sm:$0xff]  ;;  %v33_v10 = vld [vmem:[%s5445_s0 + $0x8] sm:$0xff]  ;;  %v828_v12 = vld [vmem:[%s5446_s4 + $0x50] sm:$0xff] }
   0x5   :  { %336 = vmatpush1.msra.mxu0 %v96_v4  ;;  %2944 = vmatprep.subr.mxu1 %v831_v8  ;;  %v827_v13 = vld [vmem:[%s5446_s4 + $0x48] sm:$0xff]  ;;  %v826_v14 = vld [vmem:[%s5446_s4 + $0x40] sm:$0xff]  ;;  %v34_v15 = vld [vmem:[%s5445_s0 + $0x10] sm:$0xff] }
   0x6   :  { %2566 = vmatmul.mubr.msk.f32.vlgmr.msra.gmra.mxu0 %vm112_vm0, %v32_v6  ;;  %1055 = vmatprep.subr.mxu0 %v833_v5  ;;  %v825_v16 = vld [vmem:[%s5446_s4 + $0x38] sm:$0xff]  ;;  %v824_v17 = vld [vmem:[%s5446_s4 + $0x30] sm:$0xff]  ;;  %v823_v18 = vld [vmem:[%s5446_s4 + $0x28] sm:$0xff] }
   0x7   :  { %1056 = vmatpush1.msra.mxu0 %v832_v7  ;;  %375 = vmatprep.mubr.f32.mxu0 %v5454_v3  ;;  %v822_v19 = vld [vmem:[%s5446_s4 + $0x20] sm:$0xff]  ;;  %v35_v20 = vld [vmem:[%s5445_s0 + $0x18] sm:$0xff]  ;;  %v820_v22 = vld [vmem:[%s5446_s4 + $0x10] sm:$0xff] }
   0x8   :  { %1057 = vmatprep.subr.mxu0 %v831_v8  ;;  %2952 = vmatpush1.msra.mxu1 %v830_v9  ;;  %v821_v21 = vld [vmem:[%s5446_s4 + $0x18] sm:$0xff]  ;;  %v819_v23 = vld [vmem:[%s5446_s4 + $0x8] sm:$0xff]  ;;  %v818_v24 = vld [vmem:[%s5446_s4] sm:$0xff] }
   0x9   :  { %1058 = vmatpush1.msra.mxu0 %v830_v9  ;;  %2945 = vmatprep.subr.mxu1 %v829_v11  ;;  %v36_v25 = vld [vmem:[%s5445_s0 + $0x20] sm:$0xff]  ;;  %v771_v26 = vld [vmem:[%s5447_s1 + $0x88] sm:$0xff]  ;;  %v772_v28 = vld [vmem:[%s5447_s1 + $0x90] sm:$0xff] }
   0xa   :  { %2567 = vmatmul.mubr.msk.f32.gmra.mxu0 %vm112_vm0, %v33_v10  ;;  %2953 = vmatpush1.msra.mxu1 %v828_v12  ;;  %v37_v27 = vld [vmem:[%s5445_s0 + $0x28] sm:$0xff]  ;;  %v38_v29 = vld [vmem:[%s5445_s0 + $0x30] sm:$0xff]  ;;  %v773_v30 = vld [vmem:[%s5447_s1 + $0x98] sm:$0xff] }
   0xb   :  { %381 = vmatprep.mubr.f32.mxu0 %v5454_v3  ;;  %2946 = vmatprep.subr.mxu1 %v827_v13  ;;  %v39_v31 = vld [vmem:[%s5445_s0 + $0x38] sm:$0xff]  ;;  %v774_v32 = vld [vmem:[%s5447_s1 + $0xa0] sm:$0xff]  ;;  %v775_v34 = vld [vmem:[%s5447_s1 + $0xa8] sm:$0xff] }
   0xc   :  { %1059 = vmatprep.subr.mxu0 %v829_v11  ;;  %2954 = vmatpush1.msra.mxu1 %v826_v14  ;;  %v40_v33 = vld [vmem:[%s5445_s0 + $0x40] sm:$0xff]  ;;  %v41_v35 = vld [vmem:[%s5445_s0 + $0x48] sm:$0xff]  ;;  %v776_v36 = vld [vmem:[%s5447_s1 + $0xb0] sm:$0xff] }
   0xd   :  { %1060 = vmatpush1.msra.mxu0 %v828_v12  ;;  %2947 = vmatprep.subr.mxu1 %v825_v16  ;;  %v42_v37 = vld [vmem:[%s5445_s0 + $0x50] sm:$0xff]  ;;  %v777_v38 = vld [vmem:[%s5447_s1 + $0xb8] sm:$0xff]  ;;  %v778_v40 = vld [vmem:[%s5447_s1 + $0xc0] sm:$0xff] }
   0xe   :  { %2568 = vmatmul.mubr.msk.f32.gmra.mxu0 %vm112_vm0, %v34_v15  ;;  %2955 = vmatpush1.msra.mxu1 %v824_v17  ;;  %v43_v39 = vld [vmem:[%s5445_s0 + $0x58] sm:$0xff]  ;;  %v44_v41 = vld [vmem:[%s5445_s0 + $0x60] sm:$0xff]  ;;  %v779_v42 = vld [vmem:[%s5447_s1 + $0xc8] sm:$0xff] }
   0xf   :  { %387 = vmatprep.mubr.f32.mxu0 %v5454_v3  ;;  %2948 = vmatprep.subr.mxu1 %v823_v18  ;;  %v45_v43 = vld [vmem:[%s5445_s0 + $0x68] sm:$0xff]  ;;  %v780_v44 = vld [vmem:[%s5447_s1 + $0xd0] sm:$0xff]  ;;  %v781_v46 = vld [vmem:[%s5447_s1 + $0xd8] sm:$0xff] }
  0x10   :  { %1061 = vmatprep.subr.mxu0 %v827_v13  ;;  %2956 = vmatpush1.msra.mxu1 %v822_v19  ;;  %v46_v45 = vld [vmem:[%s5445_s0 + $0x70] sm:$0xff]  ;;  %v47_v47 = vld [vmem:[%s5445_s0 + $0x78] sm:$0xff]  ;;  %v782_v48 = vld [vmem:[%s5447_s1 + $0xe0] sm:$0xff] }
  0x11   :  { %1062 = vmatpush1.msra.mxu0 %v826_v14  ;;  %2949 = vmatprep.subr.mxu1 %v821_v21  ;;  %v48_v49 = vld [vmem:[%s5445_s0 + $0x80] sm:$0xff]  ;;  %v783_v50 = vld [vmem:[%s5447_s1 + $0xe8] sm:$0xff]  ;;  %v784_v52 = vld [vmem:[%s5447_s1 + $0xf0] sm:$0xff] }
  0x12   :  { %2569 = vmatmul.mubr.msk.f32.gmra.mxu0 %vm112_vm0, %v35_v20  ;;  %2957 = vmatpush1.msra.mxu1 %v820_v22  ;;  %v49_v51 = vld [vmem:[%s5445_s0 + $0x88] sm:$0xff]  ;;  %v50_v53 = vld [vmem:[%s5445_s0 + $0x90] sm:$0xff]  ;;  %v785_v54 = vld [vmem:[%s5447_s1 + $0xf8] sm:$0xff] }
  0x13   :  { %393 = vmatprep.mubr.f32.mxu0 %v5454_v3  ;;  %2950 = vmatprep.subr.mxu1 %v819_v23  ;;  %v51_v55 = vld [vmem:[%s5445_s0 + $0x98] sm:$0xff]  ;;  %v786_v56 = vld [vmem:[%s5447_s1 + $0x100] sm:$0xff]  ;;  %v787_v58 = vld [vmem:[%s5447_s1 + $0x108] sm:$0xff] }
  0x14   :  { %1063 = vmatprep.subr.mxu0 %v825_v16  ;;  %2958 = vmatpush1.msra.mxu1 %v818_v24  ;;  %v52_v57 = vld [vmem:[%s5445_s0 + $0xa0] sm:$0xff]  ;;  %v53_v59 = vld [vmem:[%s5445_s0 + $0xa8] sm:$0xff]  ;;  %v788_v60 = vld [vmem:[%s5447_s1 + $0x110] sm:$0xff] }
  0x15   :  { %1064 = vmatpush1.msra.mxu0 %v824_v17  ;;  %2647 = vmatmul.mubr.msk.f32.vlgmr.msra.gmra.mxu1 %vm846_vm1, %v771_v26  ;;  %v54_v61 = vld [vmem:[%s5445_s0 + $0xb0] sm:$0xff]  ;;  %v789_v62 = vld [vmem:[%s5447_s1 + $0x118] sm:$0xff]  ;;  %v790_v0 = vld [vmem:[%s5447_s1 + $0x120] sm:$0xff] }
  0x16   :  { %2570 = vmatmul.mubr.msk.f32.gmra.mxu0 %vm112_vm0, %v36_v25  ;;  %1211 = vmatprep.mubr.f32.mxu1 %v5454_v3  ;;  %v55_v63 = vld [vmem:[%s5445_s0 + $0xb8] sm:$0xff]  ;;  %v56_v1 = vld [vmem:[%s5445_s0 + $0xc0] sm:$0xff]  ;;  %v791_v2 = vld [vmem:[%s5447_s1 + $0x128] sm:$0xff] }
  0x17   :  { %399 = vmatprep.mubr.f32.mxu0 %v5454_v3  ;;  %1065 = vmatprep.subr.mxu0 %v823_v18  ;;  %v57_v4 = vld [vmem:[%s5445_s0 + $0xc8] sm:$0xff]  ;;  %v792_v5 = vld [vmem:[%s5447_s1 + $0x130] sm:$0xff]  ;;  %v793_v7 = vld [vmem:[%s5447_s1 + $0x138] sm:$0xff] }
  0x18   :  { %2041 = vmatprep.subr.mxu1 %v5454_v3  ;;  %1066 = vmatpush1.msra.mxu0 %v822_v19  ;;  %v58_v6 = vld [vmem:[%s5445_s0 + $0xd0] sm:$0xff]  ;;  %v59_v8 = vld [vmem:[%s5445_s0 + $0xd8] sm:$0xff]  ;;  %v794_v9 = vld [vmem:[%s5447_s1 + $0x140] sm:$0xff] }
  0x19   :  { %2648 = vmatmul.mubr.msk.f32.gmra.mxu1 %vm846_vm1, %v772_v28  ;;  %1067 = vmatprep.subr.mxu0 %v821_v21  ;;  %v60_v10 = vld [vmem:[%s5445_s0 + $0xe0] sm:$0xff]  ;;  %v795_v11 = vld [vmem:[%s5447_s1 + $0x148] sm:$0xff]  ;;  %v796_v13 = vld [vmem:[%s5447_s1 + $0x150] sm:$0xff] }
  0x1a   :  { %2571 = vmatmul.mubr.msk.f32.gmra.mxu0 %vm112_vm0, %v37_v27  ;;  %1217 = vmatprep.mubr.f32.mxu1 %v5454_v3  ;;  %v61_v12 = vld [vmem:[%s5445_s0 + $0xe8] sm:$0xff]  ;;  %v62_v14 = vld [vmem:[%s5445_s0 + $0xf0] sm:$0xff]  ;;  %v797_v15 = vld [vmem:[%s5447_s1 + $0x158] sm:$0xff] }
  0x1b   :  { %405 = vmatprep.mubr.f32.mxu0 %v5454_v3  ;;  %1068 = vmatpush1.msra.mxu0 %v820_v22  ;;  %v63_v16 = vld [vmem:[%s5445_s0 + $0xf8] sm:$0xff]  ;;  %v798_v17 = vld [vmem:[%s5447_s1 + $0x160] sm:$0xff]  ;;  %v799_v19 = vld [vmem:[%s5447_s1 + $0x168] sm:$0xff] }
  0x1c   :  { %1069 = vmatprep.subr.mxu0 %v819_v23  ;;  %v64_v18 = vld [vmem:[%s5445_s0 + $0x100] sm:$0xff]  ;;  %v65_v20 = vld [vmem:[%s5445_s0 + $0x108] sm:$0xff]  ;;  %v3419_v21 = vld [vmem:[%s5447_s1 + $0x170] sm:$0xff] }
  0x1d   :  { %2649 = vmatmul.mubr.msk.f32.gmra.mxu1 %vm846_vm1, %v773_v30  ;;  %1070 = vmatpush1.msra.mxu0 %v818_v24  ;;  %v66_v22 = vld [vmem:[%s5445_s0 + $0x110] sm:$0xff]  ;;  %v3432_v23 = vld [vmem:[%s5447_s1 + $0x178] sm:$0xff]  ;;  %v3445_v25 = vld [vmem:[%s5447_s1 + $0x180] sm:$0xff] }
  0x1e   :  { %2572 = vmatmul.mubr.msk.f32.gmra.mxu0 %vm112_vm0, %v38_v29  ;;  %1223 = vmatprep.mubr.f32.mxu1 %v5454_v3  ;;  %v67_v24 = vld [vmem:[%s5445_s0 + $0x118] sm:$0xff]  ;;  %v68_v26 = vld [vmem:[%s5445_s0 + $0x120] sm:$0xff]  ;;  %v3458_v27 = vld [vmem:[%s5447_s1 + $0x188] sm:$0xff] }
  0x1f   :  { %411 = vmatprep.mubr.f32.mxu0 %v5454_v3  ;;  %v1631_v28 = vld [vmem:[%s5448_s6 + $0x78] sm:$0xff]  ;;  %v69_v29 = vld [vmem:[%s5445_s0 + $0x128] sm:$0xff]  ;;  %v3474_v30 = vld [vmem:[%s5447_s1 + $0x190] sm:$0xff] }
  0x20   :  { %2042 = vmatpush1.msra.mxu1 %v1631_v28 }
  0x21   :  { %2650 = vmatmul.mubr.msk.f32.gmra.mxu1 %vm846_vm1, %v774_v32  ;;  %2043 = vmatprep.subr.mxu1 %v5454_v3  ;;  %v3488_v32 = vld [vmem:[%s5447_s1 + $0x198] sm:$0xff] }
  0x22   :  { %2573 = vmatmul.mubr.msk.f32.gmra.mxu0 %vm112_vm0, %v39_v31  ;;  %1229 = vmatprep.mubr.f32.mxu1 %v5454_v3  ;;  %v70_v31 = vld [vmem:[%s5445_s0 + $0x130] sm:$0xff] }
  0x23   :  { %417 = vmatprep.mubr.f32.mxu0 %v5454_v3 }
  0x25   :  { %2651 = vmatmul.mubr.msk.f32.gmra.mxu1 %vm846_vm1, %v775_v34  ;;  %v71_v34 = vld [vmem:[%s5445_s0 + $0x138] sm:$0xff] }
  0x26   :  { %2574 = vmatmul.mubr.msk.f32.gmra.mxu0 %vm112_vm0, %v40_v33  ;;  %1235 = vmatprep.mubr.f32.mxu1 %v5454_v3  ;;  %v1630_v33 = vld [vmem:[%s5448_s6 + $0x70] sm:$0xff] }
  0x27   :  { %423 = vmatprep.mubr.f32.mxu0 %v5454_v3  ;;  %2044 = vmatpush1.msra.mxu1 %v1630_v33  ;;  %v1618_v33 = vld [vmem:[%s5448_s6 + $0x10] sm:$0xff] }
  0x28   :  { %2045 = vmatprep.subr.mxu1 %v5454_v3 }
  0x29   :  { %2652 = vmatmul.mubr.msk.f32.gmra.mxu1 %vm846_vm1, %v776_v36  ;;  %v1629_v36 = vld [vmem:[%s5448_s6 + $0x68] sm:$0xff] }
  0x2a   :  { %2575 = vmatmul.mubr.msk.f32.gmra.mxu0 %vm112_vm0, %v41_v35  ;;  %1241 = vmatprep.mubr.f32.mxu1 %v5454_v3  ;;  %v3505_v35 = vld [vmem:[%s5447_s1 + $0x1a0] sm:$0xff] }
  0x2b   :  { %429 = vmatprep.mubr.f32.mxu0 %v5454_v3  ;;  %2046 = vmatpush1.msra.mxu1 %v1629_v36 }
  0x2c   :  { %2047 = vmatprep.subr.mxu1 %v5454_v3 }
  0x2d   :  { %2653 = vmatmul.mubr.msk.f32.gmra.mxu1 %vm846_vm1, %v777_v38  ;;  %v3521_v38 = vld [vmem:[%s5447_s1 + $0x1a8] sm:$0xff] }
  0x2e   :  { %2576 = vmatmul.mubr.msk.f32.gmra.mxu0 %vm112_vm0, %v42_v37  ;;  %1247 = vmatprep.mubr.f32.mxu1 %v5454_v3  ;;  %v72_v37 = vld [vmem:[%s5445_s0 + $0x140] sm:$0xff] }
  0x2f   :  { %435 = vmatprep.mubr.f32.mxu0 %v5454_v3 }
  0x31   :  { %2654 = vmatmul.mubr.msk.f32.gmra.mxu1 %vm846_vm1, %v778_v40  ;;  %v3535_v40 = vld [vmem:[%s5447_s1 + $0x1b0] sm:$0xff] }
  0x32   :  { %2577 = vmatmul.mubr.msk.f32.gmra.mxu0 %vm112_vm0, %v43_v39  ;;  %1253 = vmatprep.mubr.f32.mxu1 %v5454_v3  ;;  %v73_v39 = vld [vmem:[%s5445_s0 + $0x148] sm:$0xff] }
  0x33   :  { %441 = vmatprep.mubr.f32.mxu0 %v5454_v3 }
  0x35   :  { %2655 = vmatmul.mubr.msk.f32.gmra.mxu1 %vm846_vm1, %v779_v42  ;;  %v74_v42 = vld [vmem:[%s5445_s0 + $0x150] sm:$0xff] }
  0x36   :  { %2578 = vmatmul.mubr.msk.f32.gmra.mxu0 %vm112_vm0, %v44_v41  ;;  %1259 = vmatprep.mubr.f32.mxu1 %v5454_v3  ;;  %v1628_v41 = vld [vmem:[%s5448_s6 + $0x60] sm:$0xff] }
  0x37   :  { %447 = vmatprep.mubr.f32.mxu0 %v5454_v3  ;;  %2048 = vmatpush1.msra.mxu1 %v1628_v41  ;;  %v1617_v41 = vld [vmem:[%s5448_s6 + $0x8] sm:$0xff] }
  0x38   :  { %2049 = vmatprep.subr.mxu1 %v5454_v3 }
  0x39   :  { %2656 = vmatmul.mubr.msk.f32.gmra.mxu1 %vm846_vm1, %v780_v44  ;;  %v1627_v44 = vld [vmem:[%s5448_s6 + $0x58] sm:$0xff] }
  0x3a   :  { %2579 = vmatmul.mubr.msk.f32.gmra.mxu0 %vm112_vm0, %v45_v43  ;;  %1265 = vmatprep.mubr.f32.mxu1 %v5454_v3  ;;  %v3552_v43 = vld [vmem:[%s5447_s1 + $0x1b8] sm:$0xff] }
  0x3b   :  { %453 = vmatprep.mubr.f32.mxu0 %v5454_v3  ;;  %2050 = vmatpush1.msra.mxu1 %v1627_v44  ;;  %v90_v44 = vld [vmem:[%s5445_s0 + $0x1d0] sm:$0xff] }
  0x3c   :  { %2051 = vmatprep.subr.mxu1 %v5454_v3 }
  0x3d   :  { %2657 = vmatmul.mubr.msk.f32.gmra.mxu1 %vm846_vm1, %v781_v46  ;;  %v3568_v46 = vld [vmem:[%s5447_s1 + $0x1c0] sm:$0xff] }
  0x3e   :  { %2580 = vmatmul.mubr.msk.f32.gmra.mxu0 %vm112_vm0, %v46_v45  ;;  %1271 = vmatprep.mubr.f32.mxu1 %v5454_v3  ;;  %v75_v45 = vld [vmem:[%s5445_s0 + $0x158] sm:$0xff] }
  0x3f   :  { %459 = vmatprep.mubr.f32.mxu0 %v5454_v3 }
  0x41   :  { %2658 = vmatmul.mubr.msk.f32.gmra.mxu1 %vm846_vm1, %v782_v48  ;;  %v3582_v48 = vld [vmem:[%s5447_s1 + $0x1c8] sm:$0xff] }
  0x42   :  { %2581 = vmatmul.mubr.msk.f32.gmra.mxu0 %vm112_vm0, %v47_v47  ;;  %1277 = vmatprep.mubr.f32.mxu1 %v5454_v3  ;;  %v76_v47 = vld [vmem:[%s5445_s0 + $0x160] sm:$0xff] }
  0x43   :  { %465 = vmatprep.mubr.f32.mxu0 %v5454_v3 }
  0x45   :  { %2659 = vmatmul.mubr.msk.f32.gmra.mxu1 %vm846_vm1, %v783_v50  ;;  %v77_v50 = vld [vmem:[%s5445_s0 + $0x168] sm:$0xff] }
  0x46   :  { %2582 = vmatmul.mubr.msk.f32.gmra.mxu0 %vm112_vm0, %v48_v49  ;;  %1283 = vmatprep.mubr.f32.mxu1 %v5454_v3  ;;  %v1626_v49 = vld [vmem:[%s5448_s6 + $0x50] sm:$0xff] }
  0x47   :  { %471 = vmatprep.mubr.f32.mxu0 %v5454_v3  ;;  %2052 = vmatpush1.msra.mxu1 %v1626_v49  ;;  %v91_v49 = vld [vmem:[%s5445_s0 + $0x1d8] sm:$0xff] }
  0x48   :  { %2053 = vmatprep.subr.mxu1 %v5454_v3 }
  0x49   :  { %2660 = vmatmul.mubr.msk.f32.gmra.mxu1 %vm846_vm1, %v784_v52  ;;  %v1625_v52 = vld [vmem:[%s5448_s6 + $0x48] sm:$0xff] }
  0x4a   :  { %2583 = vmatmul.mubr.msk.f32.gmra.mxu0 %vm112_vm0, %v49_v51  ;;  %1289 = vmatprep.mubr.f32.mxu1 %v5454_v3  ;;  %v3599_v51 = vld [vmem:[%s5447_s1 + $0x1d0] sm:$0xff] }
  0x4b   :  { %477 = vmatprep.mubr.f32.mxu0 %v5454_v3  ;;  %2054 = vmatpush1.msra.mxu1 %v1625_v52 }
  0x4c   :  { %2055 = vmatprep.subr.mxu1 %v5454_v3 }
  0x4d   :  { %2661 = vmatmul.mubr.msk.f32.gmra.mxu1 %vm846_vm1, %v785_v54  ;;  %v3615_v54 = vld [vmem:[%s5447_s1 + $0x1d8] sm:$0xff] }
  0x4e   :  { %2584 = vmatmul.mubr.msk.f32.gmra.mxu0 %vm112_vm0, %v50_v53  ;;  %1295 = vmatprep.mubr.f32.mxu1 %v5454_v3  ;;  %v78_v53 = vld [vmem:[%s5445_s0 + $0x170] sm:$0xff] }
  0x4f   :  { %483 = vmatprep.mubr.f32.mxu0 %v5454_v3 }
  0x51   :  { %2662 = vmatmul.mubr.msk.f32.gmra.mxu1 %vm846_vm1, %v786_v56  ;;  %v3629_v56 = vld [vmem:[%s5447_s1 + $0x1e0] sm:$0xff] }
  0x52   :  { %2585 = vmatmul.mubr.msk.f32.gmra.mxu0 %vm112_vm0, %v51_v55  ;;  %1301 = vmatprep.mubr.f32.mxu1 %v5454_v3  ;;  %v79_v55 = vld [vmem:[%s5445_s0 + $0x178] sm:$0xff] }
  0x53   :  { %489 = vmatprep.mubr.f32.mxu0 %v5454_v3 }
  0x55   :  { %2663 = vmatmul.mubr.msk.f32.gmra.mxu1 %vm846_vm1, %v787_v58  ;;  %v80_v58 = vld [vmem:[%s5445_s0 + $0x180] sm:$0xff] }
  0x56   :  { %2586 = vmatmul.mubr.msk.f32.gmra.mxu0 %vm112_vm0, %v52_v57  ;;  %1307 = vmatprep.mubr.f32.mxu1 %v5454_v3  ;;  %v1624_v57 = vld [vmem:[%s5448_s6 + $0x40] sm:$0xff] }
  0x57   :  { %495 = vmatprep.mubr.f32.mxu0 %v5454_v3  ;;  %2056 = vmatpush1.msra.mxu1 %v1624_v57  ;;  %v1647_v57 = vld [vmem:[%s5448_s6 + $0xf8] sm:$0xff] }
  0x58   :  { %2057 = vmatprep.subr.mxu1 %v5454_v3 }
  0x59   :  { %2664 = vmatmul.mubr.msk.f32.gmra.mxu1 %vm846_vm1, %v788_v60  ;;  %v1623_v60 = vld [vmem:[%s5448_s6 + $0x38] sm:$0xff] }
  0x5a   :  { %2587 = vmatmul.mubr.msk.f32.gmra.mxu0 %vm112_vm0, %v53_v59  ;;  %1313 = vmatprep.mubr.f32.mxu1 %v5454_v3  ;;  %v3646_v59 = vld [vmem:[%s5447_s1 + $0x1e8] sm:$0xff] }
  0x5b   :  { %501 = vmatprep.mubr.f32.mxu0 %v5454_v3  ;;  %2058 = vmatpush1.msra.mxu1 %v1623_v60 }
  0x5c   :  { %2059 = vmatprep.subr.mxu1 %v5454_v3 }
  0x5d   :  { %2665 = vmatmul.mubr.msk.f32.gmra.mxu1 %vm846_vm1, %v789_v62  ;;  %v81_v62 = vld [vmem:[%s5445_s0 + $0x188] sm:$0xff] }
  0x5e   :  { %2588 = vmatmul.mubr.msk.f32.gmra.mxu0 %vm112_vm0, %v54_v61  ;;  %1319 = vmatprep.mubr.f32.mxu1 %v5454_v3 }
  0x5f   :  { %507 = vmatprep.mubr.f32.mxu0 %v5454_v3 }
  0x61   :  { %2666 = vmatmul.mubr.msk.f32.gmra.mxu1 %vm846_vm1, %v790_v0 }
  0x62   :  { %2589 = vmatmul.mubr.msk.f32.gmra.mxu0 %vm112_vm0, %v55_v63  ;;  %1325 = vmatprep.mubr.f32.mxu1 %v5454_v3  ;;  %v3664_v63 = vld [vmem:[%s5447_s1 + $0x1f0] sm:$0xff] }
  0x63   :  { %513 = vmatprep.mubr.f32.mxu0 %v5454_v3 }
  0x65   :  { %2667 = vmatmul.mubr.msk.f32.gmra.mxu1 %vm846_vm1, %v791_v2  ;;  %v82_v2 = vld [vmem:[%s5445_s0 + $0x190] sm:$0xff] }
  0x66   :  { %2590 = vmatmul.mubr.msk.f32.gmra.mxu0 %vm112_vm0, %v56_v1  ;;  %1331 = vmatprep.mubr.f32.mxu1 %v5454_v3 }
  0x67   :  { %519 = vmatprep.mubr.f32.mxu0 %v5454_v3 }
  0x69   :  { %2668 = vmatmul.mubr.msk.f32.gmra.mxu1 %vm846_vm1, %v792_v5  ;;  %v1622_v5 = vld [vmem:[%s5448_s6 + $0x30] sm:$0xff] }
  0x6a   :  { %2591 = vmatmul.mubr.msk.f32.gmra.mxu0 %vm112_vm0, %v57_v4  ;;  %1337 = vmatprep.mubr.f32.mxu1 %v5454_v3  ;;  %v3682_v4 = vld [vmem:[%s5447_s1 + $0x1f8] sm:$0xff] }
  0x6b   :  { %525 = vmatprep.mubr.f32.mxu0 %v5454_v3  ;;  %2060 = vmatpush1.msra.mxu1 %v1622_v5  ;;  %v1646_v5 = vld [vmem:[%s5448_s6 + $0xf0] sm:$0xff] }
  0x6c   :  { %2061 = vmatprep.subr.mxu1 %v5454_v3 }
  0x6d   :  { %2669 = vmatmul.mubr.msk.f32.gmra.mxu1 %vm846_vm1, %v793_v7 }
  0x6e   :  { %2592 = vmatmul.mubr.msk.f32.gmra.mxu0 %vm112_vm0, %v58_v6  ;;  %1343 = vmatprep.mubr.f32.mxu1 %v5454_v3 }
  0x6f   :  { %531 = vmatprep.mubr.f32.mxu0 %v5454_v3 }
  0x71   :  { %2670 = vmatmul.mubr.msk.f32.gmra.mxu1 %vm846_vm1, %v794_v9 }
  0x72   :  { %2593 = vmatmul.mubr.msk.f32.gmra.mxu0 %vm112_vm0, %v59_v8  ;;  %1349 = vmatprep.mubr.f32.mxu1 %v5454_v3  ;;  %v83_v8 = vld [vmem:[%s5445_s0 + $0x198] sm:$0xff] }
  0x73   :  { %537 = vmatprep.mubr.f32.mxu0 %v5454_v3 }
  0x75   :  { %2671 = vmatmul.mubr.msk.f32.gmra.mxu1 %vm846_vm1, %v795_v11 }
  0x76   :  { %2594 = vmatmul.mubr.msk.f32.gmra.mxu0 %vm112_vm0, %v60_v10  ;;  %1355 = vmatprep.mubr.f32.mxu1 %v5454_v3  ;;  %v1621_v10 = vld [vmem:[%s5448_s6 + $0x28] sm:$0xff] }
  0x77   :  { %543 = vmatprep.mubr.f32.mxu0 %v5454_v3  ;;  %2062 = vmatpush1.msra.mxu1 %v1621_v10  ;;  %v94_v10 = vld [vmem:[%s5445_s0 + $0x1f0] sm:$0xff] }
  0x78   :  { %2063 = vmatprep.subr.mxu1 %v5454_v3 }
  0x79   :  { %2672 = vmatmul.mubr.msk.f32.gmra.mxu1 %vm846_vm1, %v796_v13 }
  0x7a   :  { %2595 = vmatmul.mubr.msk.f32.gmra.mxu0 %vm112_vm0, %v61_v12  ;;  %1361 = vmatprep.mubr.f32.mxu1 %v5454_v3  ;;  %v84_v12 = vld [vmem:[%s5445_s0 + $0x1a0] sm:$0xff] }
  0x7b   :  { %549 = vmatprep.mubr.f32.mxu0 %v5454_v3 }
  0x7d   :  { %2673 = vmatmul.mubr.msk.f32.gmra.mxu1 %vm846_vm1, %v797_v15  ;;  %v85_v15 = vld [vmem:[%s5445_s0 + $0x1a8] sm:$0xff] }
  0x7e   :  { %2596 = vmatmul.mubr.msk.f32.gmra.mxu0 %vm112_vm0, %v62_v14  ;;  %1367 = vmatprep.mubr.f32.mxu1 %v5454_v3 }
  0x7f   :  { %555 = vmatprep.mubr.f32.mxu0 %v5454_v3 }
  0x81   :  { %2674 = vmatmul.mubr.msk.f32.gmra.mxu1 %vm846_vm1, %v798_v17 }
  0x82   :  { %2597 = vmatmul.mubr.msk.f32.gmra.mxu0 %vm112_vm0, %v63_v16  ;;  %1373 = vmatprep.mubr.f32.mxu1 %v5454_v3  ;;  %v1620_v16 = vld [vmem:[%s5448_s6 + $0x20] sm:$0xff] }
  0x83   :  { %561 = vmatprep.mubr.f32.mxu0 %v5454_v3  ;;  %2064 = vmatpush1.msra.mxu1 %v1620_v16  ;;  %v95_v16 = vld [vmem:[%s5445_s0 + $0x1f8] sm:$0xff] }
  0x84   :  { %2065 = vmatprep.subr.mxu1 %v5454_v3 }
  0x85   :  { %2675 = vmatmul.mubr.msk.f32.gmra.mxu1 %vm846_vm1, %v799_v19  ;;  %v86_v19 = vld [vmem:[%s5445_s0 + $0x1b0] sm:$0xff] }
  0x86   :  { %2598 = vmatmul.mubr.msk.f32.gmra.mxu0 %vm112_vm0, %v64_v18  ;;  %1379 = vmatprep.mubr.f32.mxu1 %v5454_v3 }
  0x87   :  { %567 = vmatprep.mubr.f32.mxu0 %v5454_v3 }
  0x89   :  { %2676 = vmatmul.mubr.msk.f32.gmra.mxu1 %vm846_vm1, %v3419_v21 }
  0x8a   :  { %2599 = vmatmul.mubr.msk.f32.gmra.mxu0 %vm112_vm0, %v65_v20  ;;  %1385 = vmatprep.mubr.f32.mxu1 %v5454_v3 }
  0x8b   :  { %573 = vmatprep.mubr.f32.mxu0 %v5454_v3 }
  0x8d   :  { %2677 = vmatmul.mubr.msk.f32.gmra.mxu1 %vm846_vm1, %v3432_v23 }
  0x8e   :  { %2600 = vmatmul.mubr.msk.f32.gmra.mxu0 %vm112_vm0, %v66_v22  ;;  %1391 = vmatprep.mubr.f32.mxu1 %v5454_v3  ;;  %v1619_v22 = vld [vmem:[%s5448_s6 + $0x18] sm:$0xff] }
  0x8f   :  { %579 = vmatprep.mubr.f32.mxu0 %v5454_v3  ;;  %2066 = vmatpush1.msra.mxu1 %v1619_v22 }
  0x90   :  { %2067 = vmatprep.subr.mxu1 %v5454_v3 }
  0x91   :  { %2678 = vmatmul.mubr.msk.f32.gmra.mxu1 %vm846_vm1, %v3445_v25 }
  0x92   :  { %2601 = vmatmul.mubr.msk.f32.gmra.mxu0 %vm112_vm0, %v67_v24  ;;  %1397 = vmatprep.mubr.f32.mxu1 %v5454_v3 }
  0x93   :  { %585 = vmatprep.mubr.f32.mxu0 %v5454_v3  ;;  %2068 = vmatpush1.msra.mxu1 %v1618_v33 }
  0x94   :  { %2069 = vmatprep.subr.mxu1 %v5454_v3 }
  0x95   :  { %2679 = vmatmul.mubr.msk.f32.gmra.mxu1 %vm846_vm1, %v3458_v27 }
  0x96   :  { %2602 = vmatmul.mubr.msk.f32.gmra.mxu0 %vm112_vm0, %v68_v26  ;;  %1403 = vmatprep.mubr.f32.mxu1 %v5454_v3  ;;  %v87_v26 = vld [vmem:[%s5445_s0 + $0x1b8] sm:$0xff] }
  0x97   :  { %591 = vmatprep.mubr.f32.mxu0 %v5454_v3  ;;  %2070 = vmatpush1.msra.mxu1 %v1617_v41 }
  0x98   :  { %2071 = vmatprep.subr.mxu1 %v5454_v3 }
  0x99   :  { %2680 = vmatmul.mubr.msk.f32.gmra.mxu1 %vm846_vm1, %v3474_v30 }
  0x9a   :  { %2603 = vmatmul.mubr.msk.f32.gmra.mxu0 %vm112_vm0, %v69_v29  ;;  %1409 = vmatprep.mubr.f32.mxu1 %v5454_v3 }
  0x9b   :  { %597 = vmatprep.mubr.f32.mxu0 %v5454_v3 }
  0x9d   :  { %2681 = vmatmul.mubr.msk.f32.gmra.mxu1 %vm846_vm1, %v3488_v32 }
  0x9e   :  { %2604 = vmatmul.mubr.msk.f32.gmra.mxu0 %vm112_vm0, %v70_v31  ;;  %1415 = vmatprep.mubr.f32.mxu1 %v5454_v3  ;;  %v88_v31 = vld [vmem:[%s5445_s0 + $0x1c0] sm:$0xff] }
  0x9f   :  { %603 = vmatprep.mubr.f32.mxu0 %v5454_v3 }
  0xa1   :  { %2682 = vmatmul.mubr.msk.f32.gmra.mxu1 %vm846_vm1, %v3505_v35 }
  0xa2   :  { %2605 = vmatmul.mubr.msk.f32.gmra.mxu0 %vm112_vm0, %v71_v34  ;;  %1421 = vmatprep.mubr.f32.mxu1 %v5454_v3 }
  0xa3   :  { %609 = vmatprep.mubr.f32.mxu0 %v5454_v3 }
  0xa5   :  { %2683 = vmatmul.mubr.msk.f32.gmra.mxu1 %vm846_vm1, %v3521_v38 }
  0xa6   :  { %2606 = vmatmul.mubr.msk.f32.gmra.mxu0 %vm112_vm0, %v72_v37  ;;  %1427 = vmatprep.mubr.f32.mxu1 %v5454_v3  ;;  %v89_v37 = vld [vmem:[%s5445_s0 + $0x1c8] sm:$0xff] }
  0xa7   :  { %615 = vmatprep.mubr.f32.mxu0 %v5454_v3 }
  0xa9   :  { %2684 = vmatmul.mubr.msk.f32.gmra.mxu1 %vm846_vm1, %v3535_v40 }
  0xaa   :  { %2607 = vmatmul.mubr.msk.f32.gmra.mxu0 %vm112_vm0, %v73_v39  ;;  %1433 = vmatprep.mubr.f32.mxu1 %v5454_v3 }
  0xab   :  { %621 = vmatprep.mubr.f32.mxu0 %v5454_v3 }
  0xad   :  { %2685 = vmatmul.mubr.msk.f32.gmra.mxu1 %vm846_vm1, %v3552_v43 }
  0xae   :  { %2608 = vmatmul.mubr.msk.f32.gmra.mxu0 %vm112_vm0, %v74_v42  ;;  %1439 = vmatprep.mubr.f32.mxu1 %v5454_v3 }
  0xaf   :  { %627 = vmatprep.mubr.f32.mxu0 %v5454_v3 }
  0xb1   :  { %2686 = vmatmul.mubr.msk.f32.gmra.mxu1 %vm846_vm1, %v3568_v46 }
  0xb2   :  { %2609 = vmatmul.mubr.msk.f32.gmra.mxu0 %vm112_vm0, %v75_v45  ;;  %1445 = vmatprep.mubr.f32.mxu1 %v5454_v3 }
  0xb3   :  { %633 = vmatprep.mubr.f32.mxu0 %v5454_v3 }
  0xb5   :  { %2687 = vmatmul.mubr.msk.f32.gmra.mxu1 %vm846_vm1, %v3582_v48 }
  0xb6   :  { %2610 = vmatmul.mubr.msk.f32.gmra.mxu0 %vm112_vm0, %v76_v47  ;;  %1451 = vmatprep.mubr.f32.mxu1 %v5454_v3 }
  0xb7   :  { %639 = vmatprep.mubr.f32.mxu0 %v5454_v3 }
  0xb9   :  { %2688 = vmatmul.mubr.msk.f32.gmra.mxu1 %vm846_vm1, %v3599_v51 }
  0xba   :  { %2611 = vmatmul.mubr.msk.f32.gmra.mxu0 %vm112_vm0, %v77_v50  ;;  %1457 = vmatprep.mubr.f32.mxu1 %v5454_v3  ;;  %v1616_v50 = vld [vmem:[%s5448_s6] sm:$0xff] }
  0xbb   :  { %645 = vmatprep.mubr.f32.mxu0 %v5454_v3  ;;  %2072 = vmatpush1.msra.mxu1 %v1616_v50 }
  0xbc   :  { %2073 = vmatprep.subr.mxu1 %v5454_v3 }
  0xbd   :  { %2689 = vmatmul.mubr.msk.f32.gmra.mxu1 %vm846_vm1, %v3615_v54 }
  0xbe   :  { %2612 = vmatmul.mubr.msk.f32.gmra.mxu0 %vm112_vm0, %v78_v53  ;;  %1463 = vmatprep.mubr.f32.mxu1 %v5454_v3 }
  0xbf   :  { %651 = vmatprep.mubr.f32.mxu0 %v5454_v3  ;;  %2074 = vmatpush2.msra.mxu1 %v1647_v57  ;;  %v1643_v57 = vld [vmem:[%s5448_s6 + $0xd8] sm:$0xff] }
  0xc0   :  { %2075 = vmatprep.subr.mxu1 %v5454_v3 }
  0xc1   :  { %2690 = vmatmul.mubr.msk.f32.gmra.mxu1 %vm846_vm1, %v3629_v56 }
  0xc2   :  { %2613 = vmatmul.mubr.msk.f32.gmra.mxu0 %vm112_vm0, %v79_v55  ;;  %1469 = vmatprep.mubr.f32.mxu1 %v5454_v3  ;;  %v92_v55 = vld [vmem:[%s5445_s0 + $0x1e0] sm:$0xff] }
  0xc3   :  { %657 = vmatprep.mubr.f32.mxu0 %v5454_v3  ;;  %2076 = vmatpush2.msra.mxu1 %v1646_v5 }
  0xc4   :  { %2077 = vmatprep.subr.mxu1 %v5454_v3 }
  0xc5   :  { %2691 = vmatmul.mubr.msk.f32.gmra.mxu1 %vm846_vm1, %v3646_v59 }
  0xc6   :  { %v3651_v61 = vpop.f32.mrf.mxu0  ;;  %2614 = vmatmul.mubr.msk.f32.gmra.mxu0 %vm112_vm0, %v80_v58  ;;  %1475 = vmatprep.mubr.f32.mxu1 %v5454_v3 }
  0xc7   :  { %663 = vmatprep.mubr.f32.mxu0 %v5454_v3 }
  0xc8   :  { %v3666_v0 = vpop.f32.mrf.mxu0 }
  0xc9   :  { %2692 = vmatmul.mubr.msk.f32.gmra.mxu1 %vm846_vm1, %v3664_v63 }
  0xca   :  { %v3669_v1 = vpop.f32.mrf.mxu0  ;;  %2615 = vmatmul.mubr.msk.f32.gmra.mxu0 %vm112_vm0, %v81_v62  ;;  %1481 = vmatprep.mubr.f32.mxu1 %v5454_v3  ;;  %v93_v62 = vld [vmem:[%s5445_s0 + $0x1e8] sm:$0xff] }
  0xcb   :  { %669 = vmatprep.mubr.f32.mxu0 %v5454_v3 }
  0xcc   :  { %v3687_v6 = vpop.f32.mrf.mxu0 }
  0xcd   :  { %2693 = vmatmul.mubr.msk.f32.gmra.mxu1 %vm846_vm1, %v3682_v4 }
  0xce   :  { %v3690_v7 = vpop.f32.mrf.mxu0  ;;  %2616 = vmatmul.mubr.msk.f32.gmra.mxu0 %vm112_vm0, %v82_v2 }
  0xcf   :  { %675 = vmatprep.mubr.f32.mxu0 %v5454_v3 }
  0xd0   :  { %v3699_v9 = vpop.f32.mrf.mxu0 }
  0xd2   :  { %v3704_v11 = vpop.f32.mrf.mxu0  ;;  %2617 = vmatmul.mubr.msk.f32.gmra.mxu0 %vm112_vm0, %v83_v8 }
  0xd3   :  { %681 = vmatprep.mubr.f32.mxu0 %v5454_v3 }
  0xd4   :  { %v3712_v13 = vpop.f32.mrf.mxu0 }
  0xd6   :  { %v3714_v14 = vpop.f32.mrf.mxu0  ;;  %2618 = vmatmul.mubr.msk.f32.gmra.mxu0 %vm112_vm0, %v84_v12 }
  0xd7   :  { %687 = vmatprep.mubr.f32.mxu0 %v5454_v3 }
  0xd8   :  { %v3724_v17 = vpop.f32.mrf.mxu0 }
  0xda   :  { %v3727_v18 = vpop.f32.mrf.mxu0  ;;  %2619 = vmatmul.mubr.msk.f32.gmra.mxu0 %vm112_vm0, %v85_v15 }
  0xdb   :  { %693 = vmatprep.mubr.f32.mxu0 %v5454_v3 }
  0xdc   :  { %v3734_v20 = vpop.f32.mrf.mxu0 }
  0xde   :  { %v3739_v24 = vpop.f32.mrf.mxu0  ;;  %2620 = vmatmul.mubr.msk.f32.gmra.mxu0 %vm112_vm0, %v86_v19  ;;  %v1645_v19 = vld [vmem:[%s5448_s6 + $0xe8] sm:$0xff] }
  0xdf   :  { %699 = vmatprep.mubr.f32.mxu0 %v5454_v3  ;;  %2078 = vmatpush2.msra.mxu1 %v1645_v19  ;;  %v1642_v19 = vld [vmem:[%s5448_s6 + $0xd0] sm:$0xff] }
  0xe0   :  { %v3747_v28 = vpop.f32.mrf.mxu0  ;;  %2079 = vmatprep.subr.mxu1 %v5454_v3 }
  0xe2   :  { %v3749_v29 = vpop.f32.mrf.mxu0  ;;  %2621 = vmatmul.mubr.msk.f32.gmra.mxu0 %vm112_vm0, %v87_v26 }
  0xe3   :  { %705 = vmatprep.mubr.f32.mxu0 %v5454_v3 }
  0xe4   :  { %v3759_v34 = vpop.f32.mrf.mxu0 }
  0xe6   :  { %v3762_v36 = vpop.f32.mrf.mxu0  ;;  %2622 = vmatmul.mubr.msk.f32.gmra.mxu0 %vm112_vm0, %v88_v31  ;;  %v3852_v31 = vld [vmem:[%s5447_s1] sm:$0xff] }
  0xe7   :  { %711 = vmatprep.mubr.f32.mxu0 %v5454_v3 }
  0xe8   :  { %v3769_v39 = vpop.f32.mrf.mxu0 }
  0xea   :  { %v3774_v42 = vpop.f32.mrf.mxu0  ;;  %2623 = vmatmul.mubr.msk.f32.gmra.mxu0 %vm112_vm0, %v89_v37  ;;  %v1644_v37 = vld [vmem:[%s5448_s6 + $0xe0] sm:$0xff] }
  0xeb   :  { %717 = vmatprep.mubr.f32.mxu0 %v5454_v3  ;;  %2080 = vmatpush2.msra.mxu1 %v1644_v37 }
  0xec   :  { %v3782_v45 = vpop.f32.mrf.mxu0  ;;  %2081 = vmatprep.subr.mxu1 %v5454_v3 }
  0xed   :  { %2082 = vmatpush2.msra.mxu1 %v1643_v57  ;;  %v3911_v57 = vld [vmem:[%s5447_s1 + $0x20] sm:$0xff] }
  0xee   :  { %v3784_v47 = vpop.f32.mrf.mxu0  ;;  %2624 = vmatmul.mubr.msk.f32.gmra.mxu0 %vm112_vm0, %v90_v44  ;;  %v3867_v44 = vld [vmem:[%s5447_s1 + $0x8] sm:$0xff]  ;;  %2083 = vmatprep.subr.mxu1 %v5454_v3 }
  0xef   :  { %5456 = vst [vmem:[#allocation2_spill] sm:$0xff] %v3784_v47  ;;  %723 = vmatprep.mubr.f32.mxu0 %v5454_v3  ;;  %2084 = vmatpush2.msra.mxu1 %v1642_v19  ;;  %v3924_v19 = vld [vmem:[%s5447_s1 + $0x28] sm:$0xff] }
  0xf0   :  { %v3794_v52 = vpop.f32.mrf.mxu0  ;;  %2085 = vmatprep.subr.mxu1 %v5454_v3  ;;  %v1633_v47 = vld [vmem:[%s5448_s6 + $0x88] sm:$0xff] }
  0xf1   :  { %5457 = vst [vmem:[#allocation3_spill] sm:$0xff] %v3794_v52 }
  0xf2   :  { %v3797_v53 = vpop.f32.mrf.mxu0  ;;  %2625 = vmatmul.mubr.msk.f32.gmra.mxu0 %vm112_vm0, %v91_v49 }
  0xf3   :  { %5458 = vst [vmem:[#allocation4_spill] sm:$0xff] %v3797_v53  ;;  %729 = vmatprep.mubr.f32.mxu0 %v5454_v3 }
  0xf4   :  { %v3807_v58 = vpop.f32.mrf.mxu0 }
  0xf5   :  { %5459 = vst [vmem:[#allocation5_spill] sm:$0xff] %v3807_v58 }
  0xf6   :  { %v3810_v60 = vpop.f32.mrf.mxu0  ;;  %2626 = vmatmul.mubr.msk.f32.gmra.mxu0 %vm112_vm0, %v92_v55  ;;  %v3880_v55 = vld [vmem:[%s5447_s1 + $0x10] sm:$0xff] }
  0xf7   :  { %5460 = vst [vmem:[#allocation6_spill] sm:$0xff] %v3810_v60  ;;  %735 = vmatprep.mubr.f32.mxu0 %v5454_v3  ;;  %v1654_v60 = vld [vmem:[%s5449_s7 + $0x30] sm:$0xff] }
  0xf8   :  { %v3817_v2 = vpop.f32.mrf.mxu0 }
  0xf9   :  { %5461 = vst [vmem:[#allocation7_spill] sm:$0xff] %v3817_v2 }
  0xfa   :  { %v3822_v8 = vpop.f32.mrf.mxu0  ;;  %2627 = vmatmul.mubr.msk.f32.gmra.mxu0 %vm112_vm0, %v93_v62 }
  0xfb   :  { %5462 = vst [vmem:[#allocation8_spill] sm:$0xff] %v3822_v8  ;;  %741 = vmatprep.mubr.f32.mxu0 %v5454_v3 }
  0xfc   :  { %v3830_v12 = vpop.f32.mrf.mxu0 }
  0xfd   :  { %5463 = vst [vmem:[#allocation9_spill] sm:$0xff] %v3830_v12 }
  0xfe   :  { %v3832_v15 = vpop.f32.mrf.mxu0  ;;  %2628 = vmatmul.mubr.msk.f32.gmra.mxu0 %vm112_vm0, %v94_v10  ;;  %v3896_v10 = vld [vmem:[%s5447_s1 + $0x18] sm:$0xff] }
  0xff   :  { %5464 = vst [vmem:[#allocation10_spill] sm:$0xff] %v3832_v15  ;;  %747 = vmatprep.mubr.f32.mxu0 %v5454_v3 }
 0x100   :  { %v3842_v22 = vpop.f32.mrf.mxu0 }
 0x101   :  { %5465 = vst [vmem:[#allocation11_spill] sm:$0xff] %v3842_v22 }
 0x102   :  { %v3845_v26 = vpop.f32.mrf.mxu0  ;;  %2629 = vmatmul.mubr.msk.f32.gmra.mxu0 %vm112_vm0, %v95_v16 }
 0x103   :  { %5466 = vst [vmem:[#allocation12_spill] sm:$0xff] %v3845_v26  ;;  %1103 = vmatprep.mubr.f32.mxu0 %v5454_v3 }
 0x104   :  { %v3854_v33 = vpop.f32.mrf.mxu0 }
 0x105   :  { %5467 = vst [vmem:[#allocation13_spill] sm:$0xff] %v3854_v33 }
 0x106   :  { %v3859_v41 = vpop.f32.mrf.mxu0  ;;  %2630 = vmatmul.mubr.msk.f32.vlgmr.msra.gmra.mxu0 %vm846_vm1, %v3852_v31 }
 0x107   :  { %5468 = vst [vmem:[#allocation14_spill] sm:$0xff] %v3859_v41  ;;  %1109 = vmatprep.mubr.f32.mxu0 %v5454_v3 }
 0x108   :  { %v3870_v49 = vpop.f32.mrf.mxu0 }
 0x109   :  { %5469 = vst [vmem:[#allocation15_spill] sm:$0xff] %v3870_v49 }
 0x10a   :  { %v3872_v50 = vpop.f32.mrf.mxu0  ;;  %2631 = vmatmul.mubr.msk.f32.gmra.mxu0 %vm846_vm1, %v3867_v44 }
 0x10b   :  { %5470 = vst [vmem:[#allocation16_spill] sm:$0xff] %v3872_v50  ;;  %1115 = vmatprep.mubr.f32.mxu0 %v5454_v3  ;;  %v3929_v50 = vpop.f32.mrf.mxu1 }
 0x10c   :  { %v3885_v62 = vpop.f32.mrf.mxu0  ;;  %5477 = vst [vmem:[#allocation23_spill] sm:$0xff] %v3929_v50 }
 0x10d   :  { %5471 = vst [vmem:[#allocation17_spill] sm:$0xff] %v3885_v62  ;;  %v3944_v62 = vpop.f32.mrf.mxu1 }
 0x10e   :  { %v3888_v5 = vpop.f32.mrf.mxu0  ;;  %2632 = vmatmul.mubr.msk.f32.gmra.mxu0 %vm846_vm1, %v3880_v55  ;;  %5480 = vst [vmem:[#allocation26_spill] sm:$0xff] %v3944_v62 }
 0x10f   :  { %5472 = vst [vmem:[#allocation18_spill] sm:$0xff] %v3888_v5  ;;  %1121 = vmatprep.mubr.f32.mxu0 %v5454_v3 }
 0x110   :  { %v3898_v16 = vpop.f32.mrf.mxu0 }
 0x111   :  { %5473 = vst [vmem:[#allocation19_spill] sm:$0xff] %v3898_v16 }
 0x112   :  { %v3903_v37 = vpop.f32.mrf.mxu0  ;;  %2633 = vmatmul.mubr.msk.f32.gmra.mxu0 %vm846_vm1, %v3896_v10 }
 0x113   :  { %5474 = vst [vmem:[#allocation20_spill] sm:$0xff] %v3903_v37  ;;  %1127 = vmatprep.mubr.f32.mxu0 %v5454_v3  ;;  %v1641_v37 = vld [vmem:[%s5448_s6 + $0xc8] sm:$0xff] }
 0x114   :  { %v3914_v5 = vpop.f32.mrf.mxu0  ;;  %2086 = vmatpush2.msra.mxu1 %v1641_v37  ;;  %v1640_v37 = vld [vmem:[%s5448_s6 + $0xc0] sm:$0xff] }
 0x115   :  { %5475 = vst [vmem:[#allocation21_spill] sm:$0xff] %v3914_v5  ;;  %2087 = vmatprep.subr.mxu1 %v5454_v3  ;;  %v3942_v5 = vld [vmem:[%s5447_s1 + $0x30] sm:$0xff] }
 0x116   :  { %v3916_v16 = vpop.f32.mrf.mxu0  ;;  %2634 = vmatmul.mubr.msk.f32.gmra.mxu0 %vm846_vm1, %v3911_v57  ;;  %2088 = vmatpush2.msra.mxu1 %v1640_v37  ;;  %v3974_v37 = vld [vmem:[%s5447_s1 + $0x40] sm:$0xff] }
 0x117   :  { %5476 = vst [vmem:[#allocation22_spill] sm:$0xff] %v3916_v16  ;;  %1133 = vmatprep.mubr.f32.mxu0 %v5454_v3  ;;  %2089 = vmatprep.subr.mxu1 %v5454_v3 }
 0x118   :  { %v3931_v41 = vpop.f32.mrf.mxu0 }
 0x119   :  { %5478 = vst [vmem:[#allocation24_spill] sm:$0xff] %v3931_v41 }
 0x11a   :  { %v3934_v16 = vpop.f32.mrf.mxu0  ;;  %2635 = vmatmul.mubr.msk.f32.gmra.mxu0 %vm846_vm1, %v3924_v19 }
 0x11b   :  { %5479 = vst [vmem:[#allocation25_spill] sm:$0xff] %v3934_v16  ;;  %1139 = vmatprep.mubr.f32.mxu0 %v5454_v3  ;;  %v3959_v16 = vld [vmem:[%s5447_s1 + $0x38] sm:$0xff] }
 0x11c   :  { %v3946_v50 = vpop.f32.mrf.mxu0 }
 0x11d   :  { %5481 = vst [vmem:[#allocation27_spill] sm:$0xff] %v3946_v50  ;;  %v3962_v50 = vpop.f32.mrf.mxu1 }
 0x11e   :  { %v3951_v41 = vpop.f32.mrf.mxu0  ;;  %2636 = vmatmul.mubr.msk.f32.gmra.mxu0 %vm846_vm1, %v3942_v5  ;;  %5483 = vst [vmem:[#allocation29_spill] sm:$0xff] %v3962_v50 }
 0x11f   :  { %5482 = vst [vmem:[#allocation28_spill] sm:$0xff] %v3951_v41  ;;  %1145 = vmatprep.mubr.f32.mxu0 %v5454_v3  ;;  %v1639_v41 = vld [vmem:[%s5448_s6 + $0xb8] sm:$0xff]  ;;  %v3979_v26 = vpop.f32.mrf.mxu1 }
 0x120   :  { %v3964_v62 = vpop.f32.mrf.mxu0  ;;  %5486 = vst [vmem:[#allocation32_spill] sm:$0xff] %v3979_v26  ;;  %2090 = vmatpush2.msra.mxu1 %v1639_v41  ;;  %v1638_v41 = vld [vmem:[%s5448_s6 + $0xb0] sm:$0xff] }
 0x121   :  { %5484 = vst [vmem:[#allocation30_spill] sm:$0xff] %v3964_v62  ;;  %2091 = vmatprep.subr.mxu1 %v5454_v3  ;;  %v3992_v62 = vld [vmem:[%s5447_s1 + $0x48] sm:$0xff]  ;;  %v3994_v33 = vpop.f32.mrf.mxu1 }
 0x122   :  { %v3966_v49 = vpop.f32.mrf.mxu0  ;;  %2637 = vmatmul.mubr.msk.f32.gmra.mxu0 %vm846_vm1, %v3959_v16  ;;  %5489 = vst [vmem:[#allocation35_spill] sm:$0xff] %v3994_v33  ;;  %2092 = vmatpush2.msra.mxu1 %v1638_v41  ;;  %v4024_v41 = vld [vmem:[%s5447_s1 + $0x58] sm:$0xff] }
 0x123   :  { %5485 = vst [vmem:[#allocation31_spill] sm:$0xff] %v3966_v49  ;;  %1151 = vmatprep.mubr.f32.mxu0 %v5454_v3  ;;  %2093 = vmatprep.subr.mxu1 %v5454_v3 }
 0x124   :  { %v3981_v50 = vpop.f32.mrf.mxu0 }
 0x125   :  { %5487 = vst [vmem:[#allocation33_spill] sm:$0xff] %v3981_v50 }
 0x126   :  { %v3984_v49 = vpop.f32.mrf.mxu0  ;;  %2638 = vmatmul.mubr.msk.f32.gmra.mxu0 %vm846_vm1, %v3974_v37 }
 0x127   :  { %5488 = vst [vmem:[#allocation34_spill] sm:$0xff] %v3984_v49  ;;  %1157 = vmatprep.mubr.f32.mxu0 %v5454_v3  ;;  %v4009_v49 = vld [vmem:[%s5447_s1 + $0x50] sm:$0xff] }
 0x128   :  { %v3996_v26 = vpop.f32.mrf.mxu0 }
 0x129   :  { %5490 = vst [vmem:[#allocation36_spill] sm:$0xff] %v3996_v26  ;;  %v4012_v26 = vpop.f32.mrf.mxu1 }
 0x12a   :  { %v4001_v50 = vpop.f32.mrf.mxu0  ;;  %2639 = vmatmul.mubr.msk.f32.gmra.mxu0 %vm846_vm1, %v3992_v62  ;;  %5492 = vst [vmem:[#allocation38_spill] sm:$0xff] %v4012_v26 }
 0x12b   :  { %5491 = vst [vmem:[#allocation37_spill] sm:$0xff] %v4001_v50  ;;  %1163 = vmatprep.mubr.f32.mxu0 %v5454_v3  ;;  %v1637_v50 = vld [vmem:[%s5448_s6 + $0xa8] sm:$0xff]  ;;  %v4029_v22 = vpop.f32.mrf.mxu1 }
 0x12c   :  { %v4014_v33 = vpop.f32.mrf.mxu0  ;;  %5495 = vst [vmem:[#allocation41_spill] sm:$0xff] %v4029_v22  ;;  %2094 = vmatpush2.msra.mxu1 %v1637_v50  ;;  %v1636_v50 = vld [vmem:[%s5448_s6 + $0xa0] sm:$0xff] }
 0x12d   :  { %5493 = vst [vmem:[#allocation39_spill] sm:$0xff] %v4014_v33  ;;  %2095 = vmatprep.subr.mxu1 %v5454_v3  ;;  %v4042_v33 = vld [vmem:[%s5447_s1 + $0x60] sm:$0xff]  ;;  %v4044_v8 = vpop.f32.mrf.mxu1 }
 0x12e   :  { %v4016_v15 = vpop.f32.mrf.mxu0  ;;  %2640 = vmatmul.mubr.msk.f32.gmra.mxu0 %vm846_vm1, %v4009_v49  ;;  %5498 = vst [vmem:[#allocation44_spill] sm:$0xff] %v4044_v8  ;;  %2096 = vmatpush2.msra.mxu1 %v1636_v50  ;;  %v4074_v50 = vld [vmem:[%s5447_s1 + $0x70] sm:$0xff] }
 0x12f   :  { %5494 = vst [vmem:[#allocation40_spill] sm:$0xff] %v4016_v15  ;;  %1169 = vmatprep.mubr.f32.mxu0 %v5454_v3  ;;  %2097 = vmatprep.subr.mxu1 %v5454_v3 }
 0x130   :  { %v4031_v26 = vpop.f32.mrf.mxu0 }
 0x131   :  { %5496 = vst [vmem:[#allocation42_spill] sm:$0xff] %v4031_v26 }
 0x132   :  { %v4034_v15 = vpop.f32.mrf.mxu0  ;;  %2641 = vmatmul.mubr.msk.f32.gmra.mxu0 %vm846_vm1, %v4024_v41 }
 0x133   :  { %5497 = vst [vmem:[#allocation43_spill] sm:$0xff] %v4034_v15  ;;  %1175 = vmatprep.mubr.f32.mxu0 %v5454_v3  ;;  %v4059_v15 = vld [vmem:[%s5447_s1 + $0x68] sm:$0xff] }
 0x134   :  { %v4046_v22 = vpop.f32.mrf.mxu0 }
 0x135   :  { %5499 = vst [vmem:[#allocation45_spill] sm:$0xff] %v4046_v22  ;;  %v4062_v22 = vpop.f32.mrf.mxu1 }
 0x136   :  { %v4051_v26 = vpop.f32.mrf.mxu0  ;;  %2642 = vmatmul.mubr.msk.f32.gmra.mxu0 %vm846_vm1, %v4042_v33  ;;  %5501 = vst [vmem:[#allocation47_spill] sm:$0xff] %v4062_v22 }
 0x137   :  { %5500 = vst [vmem:[#allocation46_spill] sm:$0xff] %v4051_v26  ;;  %1181 = vmatprep.mubr.f32.mxu0 %v5454_v3  ;;  %v1635_v26 = vld [vmem:[%s5448_s6 + $0x98] sm:$0xff]  ;;  %v4082_v22 = vpop.f32.mrf.mxu1 }
 0x138   :  { %v4064_v8 = vpop.f32.mrf.mxu0  ;;  %5504 = vst [vmem:[#allocation50_spill] sm:$0xff] %v4082_v22  ;;  %2098 = vmatpush2.msra.mxu1 %v1635_v26  ;;  %v4098_v26 = vld [vmem:[%s5447_s1 + $0x78] sm:$0xff] }
 0x139   :  { %5502 = vst [vmem:[#allocation48_spill] sm:$0xff] %v4064_v8  ;;  %v1655_v8 = vld [vmem:[%s5449_s7 + $0x38] sm:$0xff]  ;;  %2099 = vmatprep.subr.mxu1 %v5454_v3 }
 0x13a   :  { %v4066_v12 = vpop.f32.mrf.mxu0  ;;  %2643 = vmatmul.mubr.msk.f32.gmra.mxu0 %vm846_vm1, %v4059_v15  ;;  %2831 = vmatprep.subr.mxu0 %v1655_v8 }
 0x13b   :  { %5503 = vst [vmem:[#allocation49_spill] sm:$0xff] %v4066_v12  ;;  %1187 = vmatprep.mubr.f32.mxu0 %v5454_v3  ;;  %2832 = vmatpush3.msra.mxu0 %v1655_v8  ;;  %v1653_v8 = vld [vmem:[%s5449_s7 + $0x28] sm:$0xff] }
 0x13c   :  { %v4084_v12 = vpop.f32.mrf.mxu0  ;;  %2833 = vmatprep.subr.mxu0 %v1654_v60 }
 0x13d   :  { %5505 = vst [vmem:[#allocation51_spill] sm:$0xff] %v4084_v12  ;;  %2834 = vmatpush3.msra.mxu0 %v1654_v60  ;;  %v4103_v12 = vpop.f32.mrf.mxu1  ;;  %v5510_v60 = vmov 0.0  }
 0x13e   :  { %v4090_v2 = vpop.f32.mrf.mxu0  ;;  %2644 = vmatmul.mubr.msk.f32.gmra.mxu0 %vm846_vm1, %v4074_v50  ;;  %5507 = vst [vmem:[#allocation53_spill] sm:$0xff] %v4103_v12  ;;  %2835 = vmatprep.subr.mxu0 %v1653_v8 }
 0x13f   :  { %5506 = vst [vmem:[#allocation52_spill] sm:$0xff] %v4090_v2  ;;  %1193 = vmatprep.mubr.f32.mxu0 %v5454_v3  ;;  %v1634_v2 = vld [vmem:[%s5448_s6 + $0x90] sm:$0xff]  ;;  %2836 = vmatpush3.msra.mxu0 %v1653_v8  ;;  %v1652_v3 = vld [vmem:[%s5449_s7 + $0x20] sm:$0xff]  ;;  %v1651_v8 = vld [vmem:[%s5449_s7 + $0x18] sm:$0xff]  ;;  %v4126_v12 = vpop.f32.mrf.mxu1 }
 0x140   :  { %v4105_v22 = vpop.f32.mrf.mxu0  ;;  %2100 = vmatpush2.msra.mxu1 %v1634_v2  ;;  %2837 = vmatprep.subr.mxu0 %v1652_v3  ;;  %5511 = vst [vmem:[#allocation56_spill] sm:$0xff] %v4126_v12  ;;  %v1650_v2 = vld [vmem:[%s5449_s7 + $0x10] sm:$0xff] }
 0x141   :  { %5508 = vst [vmem:[#allocation54_spill] sm:$0xff] %v4105_v22  ;;  %v4121_v22 = vld [vmem:[%s5447_s1 + $0x80] sm:$0xff]  ;;  %2838 = vmatpush3.msra.mxu0 %v1652_v3  ;;  %2101 = vmatprep.subr.mxu1 %v5510_v60  ;;  %v1649_v3 = vld [vmem:[%s5449_s7 + $0x8] sm:$0xff] }
 0x142   :  { %v4113_v53 = vpop.f32.mrf.mxu0  ;;  %2645 = vmatmul.mubr.msk.f32.gmra.mxu0 %vm846_vm1, %v4098_v26  ;;  %2839 = vmatprep.subr.mxu0 %v1651_v8 }
 0x143   :  { %5509 = vst [vmem:[#allocation55_spill] sm:$0xff] %v4113_v53  ;;  %1199 = vmatprep.mubr.f32.mxu0 %v5510_v60  ;;  %2840 = vmatpush3.msra.mxu0 %v1651_v8  ;;  %v1648_v8 = vld [vmem:[%s5449_s7] sm:$0xff] }
 0x144   :  { %v4128_v58 = vpop.f32.mrf.mxu0  ;;  %2102 = vmatpush2.msra.mxu1 %v1633_v47  ;;  %2841 = vmatprep.subr.mxu0 %v1650_v2  ;;  %v1632_v47 = vld [vmem:[%s5448_s6 + $0x80] sm:$0xff] }
 0x145   :  { %5512 = vst [vmem:[#allocation57_spill] sm:$0xff] %v4128_v58  ;;  %v4146_v58 = vpop.f32.mrf.mxu1  ;;  %2842 = vmatpush3.msra.mxu0 %v1650_v2  ;;  %2103 = vmatprep.subr.mxu1 %v5510_v60 }
 0x146   :  { %v4134_v53 = vpop.f32.mrf.mxu0  ;;  %2646 = vmatmul.mubr.msk.f32.gmra.mxu0 %vm846_vm1, %v4121_v22  ;;  %2843 = vmatprep.subr.mxu0 %v1649_v3 }
 0x147   :  { %5513 = vst [vmem:[#allocation58_spill] sm:$0xff] %v4134_v53  ;;  %2847 = vmatprep.mubr.msk.f32.mxu0 %vm846_vm1, %v3852_v31  ;;  %2844 = vmatpush3.msra.mxu0 %v1649_v3  ;;  %v4156_v52 = vpop.f32.mrf.mxu1 }
 0x148   :  { %v4148_v12 = vpop.f32.mrf.mxu0  ;;  %2845 = vmatprep.subr.mxu0 %v1648_v8  ;;  %2104 = vmatpush2.msra.mxu1 %v1632_v47 }
 0x149   :  { %2846 = vmatpush3.msra.mxu0 %v1648_v8  ;;  %v4169_v2 = vpop.f32.mrf.mxu1 }
 0x14a   :  { %v4154_v53 = vpop.f32.mrf.mxu0  ;;  %2848 = vmatmul.mubr.msk.f32.vlgmr.msra.gmra.mxu0 %vm846_vm1, %v3867_v44 }
 0x14b   :  { %5514 = vst [vmem:[#allocation59_spill] sm:$0xff] %v4154_v53  ;;  %2850 = vmatprep.mubr.msk.f32.mxu0 %vm846_vm1, %v3880_v55  ;;  %v4179_v8 = vpop.f32.mrf.mxu1 }
 0x14c   :  { %v4158_v31 = vpop.f32.mrf.mxu0 }
 0x14d   :  { %5515 = vst [vmem:[#allocation60_spill] sm:$0xff] %v4158_v31  ;;  %v4189_v55 = vpop.f32.mrf.mxu1 }
 0x14e   :  { %v4163_v60 = vpop.f32.mrf.mxu0  ;;  %2851 = vmatmul.mubr.msk.f32.gmra.mxu0 %vm846_vm1, %v3896_v10 }
 0x14f   :  { %5516 = vst [vmem:[#allocation61_spill] sm:$0xff] %v4163_v60  ;;  %2853 = vmatprep.mubr.msk.f32.mxu0 %vm846_vm1, %v3911_v57  ;;  %v4199_v57 = vpop.f32.mrf.mxu1 }
 0x150   :  { %v4171_v3 = vpop.f32.mrf.mxu0 }
 0x151   :  { %5517 = vst [vmem:[#allocation62_spill] sm:$0xff] %v4171_v3 }
 0x152   :  { %v4173_v53 = vpop.f32.mrf.mxu0  ;;  %2854 = vmatmul.mubr.msk.f32.gmra.mxu0 %vm846_vm1, %v3924_v19 }
 0x153   :  { %5518 = vst [vmem:[#allocation63_spill] sm:$0xff] %v4173_v53  ;;  %2856 = vmatprep.mubr.msk.f32.mxu0 %vm846_vm1, %v3942_v5  ;;  %v4209_v5 = vpop.f32.mrf.mxu1 }
 0x154   :  { %v4181_v47 = vpop.f32.mrf.mxu0 }
 0x155   :  { %5519 = vst [vmem:[#allocation64_spill] sm:$0xff] %v4181_v47 }
 0x156   :  { %v4183_v44 = vpop.f32.mrf.mxu0  ;;  %2857 = vmatmul.mubr.msk.f32.gmra.mxu0 %vm846_vm1, %v3959_v16 }
 0x157   :  { %5520 = vst [vmem:[#allocation65_spill] sm:$0xff] %v4183_v44  ;;  %2859 = vmatprep.mubr.msk.f32.mxu0 %vm846_vm1, %v3974_v37  ;;  %v4219_v37 = vpop.f32.mrf.mxu1 }
 0x158   :  { %v4191_v53 = vpop.f32.mrf.mxu0 }
 0x159   :  { %5521 = vst [vmem:[#allocation66_spill] sm:$0xff] %v4191_v53 }
 0x15a   :  { %v4193_v10 = vpop.f32.mrf.mxu0  ;;  %2860 = vmatmul.mubr.msk.f32.gmra.mxu0 %vm846_vm1, %v3992_v62 }
 0x15b   :  { %5522 = vst [vmem:[#allocation67_spill] sm:$0xff] %v4193_v10  ;;  %2862 = vmatprep.mubr.msk.f32.mxu0 %vm846_vm1, %v4009_v49  ;;  %v4229_v49 = vpop.f32.mrf.mxu1 }
 0x15c   :  { %v4201_v44 = vpop.f32.mrf.mxu0 }
 0x15d   :  { %5523 = vst [vmem:[#allocation68_spill] sm:$0xff] %v4201_v44 }
 0x15e   :  { %v4203_v19 = vpop.f32.mrf.mxu0  ;;  %2863 = vmatmul.mubr.msk.f32.gmra.mxu0 %vm846_vm1, %v4024_v41 }
 0x15f   :  { %5524 = vst [vmem:[#allocation69_spill] sm:$0xff] %v4203_v19  ;;  %2865 = vmatprep.mubr.msk.f32.mxu0 %vm846_vm1, %v4042_v33  ;;  %v4239_v33 = vpop.f32.mrf.mxu1 }
 0x160   :  { %v4211_v10 = vpop.f32.mrf.mxu0 }
 0x161   :  { %5525 = vst [vmem:[#allocation70_spill] sm:$0xff] %v4211_v10 }
 0x162   :  { %v4213_v16 = vpop.f32.mrf.mxu0  ;;  %2866 = vmatmul.mubr.msk.f32.gmra.mxu0 %vm846_vm1, %v4059_v15 }
 0x163   :  { %5526 = vst [vmem:[#allocation71_spill] sm:$0xff] %v4213_v16  ;;  %2868 = vmatprep.mubr.msk.f32.mxu0 %vm846_vm1, %v4074_v50  ;;  %v2960_v50 = vld [vmem:[%s5447_s1 + $0x88] sm:$0xff] }
 0x164   :  { %v4221_v19 = vpop.f32.mrf.mxu0 }
 0x165   :  { %5527 = vst [vmem:[#allocation72_spill] sm:$0xff] %v4221_v19 }
 0x166   :  { %v4223_v62 = vpop.f32.mrf.mxu0  ;;  %2869 = vmatmul.mubr.msk.f32.gmra.mxu0 %vm846_vm1, %v4098_v26  ;;  %v4253_v26 = vpop.f32.mrf.mxu1 }
 0x167   :  { %5528 = vst [vmem:[#allocation73_spill] sm:$0xff] %v4223_v62  ;;  %2871 = vmatprep.mubr.msk.f32.mxu0 %vm846_vm1, %v4121_v22 }
 0x168   :  { %v4231_v16 = vpop.f32.mrf.mxu0 }
 0x169   :  { %5529 = vst [vmem:[#allocation74_spill] sm:$0xff] %v4231_v16 }
 0x16a   :  { %v4233_v41 = vpop.f32.mrf.mxu0  ;;  %2872 = vmatmul.mubr.msk.f32.gmra.mxu0 %vm846_vm1, %v2960_v50  ;;  %v2963_v50 = vld [vmem:[%s5447_s1 + $0xa0] sm:$0xff] }
 0x16b   :  { %5530 = vst [vmem:[#allocation75_spill] sm:$0xff] %v4233_v41  ;;  %v2961_v41 = vld [vmem:[%s5447_s1 + $0x90] sm:$0xff] }
 0x16c   :  { %v4241_v62 = vpop.f32.mrf.mxu0  ;;  %2874 = vmatprep.mubr.msk.f32.mxu0 %vm846_vm1, %v2961_v41 }
 0x16d   :  { %5531 = vst [vmem:[#allocation76_spill] sm:$0xff] %v4241_v62  ;;  %v4267_v62 = vpop.f32.mrf.mxu1 }
 0x16e   :  { %v4243_v15 = vpop.f32.mrf.mxu0 }
 0x16f   :  { %5532 = vst [vmem:[#allocation77_spill] sm:$0xff] %v4243_v15  ;;  %v2962_v15 = vld [vmem:[%s5447_s1 + $0x98] sm:$0xff] }
 0x170   :  { %v4255_v22 = vpop.f32.mrf.mxu0  ;;  %2875 = vmatmul.mubr.msk.f32.gmra.mxu0 %vm846_vm1, %v2962_v15  ;;  %v2965_v15 = vld [vmem:[%s5447_s1 + $0xb0] sm:$0xff] }
 0x171   :  { %5533 = vst [vmem:[#allocation78_spill] sm:$0xff] %v4255_v22  ;;  %2877 = vmatprep.mubr.msk.f32.mxu0 %vm846_vm1, %v2963_v50  ;;  %v4281_v22 = vpop.f32.mrf.mxu1 }
 0x172   :  { %v4257_v16 = vpop.f32.mrf.mxu0 }
 0x173   :  { %5534 = vst [vmem:[#allocation79_spill] sm:$0xff] %v4257_v16  ;;  %v2964_v16 = vld [vmem:[%s5447_s1 + $0xa8] sm:$0xff] }
 0x174   :  { %v4269_v41 = vpop.f32.mrf.mxu0  ;;  %2878 = vmatmul.mubr.msk.f32.gmra.mxu0 %vm846_vm1, %v2964_v16  ;;  %v2967_v16 = vld [vmem:[%s5447_s1 + $0xc0] sm:$0xff] }
 0x175   :  { %5535 = vst [vmem:[#allocation80_spill] sm:$0xff] %v4269_v41  ;;  %2880 = vmatprep.mubr.msk.f32.mxu0 %vm846_vm1, %v2965_v15  ;;  %v4295_v41 = vpop.f32.mrf.mxu1 }
 0x176   :  { %v4271_v19 = vpop.f32.mrf.mxu0 }
 0x177   :  { %5536 = vst [vmem:[#allocation81_spill] sm:$0xff] %v4271_v19  ;;  %v2966_v19 = vld [vmem:[%s5447_s1 + $0xb8] sm:$0xff] }
 0x178   :  { %v4283_v50 = vpop.f32.mrf.mxu0  ;;  %2881 = vmatmul.mubr.msk.f32.gmra.mxu0 %vm846_vm1, %v2966_v19  ;;  %v2969_v19 = vld [vmem:[%s5447_s1 + $0xd0] sm:$0xff] }
 0x179   :  { %5537 = vst [vmem:[#allocation82_spill] sm:$0xff] %v4283_v50  ;;  %2883 = vmatprep.mubr.msk.f32.mxu0 %vm846_vm1, %v2967_v16  ;;  %v4309_v50 = vpop.f32.mrf.mxu1 }
 0x17a   :  { %v4285_v10 = vpop.f32.mrf.mxu0 }
 0x17b   :  { %5538 = vst [vmem:[#allocation83_spill] sm:$0xff] %v4285_v10  ;;  %v2968_v10 = vld [vmem:[%s5447_s1 + $0xc8] sm:$0xff] }
 0x17c   :  { %v4297_v15 = vpop.f32.mrf.mxu0  ;;  %2884 = vmatmul.mubr.msk.f32.gmra.mxu0 %vm846_vm1, %v2968_v10  ;;  %v2971_v10 = vld [vmem:[%s5447_s1 + $0xe0] sm:$0xff] }
 0x17d   :  { %5539 = vst [vmem:[#allocation84_spill] sm:$0xff] %v4297_v15  ;;  %2886 = vmatprep.mubr.msk.f32.mxu0 %vm846_vm1, %v2969_v19  ;;  %v4323_v15 = vpop.f32.mrf.mxu1 }
 0x17e   :  { %v4299_v44 = vpop.f32.mrf.mxu0 }
 0x17f   :  { %5540 = vst [vmem:[#allocation85_spill] sm:$0xff] %v4299_v44  ;;  %v2970_v44 = vld [vmem:[%s5447_s1 + $0xd8] sm:$0xff] }
 0x180   :  { %v4311_v16 = vpop.f32.mrf.mxu0  ;;  %2887 = vmatmul.mubr.msk.f32.gmra.mxu0 %vm846_vm1, %v2970_v44  ;;  %v2973_v44 = vld [vmem:[%s5447_s1 + $0xf0] sm:$0xff] }
 0x181   :  { %5541 = vst [vmem:[#allocation86_spill] sm:$0xff] %v4311_v16  ;;  %2889 = vmatprep.mubr.msk.f32.mxu0 %vm846_vm1, %v2971_v10  ;;  %v4337_v16 = vpop.f32.mrf.mxu1 }
 0x182   :  { %v4313_v53 = vpop.f32.mrf.mxu0 }
 0x183   :  { %5542 = vst [vmem:[#allocation87_spill] sm:$0xff] %v4313_v53  ;;  %v2972_v53 = vld [vmem:[%s5447_s1 + $0xe8] sm:$0xff] }
 0x184   :  { %v4325_v19 = vpop.f32.mrf.mxu0  ;;  %2890 = vmatmul.mubr.msk.f32.gmra.mxu0 %vm846_vm1, %v2972_v53  ;;  %v2975_v53 = vld [vmem:[%s5447_s1 + $0x100] sm:$0xff] }
 0x185   :  { %5543 = vst [vmem:[#allocation88_spill] sm:$0xff] %v4325_v19  ;;  %2892 = vmatprep.mubr.msk.f32.mxu0 %vm846_vm1, %v2973_v44  ;;  %v4351_v19 = vpop.f32.mrf.mxu1 }
 0x186   :  { %v4327_v47 = vpop.f32.mrf.mxu0 }
 0x187   :  { %5544 = vst [vmem:[#allocation89_spill] sm:$0xff] %v4327_v47  ;;  %v2974_v47 = vld [vmem:[%s5447_s1 + $0xf8] sm:$0xff] }
 0x188   :  { %v4339_v10 = vpop.f32.mrf.mxu0  ;;  %2893 = vmatmul.mubr.msk.f32.gmra.mxu0 %vm846_vm1, %v2974_v47  ;;  %v2977_v47 = vld [vmem:[%s5447_s1 + $0x110] sm:$0xff] }
 0x189   :  { %5545 = vst [vmem:[#allocation90_spill] sm:$0xff] %v4339_v10  ;;  %2895 = vmatprep.mubr.msk.f32.mxu0 %vm846_vm1, %v2975_v53  ;;  %v4365_v10 = vpop.f32.mrf.mxu1 }
 0x18a   :  { %v4341_v60 = vpop.f32.mrf.mxu0  ;;  %5549 = vst [vmem:[#allocation94_spill] sm:$0xff] %v4365_v10 }
 0x18b   :  { %5546 = vst [vmem:[#allocation91_spill] sm:$0xff] %v4341_v60  ;;  %v2976_v60 = vld [vmem:[%s5447_s1 + $0x108] sm:$0xff] }
 0x18c   :  { %v4353_v44 = vpop.f32.mrf.mxu0  ;;  %2896 = vmatmul.mubr.msk.f32.gmra.mxu0 %vm846_vm1, %v2976_v60  ;;  %v2979_v60 = vld [vmem:[%s5447_s1 + $0x120] sm:$0xff] }
 0x18d   :  { %5547 = vst [vmem:[#allocation92_spill] sm:$0xff] %v4353_v44  ;;  %2898 = vmatprep.mubr.msk.f32.mxu0 %vm846_vm1, %v2977_v47  ;;  %v4379_v44 = vpop.f32.mrf.mxu1 }
 0x18e   :  { %v4355_v3 = vpop.f32.mrf.mxu0  ;;  %5552 = vst [vmem:[#allocation97_spill] sm:$0xff] %v4379_v44 }
 0x18f   :  { %5548 = vst [vmem:[#allocation93_spill] sm:$0xff] %v4355_v3  ;;  %v2978_v3 = vld [vmem:[%s5447_s1 + $0x118] sm:$0xff] }
 0x190   :  { %v4367_v53 = vpop.f32.mrf.mxu0  ;;  %2899 = vmatmul.mubr.msk.f32.gmra.mxu0 %vm846_vm1, %v2978_v3  ;;  %v2981_v3 = vld [vmem:[%s5447_s1 + $0x130] sm:$0xff] }
 0x191   :  { %5550 = vst [vmem:[#allocation95_spill] sm:$0xff] %v4367_v53  ;;  %2901 = vmatprep.mubr.msk.f32.mxu0 %vm846_vm1, %v2979_v60  ;;  %v4393_v53 = vpop.f32.mrf.mxu1 }
 0x192   :  { %v4369_v31 = vpop.f32.mrf.mxu0  ;;  %5555 = vst [vmem:[#allocation100_spill] sm:$0xff] %v4393_v53 }
 0x193   :  { %5551 = vst [vmem:[#allocation96_spill] sm:$0xff] %v4369_v31  ;;  %v2980_v31 = vld [vmem:[%s5447_s1 + $0x128] sm:$0xff] }
 0x194   :  { %v4381_v47 = vpop.f32.mrf.mxu0  ;;  %2902 = vmatmul.mubr.msk.f32.gmra.mxu0 %vm846_vm1, %v2980_v31  ;;  %v2983_v31 = vld [vmem:[%s5447_s1 + $0x140] sm:$0xff] }
 0x195   :  { %5553 = vst [vmem:[#allocation98_spill] sm:$0xff] %v4381_v47  ;;  %2904 = vmatprep.mubr.msk.f32.mxu0 %vm846_vm1, %v2981_v3  ;;  %v4407_v47 = vpop.f32.mrf.mxu1 }
 0x196   :  { %v4383_v10 = vpop.f32.mrf.mxu0  ;;  %5558 = vst [vmem:[#allocation103_spill] sm:$0xff] %v4407_v47 }
 0x197   :  { %5554 = vst [vmem:[#allocation99_spill] sm:$0xff] %v4383_v10  ;;  %v2982_v10 = vld [vmem:[%s5447_s1 + $0x138] sm:$0xff] }
 0x198   :  { %v4395_v60 = vpop.f32.mrf.mxu0  ;;  %2905 = vmatmul.mubr.msk.f32.gmra.mxu0 %vm846_vm1, %v2982_v10  ;;  %v2985_v10 = vld [vmem:[%s5447_s1 + $0x150] sm:$0xff] }
 0x199   :  { %5556 = vst [vmem:[#allocation101_spill] sm:$0xff] %v4395_v60  ;;  %2907 = vmatprep.mubr.msk.f32.mxu0 %vm846_vm1, %v2983_v31  ;;  %v4421_v60 = vpop.f32.mrf.mxu1 }
 0x19a   :  { %v4397_v44 = vpop.f32.mrf.mxu0  ;;  %5561 = vst [vmem:[#allocation106_spill] sm:$0xff] %v4421_v60 }
 0x19b   :  { %5557 = vst [vmem:[#allocation102_spill] sm:$0xff] %v4397_v44  ;;  %v2984_v44 = vld [vmem:[%s5447_s1 + $0x148] sm:$0xff] }
 0x19c   :  { %v4409_v3 = vpop.f32.mrf.mxu0  ;;  %2908 = vmatmul.mubr.msk.f32.gmra.mxu0 %vm846_vm1, %v2984_v44  ;;  %v2987_v44 = vld [vmem:[%s5447_s1 + $0x160] sm:$0xff] }
 0x19d   :  { %5559 = vst [vmem:[#allocation104_spill] sm:$0xff] %v4409_v3  ;;  %2910 = vmatprep.mubr.msk.f32.mxu0 %vm846_vm1, %v2985_v10  ;;  %v4435_v3 = vpop.f32.mrf.mxu1 }
 0x19e   :  { %v4411_v53 = vpop.f32.mrf.mxu0 }
 0x19f   :  { %5560 = vst [vmem:[#allocation105_spill] sm:$0xff] %v4411_v53  ;;  %v2986_v53 = vld [vmem:[%s5447_s1 + $0x158] sm:$0xff] }
 0x1a0   :  { %v4423_v31 = vpop.f32.mrf.mxu0  ;;  %2911 = vmatmul.mubr.msk.f32.gmra.mxu0 %vm846_vm1, %v2986_v53  ;;  %v4447_v53 = vpop.f32.mrf.mxu1 }
 0x1a1   :  { %5562 = vst [vmem:[#allocation107_spill] sm:$0xff] %v4423_v31  ;;  %2913 = vmatprep.mubr.msk.f32.mxu0 %vm846_vm1, %v2987_v44 }
 0x1a2   :  { %v4425_v47 = vpop.f32.mrf.mxu0 }
 0x1a3   :  { %5563 = vst [vmem:[#allocation108_spill] sm:$0xff] %v4425_v47  ;;  %v2988_v47 = vld [vmem:[%s5447_s1 + $0x168] sm:$0xff] }
 0x1a4   :  { %v4437_v10 = vpop.f32.mrf.mxu0  ;;  %2914 = vmatmul.mubr.msk.f32.gmra.mxu0 %vm846_vm1, %v2988_v47 }
 0x1a5   :  { %5564 = vst [vmem:[#allocation109_spill] sm:$0xff] %v4437_v10  ;;  %2916 = vmatprep.mubr.msk.f32.mxu0 %vm846_vm1, %v3419_v21 }
 0x1a6   :  { %v4439_v60 = vpop.f32.mrf.mxu0 }
 0x1a7   :  { %5565 = vst [vmem:[#allocation110_spill] sm:$0xff] %v4439_v60  ;;  %v4457_v60 = vpop.f32.mrf.mxu1 }
 0x1a8   :  { %v4449_v31 = vpop.f32.mrf.mxu0  ;;  %2917 = vmatmul.mubr.msk.f32.gmra.mxu0 %vm846_vm1, %v3432_v23 }
 0x1a9   :  { %5566 = vst [vmem:[#allocation111_spill] sm:$0xff] %v4449_v31  ;;  %2919 = vmatprep.mubr.msk.f32.mxu0 %vm846_vm1, %v3445_v25  ;;  %v4467_v21 = vpop.f32.mrf.mxu1 }
 0x1aa   :  { %v4451_v44 = vpop.f32.mrf.mxu0 }
 0x1ab   :  { %5567 = vst [vmem:[#allocation112_spill] sm:$0xff] %v4451_v44  ;;  %v4477_v25 = vpop.f32.mrf.mxu1 }
 0x1ac   :  { %v4459_v10 = vpop.f32.mrf.mxu0  ;;  %2920 = vmatmul.mubr.msk.f32.gmra.mxu0 %vm846_vm1, %v3458_v27 }
 0x1ad   :  { %5568 = vst [vmem:[#allocation113_spill] sm:$0xff] %v4459_v10  ;;  %2922 = vmatprep.mubr.msk.f32.mxu0 %vm846_vm1, %v3474_v30  ;;  %v4487_v30 = vpop.f32.mrf.mxu1 }
 0x1ae   :  { %v4461_v47 = vpop.f32.mrf.mxu0 }
 0x1af   :  { %5569 = vst [vmem:[#allocation114_spill] sm:$0xff] %v4461_v47 }
 0x1b0   :  { %v4469_v44 = vpop.f32.mrf.mxu0  ;;  %2923 = vmatmul.mubr.msk.f32.gmra.mxu0 %vm846_vm1, %v3488_v32  ;;  %v102_v32 = vlaneseq }
 0x1b1   :  { %5570 = vst [vmem:[#allocation115_spill] sm:$0xff] %v4469_v44  ;;  %2925 = vmatprep.mubr.msk.f32.mxu0 %vm846_vm1, %v3505_v35  ;;  %v4497_v35 = vpop.f32.mrf.mxu1 }
 0x1b2   :  { %v4471_v23 = vpop.f32.mrf.mxu0 }
 0x1b3   :  { %5571 = vst [vmem:[#allocation116_spill] sm:$0xff] %v4471_v23 }
 0x1b4   :  { %v4479_v47 = vpop.f32.mrf.mxu0  ;;  %2926 = vmatmul.mubr.msk.f32.gmra.mxu0 %vm846_vm1, %v3521_v38  ;;  %v103_v38 = vshrl.u32 %v102_v32, 7  ;;  %v100_v32 = vld [vmem:[%s5450_s3] sm:$0x3] }
 0x1b5   :  { %5572 = vst [vmem:[#allocation117_spill] sm:$0xff] %v4479_v47  ;;  %2928 = vmatprep.mubr.msk.f32.mxu0 %vm846_vm1, %v3535_v40  ;;  %v4507_v40 = vpop.f32.mrf.mxu1 }
 0x1b6   :  { %v4481_v27 = vpop.f32.mrf.mxu0  ;;  %5578 = vst [vmem:[#allocation123_spill] sm:$0xff] %v4507_v40 }
 0x1b7   :  { %5573 = vst [vmem:[#allocation118_spill] sm:$0xff] %v4481_v27 }
 0x1b8   :  { %v4489_v23 = vpop.f32.mrf.mxu0  ;;  %2929 = vmatmul.mubr.msk.f32.gmra.mxu0 %vm846_vm1, %v3552_v43  ;;  %v108_v43 = vsub.s32 1, %v103_v38 }
 0x1b9   :  { %5574 = vst [vmem:[#allocation119_spill] sm:$0xff] %v4489_v23  ;;  %2931 = vmatprep.mubr.msk.f32.mxu0 %vm846_vm1, %v3568_v46  ;;  %v104_v23 = vsub.s32 0, %v103_v38 }
 0x1ba   :  { %v4491_v44 = vpop.f32.mrf.mxu0  ;;  %v4527_v38 = vrot.slane %v100_v32, %v108_v43 }
 0x1bb   :  { %5575 = vst [vmem:[#allocation120_spill] sm:$0xff] %v4491_v44 }
 0x1bc   :  { %v4499_v27 = vpop.f32.mrf.mxu0  ;;  %2932 = vmatmul.mubr.msk.f32.gmra.mxu0 %vm846_vm1, %v3582_v48  ;;  %v834_v48 = vld [vmem:[%s5451_s5] sm:$0x3] }
 0x1bd   :  { %5576 = vst [vmem:[#allocation121_spill] sm:$0xff] %v4499_v27  ;;  %2934 = vmatprep.mubr.msk.f32.mxu0 %vm846_vm1, %v3599_v51  ;;  %v4523_v51 = vpop.f32.mrf.mxu1  ;;  %v4535_v27 = vrot.slane %v834_v48, %v108_v43 }
 0x1be   :  { %v4501_v47 = vpop.f32.mrf.mxu0  ;;  %5581 = vst [vmem:[#allocation126_spill] sm:$0xff] %v4523_v51 }
 0x1bf   :  { %5577 = vst [vmem:[#allocation122_spill] sm:$0xff] %v4501_v47 }
 0x1c0   :  { %v4509_v44 = vpop.f32.mrf.mxu0  ;;  %2935 = vmatmul.mubr.msk.f32.gmra.mxu0 %vm846_vm1, %v3615_v54  ;;  %v4531_v54 = vrot.slane %v834_v48, %v104_v23 }
 0x1c1   :  { %5579 = vst [vmem:[#allocation124_spill] sm:$0xff] %v4509_v44  ;;  %2937 = vmatprep.mubr.msk.f32.mxu0 %vm846_vm1, %v3629_v56  ;;  %v4539_v56 = vpop.f32.mrf.mxu1 }
 0x1c2   :  { %v4511_v46 = vpop.f32.mrf.mxu0  ;;  %5583 = vst [vmem:[#allocation128_spill] sm:$0xff] %v4539_v56  ;;  %v380_v56 = vadd.f32 %v3687_v6, %v4527_v38 }
 0x1c3   :  { %5580 = vst [vmem:[#allocation125_spill] sm:$0xff] %v4511_v46  ;;  %v4529_v46 = vrot.slane %v100_v32, %v104_v23  ;;  %v374_v32 = vadd.f32 %v3666_v0, %v4527_v38  ;;  %v4549_v43 = vpop.f32.mrf.mxu1 }
 0x1c4   :  { %v4525_v47 = vpop.f32.mrf.mxu0  ;;  %2938 = vmatmul.mubr.msk.f32.gmra.mxu0 %vm846_vm1, %v3646_v59 }
 0x1c5   :  { %5582 = vst [vmem:[#allocation127_spill] sm:$0xff] %v4525_v47  ;;  %2940 = vmatprep.mubr.msk.f32.mxu0 %vm846_vm1, %v3664_v63  ;;  %v372_v31 = vadd.f32 %v3651_v61, %v4529_v46  ;;  %v378_v61 = vadd.f32 %v3669_v1, %v4529_v46 }
 0x1c6   :  { %v1105_v44 = vpop.f32.mrf.mxu0 }
 0x1c7   :  { %v1106_v10 = vadd.f32 %v1105_v44, %v4531_v54 }
 0x1c8   :  { %v1107_v47 = vpop.f32.mrf.mxu0  ;;  %2941 = vmatmul.mubr.msk.f32.gmra.mxu0 %vm846_vm1, %v3682_v4  ;;  %v4557_v4 = vpop.f32.mrf.mxu1 }
 0x1c9   :  { %v1108_v23 = vadd.f32 %v1107_v47, %v4535_v27  ;;  %v1488_v63 = vmul.f32 %v1106_v10, %v372_v31 }
 0x1ca   :  { %v1111_v40 = vpop.f32.mrf.mxu0 }
 0x1cb   :  { %v1489_v59 = vmul.f32 %v1108_v23, %v374_v32  ;;  %v1112_v48 = vadd.f32 %v1111_v40, %v4531_v54  ;;  %v386_v40 = vadd.f32 %v3699_v9, %v4527_v38  ;;  %v384_v23 = vadd.f32 %v3690_v7, %v4529_v46 }
 0x1cc   :  { %v1113_v44 = vpop.f32.mrf.mxu0 }
 0x1cd   :  { %v1114_v0 = vadd.f32 %v1113_v44, %v4535_v27  ;;  %2105 = vmatprep.mubr.f32.mxu1 %v1489_v59  ;;  %v1490_v32 = vmul.f32 %v1112_v48, %v378_v61 }
 0x1ce   :  { %v1117_v47 = vpop.f32.mrf.mxu0  ;;  %2106 = vmatmul.mubr.f32.vlgmr.msra.gmra.mxu1 %v1488_v63  ;;  %v4565_v63 = vpop.f32.mrf.mxu1 }
 0x1cf   :  { %v1491_v51 = vmul.f32 %v1114_v0, %v380_v56  ;;  %v1118_v31 = vadd.f32 %v1117_v47, %v4531_v54  ;;  %v392_v0 = vadd.f32 %v3712_v13, %v4527_v38 }
 0x1d0   :  { %v1119_v10 = vpop.f32.mrf.mxu0  ;;  %v4573_v47 = vpop.f32.mrf.mxu1 }
 0x1d1   :  { %v1120_v6 = vadd.f32 %v1119_v10, %v4535_v27  ;;  %2110 = vmatprep.mubr.f32.mxu1 %v1491_v51  ;;  %v1492_v56 = vmul.f32 %v1118_v31, %v384_v23  ;;  %v390_v51 = vadd.f32 %v3704_v11, %v4529_v46 }
 0x1d2   :  { %v1123_v59 = vpop.f32.mrf.mxu0  ;;  %2111 = vmatmul.mubr.f32.gmra.mxu1 %v1490_v32 }
 0x1d3   :  { %v1493_v1 = vmul.f32 %v1120_v6, %v386_v40  ;;  %v1124_v48 = vadd.f32 %v1123_v59, %v4531_v54  ;;  %v398_v40 = vadd.f32 %v3724_v17, %v4527_v38  ;;  %v396_v6 = vadd.f32 %v3714_v14, %v4529_v46  ;;  %v4581_v59 = vpop.f32.mrf.mxu1 }
 0x1d4   :  { %v1125_v44 = vpop.f32.mrf.mxu0 }
 0x1d5   :  { %v1126_v9 = vadd.f32 %v1125_v44, %v4535_v27  ;;  %2115 = vmatprep.mubr.f32.mxu1 %v1493_v1  ;;  %v1494_v32 = vmul.f32 %v1124_v48, %v390_v51  ;;  %v404_v44 = vadd.f32 %v3734_v20, %v4527_v38  ;;  %v4589_v51 = vpop.f32.mrf.mxu1 }
 0x1d6   :  { %v1129_v61 = vpop.f32.mrf.mxu0  ;;  %2116 = vmatmul.mubr.f32.gmra.mxu1 %v1492_v56 }
 0x1d7   :  { %v1495_v7 = vmul.f32 %v1126_v9, %v392_v0  ;;  %v1130_v31 = vadd.f32 %v1129_v61, %v4531_v54  ;;  %v402_v0 = vadd.f32 %v3727_v18, %v4529_v46 }
 0x1d8   :  { %v1131_v10 = vpop.f32.mrf.mxu0 }
 0x1d9   :  { %v1132_v13 = vadd.f32 %v1131_v10, %v4535_v27  ;;  %2120 = vmatprep.mubr.f32.mxu1 %v1495_v7  ;;  %v1496_v1 = vmul.f32 %v1130_v31, %v396_v6  ;;  %v410_v31 = vadd.f32 %v3747_v28, %v4527_v38  ;;  %v408_v10 = vadd.f32 %v3739_v24, %v4529_v46 }
 0x1da   :  { %v1135_v23 = vpop.f32.mrf.mxu0  ;;  %2121 = vmatmul.mubr.f32.gmra.mxu1 %v1494_v32 }
 0x1db   :  { %v1497_v11 = vmul.f32 %v1132_v13, %v398_v40  ;;  %v1136_v56 = vadd.f32 %v1135_v23, %v4531_v54  ;;  %v4597_v13 = vpop.f32.mrf.mxu1 }
 0x1dc   :  { %v1137_v48 = vpop.f32.mrf.mxu0 }
 0x1dd   :  { %v1138_v17 = vadd.f32 %v1137_v48, %v4535_v27  ;;  %2125 = vmatprep.mubr.f32.mxu1 %v1497_v11  ;;  %v1498_v61 = vmul.f32 %v1136_v56, %v402_v0  ;;  %v414_v56 = vadd.f32 %v3749_v29, %v4529_v46 }
 0x1de   :  { %v1141_v9 = vpop.f32.mrf.mxu0  ;;  %2126 = vmatmul.mubr.f32.gmra.mxu1 %v1496_v1  ;;  %v416_v1 = vadd.f32 %v3759_v34, %v4527_v38 }
 0x1df   :  { %v1499_v14 = vmul.f32 %v1138_v17, %v404_v44  ;;  %v1142_v7 = vadd.f32 %v1141_v9, %v4531_v54  ;;  %v4605_v44 = vpop.f32.mrf.mxu1 }
 0x1e0   :  { %v1143_v32 = vpop.f32.mrf.mxu0 }
 0x1e1   :  { %v1144_v20 = vadd.f32 %v1143_v32, %v4535_v27  ;;  %2130 = vmatprep.mubr.f32.mxu1 %v1499_v14  ;;  %v1500_v6 = vmul.f32 %v1142_v7, %v408_v10  ;;  %v422_v14 = vadd.f32 %v3769_v39, %v4527_v38  ;;  %v4613_v32 = vpop.f32.mrf.mxu1 }
 0x1e2   :  { %v1147_v40 = vpop.f32.mrf.mxu0  ;;  %2131 = vmatmul.mubr.f32.gmra.mxu1 %v1498_v61  ;;  %v420_v61 = vadd.f32 %v3762_v36, %v4529_v46 }
 0x1e3   :  { %v1501_v18 = vmul.f32 %v1144_v20, %v410_v31  ;;  %v1148_v23 = vadd.f32 %v1147_v40, %v4531_v54  ;;  %v428_v40 = vadd.f32 %v3782_v45, %v4527_v38 }
 0x1e4   :  { %v1149_v11 = vpop.f32.mrf.mxu0 }
 0x1e5   :  { %v1150_v28 = vadd.f32 %v1149_v11, %v4535_v27  ;;  %2135 = vmatprep.mubr.f32.mxu1 %v1501_v18  ;;  %v1502_v17 = vmul.f32 %v1148_v23, %v414_v56  ;;  %v426_v18 = vadd.f32 %v3774_v42, %v4529_v46  ;;  %v4621_v23 = vpop.f32.mrf.mxu1  ;;  %v5584_v56 = vld [vmem:[#allocation3_spill] sm:$0xff] }
 0x1e6   :  { %v1153_v48 = vpop.f32.mrf.mxu0  ;;  %2136 = vmatmul.mubr.f32.gmra.mxu1 %v1500_v6 }
 0x1e7   :  { %v1503_v24 = vmul.f32 %v1150_v28, %v416_v1  ;;  %v1154_v0 = vadd.f32 %v1153_v48, %v4531_v54  ;;  %v434_v48 = vadd.f32 %v5584_v56, %v4527_v38 }
 0x1e8   :  { %v1155_v9 = vpop.f32.mrf.mxu0 }
 0x1e9   :  { %v1156_v34 = vadd.f32 %v1155_v9, %v4535_v27  ;;  %2140 = vmatprep.mubr.f32.mxu1 %v1503_v24  ;;  %v1504_v31 = vmul.f32 %v1154_v0, %v420_v61  ;;  %v5585_v24 = vld [vmem:[#allocation2_spill] sm:$0xff]  ;;  %v4629_v9 = vpop.f32.mrf.mxu1 }
 0x1ea   :  { %v1159_v7 = vpop.f32.mrf.mxu0  ;;  %2141 = vmatmul.mubr.f32.gmra.mxu1 %v1502_v17  ;;  %v432_v17 = vadd.f32 %v5585_v24, %v4529_v46 }
 0x1eb   :  { %v1505_v29 = vmul.f32 %v1156_v34, %v422_v14  ;;  %v1160_v20 = vadd.f32 %v1159_v7, %v4531_v54  ;;  %v5586_v7 = vld [vmem:[#allocation5_spill] sm:$0xff] }
 0x1ec   :  { %v1161_v10 = vpop.f32.mrf.mxu0 }
 0x1ed   :  { %v1162_v39 = vadd.f32 %v1161_v10, %v4535_v27  ;;  %2145 = vmatprep.mubr.f32.mxu1 %v1505_v29  ;;  %v1506_v11 = vmul.f32 %v1160_v20, %v426_v18  ;;  %v440_v29 = vadd.f32 %v5586_v7, %v4527_v38  ;;  %v5587_v20 = vld [vmem:[#allocation4_spill] sm:$0xff]  ;;  %v4637_v18 = vpop.f32.mrf.mxu1 }
 0x1ee   :  { %v1165_v6 = vpop.f32.mrf.mxu0  ;;  %2146 = vmatmul.mubr.f32.gmra.mxu1 %v1504_v31  ;;  %v438_v10 = vadd.f32 %v5587_v20, %v4529_v46 }
 0x1ef   :  { %v1507_v36 = vmul.f32 %v1162_v39, %v428_v40  ;;  %v1166_v1 = vadd.f32 %v1165_v6, %v4531_v54 }
 0x1f0   :  { %v1167_v28 = vpop.f32.mrf.mxu0 }
 0x1f1   :  { %v1168_v45 = vadd.f32 %v1167_v28, %v4535_v27  ;;  %2150 = vmatprep.mubr.f32.mxu1 %v1507_v36  ;;  %v1508_v14 = vmul.f32 %v1166_v1, %v432_v17  ;;  %v5588_v1 = vld [vmem:[#allocation7_spill] sm:$0xff] }
 0x1f2   :  { %v1171_v0 = vpop.f32.mrf.mxu0  ;;  %2151 = vmatmul.mubr.f32.gmra.mxu1 %v1506_v11  ;;  %v446_v28 = vadd.f32 %v5588_v1, %v4527_v38  ;;  %v5593_v1 = vld [vmem:[#allocation11_spill] sm:$0xff] }
 0x1f3   :  { %v1509_v42 = vmul.f32 %v1168_v45, %v434_v48  ;;  %v1172_v34 = vadd.f32 %v1171_v0, %v4531_v54  ;;  %v5589_v48 = vld [vmem:[#allocation6_spill] sm:$0xff]  ;;  %v4645_v0 = vpop.f32.mrf.mxu1 }
 0x1f4   :  { %v1173_v61 = vpop.f32.mrf.mxu0  ;;  %v444_v45 = vadd.f32 %v5589_v48, %v4529_v46  ;;  %v5594_v48 = vld [vmem:[#allocation10_spill] sm:$0xff] }
 0x1f5   :  { %v1174_v31 = vadd.f32 %v1173_v61, %v4535_v27  ;;  %2155 = vmatprep.mubr.f32.mxu1 %v1509_v42  ;;  %v1510_v6 = vmul.f32 %v1172_v34, %v438_v10  ;;  %v5590_v61 = vld [vmem:[#allocation9_spill] sm:$0xff] }
 0x1f6   :  { %v1177_v40 = vpop.f32.mrf.mxu0  ;;  %2156 = vmatmul.mubr.f32.gmra.mxu1 %v1508_v14  ;;  %v452_v7 = vadd.f32 %v5590_v61, %v4527_v38 }
 0x1f7   :  { %v1511_v39 = vmul.f32 %v1174_v31, %v440_v29  ;;  %v1178_v36 = vadd.f32 %v1177_v40, %v4531_v54  ;;  %v5591_v31 = vld [vmem:[#allocation8_spill] sm:$0xff] }
 0x1f8   :  { %v1179_v11 = vpop.f32.mrf.mxu0  ;;  %v450_v20 = vadd.f32 %v5591_v31, %v4529_v46 }
 0x1f9   :  { %v1180_v56 = vadd.f32 %v1179_v11, %v4535_v27  ;;  %2160 = vmatprep.mubr.f32.mxu1 %v1511_v39  ;;  %v1512_v42 = vmul.f32 %v1178_v36, %v444_v45  ;;  %v4653_v39 = vpop.f32.mrf.mxu1  ;;  %v456_v45 = vadd.f32 %v5594_v48, %v4529_v46 }
 0x1fa   :  { %v1183_v24 = vpop.f32.mrf.mxu0  ;;  %2161 = vmatmul.mubr.f32.gmra.mxu1 %v1510_v6  ;;  %5592 = vst [vmem:[#allocation3_spill] sm:$0xff] %v4653_v39 }
 0x1fb   :  { %v1513_v17 = vmul.f32 %v1180_v56, %v446_v28  ;;  %v1184_v14 = vadd.f32 %v1183_v24, %v4531_v54  ;;  %v458_v28 = vadd.f32 %v5593_v1, %v4527_v38 }
 0x1fc   :  { %v1185_v34 = vpop.f32.mrf.mxu0 }
 0x1fd   :  { %v1186_v29 = vadd.f32 %v1185_v34, %v4535_v27  ;;  %2165 = vmatprep.mubr.f32.mxu1 %v1513_v17  ;;  %v1514_v6 = vmul.f32 %v1184_v14, %v450_v20  ;;  %v5596_v20 = vld [vmem:[#allocation12_spill] sm:$0xff] }
 0x1fe   :  { %v1189_v10 = vpop.f32.mrf.mxu0  ;;  %2166 = vmatmul.mubr.f32.gmra.mxu1 %v1512_v42  ;;  %v4661_v42 = vpop.f32.mrf.mxu1 }
 0x1ff   :  { %v1515_v40 = vmul.f32 %v1186_v29, %v452_v7  ;;  %v1190_v36 = vadd.f32 %v1189_v10, %v4531_v54  ;;  %v5595_v7 = vld [vmem:[#allocation13_spill] sm:$0xff]  ;;  %v462_v10 = vadd.f32 %v5596_v20, %v4529_v46 }
 0x200   :  { %v1191_v11 = vpop.f32.mrf.mxu0  ;;  %v464_v29 = vadd.f32 %v5595_v7, %v4527_v38 }
 0x201   :  { %v1192_v56 = vadd.f32 %v1191_v11, %v4535_v27  ;;  %2170 = vmatprep.mubr.f32.mxu1 %v1515_v40  ;;  %v1516_v34 = vmul.f32 %v1190_v36, %v456_v45  ;;  %v5599_v45 = vld [vmem:[#allocation17_spill] sm:$0xff] }
 0x202   :  { %v1195_v24 = vpop.f32.mrf.mxu0  ;;  %2171 = vmatmul.mubr.f32.gmra.mxu1 %v1514_v6  ;;  %v4669_v6 = vpop.f32.mrf.mxu1 }
 0x203   :  { %v1517_v17 = vmul.f32 %v1192_v56, %v458_v28  ;;  %v1196_v14 = vadd.f32 %v1195_v24, %v4531_v54  ;;  %5597 = vst [vmem:[#allocation2_spill] sm:$0xff] %v4669_v6  ;;  %v5598_v56 = vld [vmem:[#allocation15_spill] sm:$0xff]  ;;  %v476_v24 = vadd.f32 %v5599_v45, %v4527_v38 }
 0x204   :  { %v1197_v61 = vpop.f32.mrf.mxu0  ;;  %v470_v48 = vadd.f32 %v5598_v56, %v4527_v38  ;;  %v4685_v56 = vpop.f32.mrf.mxu1 }
 0x205   :  { %v1198_v31 = vadd.f32 %v1197_v61, %v4535_v27  ;;  %2175 = vmatprep.mubr.f32.mxu1 %v1517_v17  ;;  %v1518_v1 = vmul.f32 %v1196_v14, %v462_v10  ;;  %v5600_v17 = vld [vmem:[#allocation26_spill] sm:$0xff]  ;;  %v5603_v10 = vld [vmem:[#allocation23_spill] sm:$0xff] }
 0x206   :  { %v1201_v40 = vpop.f32.mrf.mxu0  ;;  %2176 = vmatmul.mubr.f32.gmra.mxu1 %v1516_v34  ;;  %v1210_v61 = vadd.f32 %v5600_v17, %v4535_v27  ;;  %v5601_v34 = vld [vmem:[#allocation14_spill] sm:$0xff]  ;;  %v5604_v17 = vld [vmem:[#allocation19_spill] sm:$0xff] }
 0x207   :  { %v1519_v11 = vmul.f32 %v1198_v31, %v464_v29  ;;  %v1202_v36 = vadd.f32 %v1201_v40, %v4531_v54  ;;  %v468_v29 = vadd.f32 %v5601_v34, %v4529_v46  ;;  %v5602_v31 = vld [vmem:[#allocation16_spill] sm:$0xff]  ;;  %v1208_v40 = vadd.f32 %v5603_v10, %v4531_v54  ;;  %v5607_v34 = vld [vmem:[#allocation29_spill] sm:$0xff]  ;;  %v4695_v10 = vpop.f32.mrf.mxu1 }
 0x208   :  { %v1203_v28 = vpop.f32.mrf.mxu0  ;;  %v474_v20 = vadd.f32 %v5602_v31, %v4529_v46  ;;  %v1523_v6 = vmul.f32 %v1210_v61, %v476_v24  ;;  %v482_v39 = vadd.f32 %v5604_v17, %v4527_v38  ;;  %v1214_v31 = vadd.f32 %v5607_v34, %v4531_v54  ;;  %5608 = vst [vmem:[#allocation5_spill] sm:$0xff] %v4695_v10  ;;  %v5609_v24 = vld [vmem:[#allocation21_spill] sm:$0xff]  ;;  %v5614_v34 = vld [vmem:[#allocation44_spill] sm:$0xff] }
 0x209   :  { %v1204_v7 = vadd.f32 %v1203_v28, %v4535_v27  ;;  %2180 = vmatprep.mubr.f32.mxu1 %v1519_v11  ;;  %v1520_v45 = vmul.f32 %v1202_v36, %v468_v29  ;;  %v5605_v11 = vld [vmem:[#allocation32_spill] sm:$0xff]  ;;  %v488_v61 = vadd.f32 %v5609_v24, %v4527_v38  ;;  %v5610_v29 = vld [vmem:[#allocation38_spill] sm:$0xff]  ;;  %v1228_v24 = vadd.f32 %v5614_v34, %v4535_v27 }
 0x20a   :  { %2181 = vmatmul.mubr.f32.gmra.mxu1 %v1518_v1  ;;  %v1216_v28 = vadd.f32 %v5605_v11, %v4535_v27  ;;  %v1522_v1 = vmul.f32 %v1208_v40, %v474_v20  ;;  %v1222_v17 = vadd.f32 %v5610_v29, %v4535_v27  ;;  %v5612_v40 = vld [vmem:[#allocation35_spill] sm:$0xff]  ;;  %v4705_v11 = vpop.f32.mrf.mxu1 }
 0x20b   :  { %v1521_v14 = vmul.f32 %v1204_v7, %v470_v48  ;;  %v5606_v48 = vld [vmem:[#allocation18_spill] sm:$0xff] }
 0x20c   :  { %v480_v7 = vadd.f32 %v5606_v48, %v4529_v46  ;;  %v1525_v36 = vmul.f32 %v1216_v28, %v482_v39  ;;  %v1527_v48 = vmul.f32 %v1222_v17, %v488_v61  ;;  %v5613_v39 = vld [vmem:[#allocation24_spill] sm:$0xff]  ;;  %v5618_v61 = vld [vmem:[#allocation27_spill] sm:$0xff] }
 0x20d   :  { %2185 = vmatprep.mubr.f32.mxu1 %v1521_v14  ;;  %v494_v28 = vadd.f32 %v5613_v39, %v4527_v38  ;;  %v500_v17 = vadd.f32 %v5618_v61, %v4527_v38  ;;  %v5619_v39 = vld [vmem:[#allocation50_spill] sm:$0xff]  ;;  %v5623_v61 = vld [vmem:[#allocation56_spill] sm:$0xff] }
 0x20e   :  { %2186 = vmatmul.mubr.f32.gmra.mxu1 %v1520_v45  ;;  %v1524_v14 = vmul.f32 %v1214_v31, %v480_v7  ;;  %v1220_v45 = vadd.f32 %v5612_v40, %v4531_v54  ;;  %v5615_v7 = vld [vmem:[#allocation22_spill] sm:$0xff]  ;;  %v1234_v10 = vadd.f32 %v5619_v39, %v4535_v27 }
 0x20f   :  { %2190 = vmatprep.mubr.f32.mxu1 %v1523_v6  ;;  %v5611_v6 = vld [vmem:[#allocation20_spill] sm:$0xff]  ;;  %v492_v31 = vadd.f32 %v5615_v7, %v4529_v46  ;;  %v1529_v40 = vmul.f32 %v1228_v24, %v494_v28  ;;  %v5622_v28 = vld [vmem:[#allocation30_spill] sm:$0xff] }
 0x210   :  { %v486_v20 = vadd.f32 %v5611_v6, %v4529_v46  ;;  %v4715_v6 = vpop.f32.mrf.mxu1  ;;  %v506_v24 = vadd.f32 %v5622_v28, %v4527_v38  ;;  %v1246_v28 = vadd.f32 %v4156_v52, %v4535_v27 }
 0x211   :  { %5617 = vst [vmem:[#allocation4_spill] sm:$0xff] %v4715_v6  ;;  %v1240_v6 = vadd.f32 %v5623_v61, %v4535_v27 }
 0x212   :  { %2191 = vmatmul.mubr.f32.gmra.mxu1 %v1522_v1  ;;  %v1526_v1 = vmul.f32 %v1220_v45, %v486_v20  ;;  %v5620_v20 = vld [vmem:[#allocation25_spill] sm:$0xff]  ;;  %v4725_v7 = vpop.f32.mrf.mxu1 }
 0x213   :  { %2195 = vmatprep.mubr.f32.mxu1 %v1525_v36  ;;  %v5616_v36 = vld [vmem:[#allocation41_spill] sm:$0xff]  ;;  %v498_v45 = vadd.f32 %v5620_v20, %v4529_v46 }
 0x214   :  { %v1226_v29 = vadd.f32 %v5616_v36, %v4531_v54  ;;  %v1531_v36 = vmul.f32 %v1234_v10, %v500_v17  ;;  %v4735_v20 = vpop.f32.mrf.mxu1  ;;  %v5626_v10 = vld [vmem:[#allocation33_spill] sm:$0xff] }
 0x215   :  { %v512_v17 = vadd.f32 %v5626_v10, %v4527_v38  ;;  %v5630_v10 = vld [vmem:[#allocation39_spill] sm:$0xff] }
 0x216   :  { %2196 = vmatmul.mubr.f32.gmra.mxu1 %v1524_v14  ;;  %v1528_v14 = vmul.f32 %v1226_v29, %v492_v31  ;;  %v5624_v31 = vld [vmem:[#allocation28_spill] sm:$0xff]  ;;  %v4745_v61 = vpop.f32.mrf.mxu1 }
 0x217   :  { %2200 = vmatprep.mubr.f32.mxu1 %v1527_v48  ;;  %v5621_v48 = vld [vmem:[#allocation47_spill] sm:$0xff]  ;;  %v504_v29 = vadd.f32 %v5624_v31, %v4529_v46  ;;  %v1535_v31 = vmul.f32 %v1246_v28, %v512_v17  ;;  %v524_v17 = vadd.f32 %v5630_v10, %v4527_v38  ;;  %v1258_v28 = vadd.f32 %v4199_v57, %v4535_v27 }
 0x218   :  { %v1232_v34 = vadd.f32 %v5621_v48, %v4531_v54  ;;  %v1533_v48 = vmul.f32 %v1240_v6, %v506_v24  ;;  %v5628_v6 = vld [vmem:[#allocation36_spill] sm:$0xff]  ;;  %v1270_v10 = vadd.f32 %v4239_v33, %v4535_v27 }
 0x219   :  { %v518_v24 = vadd.f32 %v5628_v6, %v4527_v38 }
 0x21a   :  { %2201 = vmatmul.mubr.f32.gmra.mxu1 %v1526_v1  ;;  %v1530_v1 = vmul.f32 %v1232_v34, %v498_v45  ;;  %v5627_v45 = vld [vmem:[#allocation31_spill] sm:$0xff] }
 0x21b   :  { %2205 = vmatprep.mubr.f32.mxu1 %v1529_v40  ;;  %v5625_v40 = vld [vmem:[#allocation53_spill] sm:$0xff]  ;;  %v510_v34 = vadd.f32 %v5627_v45, %v4529_v46 }
 0x21c   :  { %v1238_v39 = vadd.f32 %v5625_v40, %v4531_v54  ;;  %v1252_v40 = vadd.f32 %v4179_v8, %v4535_v27 }
 0x21e   :  { %2206 = vmatmul.mubr.f32.gmra.mxu1 %v1528_v14  ;;  %v1532_v14 = vmul.f32 %v1238_v39, %v504_v29  ;;  %v1250_v39 = vadd.f32 %v4169_v2, %v4531_v54  ;;  %v1539_v2 = vmul.f32 %v1258_v28, %v524_v17  ;;  %v5635_v17 = vld [vmem:[#allocation43_spill] sm:$0xff] }
 0x21f   :  { %2210 = vmatprep.mubr.f32.mxu1 %v1531_v36  ;;  %v1244_v36 = vadd.f32 %v4146_v58, %v4531_v54  ;;  %v1537_v58 = vmul.f32 %v1252_v40, %v518_v24  ;;  %v1264_v24 = vadd.f32 %v4219_v37, %v4535_v27  ;;  %v5633_v40 = vld [vmem:[#allocation40_spill] sm:$0xff]  ;;  %v534_v28 = vadd.f32 %v5635_v17, %v4529_v46 }
 0x221   :  { %v1534_v52 = vmul.f32 %v1244_v36, %v510_v34  ;;  %v1256_v34 = vadd.f32 %v4189_v55, %v4531_v54 }
 0x222   :  { %2211 = vmatmul.mubr.f32.gmra.mxu1 %v1530_v1  ;;  %v5629_v1 = vld [vmem:[#allocation34_spill] sm:$0xff] }
 0x223   :  { %2215 = vmatprep.mubr.f32.mxu1 %v1533_v48  ;;  %v516_v29 = vadd.f32 %v5629_v1, %v4529_v46  ;;  %v4755_v48 = vpop.f32.mrf.mxu1  ;;  %v1262_v1 = vadd.f32 %v4209_v5, %v4531_v54 }
 0x225   :  { %v1536_v8 = vmul.f32 %v1250_v39, %v516_v29  ;;  %v4765_v36 = vpop.f32.mrf.mxu1  ;;  %v5634_v39 = vld [vmem:[#allocation45_spill] sm:$0xff] }
 0x226   :  { %2216 = vmatmul.mubr.f32.gmra.mxu1 %v1532_v14  ;;  %v5631_v14 = vld [vmem:[#allocation37_spill] sm:$0xff] }
 0x227   :  { %2220 = vmatprep.mubr.f32.mxu1 %v1535_v31  ;;  %v522_v45 = vadd.f32 %v5631_v14, %v4529_v46  ;;  %v5632_v31 = vld [vmem:[#allocation42_spill] sm:$0xff]  ;;  %v4775_v29 = vpop.f32.mrf.mxu1 }
 0x228   :  { %v530_v6 = vadd.f32 %v5632_v31, %v4527_v38  ;;  %v5637_v31 = vld [vmem:[#allocation46_spill] sm:$0xff] }
 0x229   :  { %v1538_v57 = vmul.f32 %v1256_v34, %v522_v45  ;;  %v4785_v14 = vpop.f32.mrf.mxu1  ;;  %v5636_v45 = vld [vmem:[#allocation48_spill] sm:$0xff] }
 0x22a   :  { %2221 = vmatmul.mubr.f32.gmra.mxu1 %v1534_v52  ;;  %v528_v52 = vadd.f32 %v5633_v40, %v4529_v46  ;;  %v1541_v55 = vmul.f32 %v1264_v24, %v530_v6  ;;  %v542_v34 = vadd.f32 %v5636_v45, %v4527_v38  ;;  %v540_v6 = vadd.f32 %v5637_v31, %v4529_v46  ;;  %v5638_v40 = vld [vmem:[#allocation51_spill] sm:$0xff] }
 0x22b   :  { %2225 = vmatprep.mubr.f32.mxu1 %v1537_v58  ;;  %v536_v58 = vadd.f32 %v5634_v39, %v4527_v38  ;;  %v1274_v24 = vadd.f32 %v4253_v26, %v4531_v54  ;;  %v1286_v45 = vadd.f32 %v4309_v50, %v4531_v54  ;;  %v1294_v31 = vadd.f32 %v4351_v19, %v4535_v27 }
 0x22c   :  { %v1540_v37 = vmul.f32 %v1262_v1, %v528_v52  ;;  %v548_v52 = vadd.f32 %v5638_v40, %v4527_v38  ;;  %v1282_v1 = vadd.f32 %v4295_v41, %v4535_v27 }
 0x22d   :  { %v1543_v5 = vmul.f32 %v1270_v10, %v536_v58  ;;  %v1280_v58 = vadd.f32 %v4281_v22, %v4531_v54 }
 0x22e   :  { %2226 = vmatmul.mubr.f32.gmra.mxu1 %v1536_v8  ;;  %v1268_v8 = vadd.f32 %v4229_v49, %v4531_v54  ;;  %v1547_v26 = vmul.f32 %v1282_v1, %v548_v52  ;;  %v566_v52 = vadd.f32 %v4148_v12, %v4527_v38  ;;  %v5644_v1 = vld [vmem:[#allocation97_spill] sm:$0xff]  ;;  %v5648_v12 = vld [vmem:[#allocation103_spill] sm:$0xff] }
 0x22f   :  { %2230 = vmatprep.mubr.f32.mxu1 %v1539_v2  ;;  %v1276_v2 = vadd.f32 %v4267_v62, %v4535_v27  ;;  %v1544_v62 = vmul.f32 %v1274_v24, %v540_v6  ;;  %v5643_v6 = vld [vmem:[#allocation55_spill] sm:$0xff] }
 0x230   :  { %v1542_v33 = vmul.f32 %v1268_v8, %v534_v28  ;;  %v1288_v28 = vadd.f32 %v4323_v15, %v4535_v27  ;;  %v5641_v8 = vld [vmem:[#allocation52_spill] sm:$0xff]  ;;  %v558_v24 = vadd.f32 %v5643_v6, %v4529_v46 }
 0x231   :  { %v1545_v49 = vmul.f32 %v1276_v2, %v542_v34  ;;  %v5642_v2 = vld [vmem:[#allocation57_spill] sm:$0xff] }
 0x232   :  { %2231 = vmatmul.mubr.f32.gmra.mxu1 %v1538_v57  ;;  %v4795_v57 = vpop.f32.mrf.mxu1 }
 0x233   :  { %2235 = vmatprep.mubr.f32.mxu1 %v1541_v55  ;;  %v5639_v55 = vld [vmem:[#allocation49_spill] sm:$0xff] }
 0x234   :  { %v546_v39 = vadd.f32 %v5639_v55, %v4529_v46  ;;  %v4805_v10 = vpop.f32.mrf.mxu1  ;;  %v5645_v55 = vld [vmem:[#allocation58_spill] sm:$0xff] }
 0x236   :  { %2236 = vmatmul.mubr.f32.gmra.mxu1 %v1540_v37  ;;  %v5640_v37 = vld [vmem:[#allocation54_spill] sm:$0xff]  ;;  %v1546_v41 = vmul.f32 %v1280_v58, %v546_v39  ;;  %v4815_v34 = vpop.f32.mrf.mxu1  ;;  %v564_v39 = vadd.f32 %v5645_v55, %v4529_v46 }
 0x237   :  { %2240 = vmatprep.mubr.f32.mxu1 %v1543_v5  ;;  %v554_v17 = vadd.f32 %v5640_v37, %v4527_v38  ;;  %v552_v5 = vadd.f32 %v5641_v8, %v4529_v46  ;;  %v5646_v58 = vld [vmem:[#allocation94_spill] sm:$0xff] }
 0x238   :  { %v4825_v40 = vpop.f32.mrf.mxu1 }
 0x239   :  { %v1549_v22 = vmul.f32 %v1288_v28, %v554_v17  ;;  %v1548_v15 = vmul.f32 %v1286_v45, %v552_v5  ;;  %v5647_v17 = vld [vmem:[#allocation60_spill] sm:$0xff]  ;;  %v5649_v5 = vld [vmem:[#allocation59_spill] sm:$0xff] }
 0x23a   :  { %2241 = vmatmul.mubr.f32.gmra.mxu1 %v1542_v33  ;;  %v560_v33 = vadd.f32 %v5642_v2, %v4527_v38  ;;  %v4835_v37 = vpop.f32.mrf.mxu1  ;;  %v572_v28 = vadd.f32 %v5647_v17, %v4527_v38  ;;  %v570_v45 = vadd.f32 %v5649_v5, %v4529_v46 }
 0x23b   :  { %2245 = vmatprep.mubr.f32.mxu1 %v1545_v49  ;;  %v1292_v49 = vadd.f32 %v4337_v16, %v4531_v54 }
 0x23c   :  { %v1551_v50 = vmul.f32 %v1294_v31, %v560_v33  ;;  %v4845_v33 = vpop.f32.mrf.mxu1 }
 0x23d   :  { %v1550_v19 = vmul.f32 %v1292_v49, %v558_v24  ;;  %v1312_v24 = vadd.f32 %v4435_v3, %v4535_v27 }
 0x23e   :  { %2246 = vmatmul.mubr.f32.gmra.mxu1 %v1544_v62  ;;  %v1300_v62 = vadd.f32 %v5644_v1, %v4535_v27  ;;  %v5653_v1 = vld [vmem:[#allocation106_spill] sm:$0xff] }
 0x23f   :  { %2250 = vmatprep.mubr.f32.mxu1 %v1547_v26  ;;  %v1298_v26 = vadd.f32 %v5646_v58, %v4531_v54 }
 0x240   :  { %v1553_v16 = vmul.f32 %v1300_v62, %v566_v52  ;;  %v1310_v62 = vadd.f32 %v5653_v1, %v4531_v54  ;;  %v1328_v1 = vadd.f32 %v4487_v30, %v4531_v54 }
 0x241   :  { %v1552_v8 = vmul.f32 %v1298_v26, %v564_v39  ;;  %v5654_v39 = vld [vmem:[#allocation64_spill] sm:$0xff]  ;;  %v1318_v26 = vadd.f32 %v4457_v60, %v4535_v27 }
 0x242   :  { %2251 = vmatmul.mubr.f32.gmra.mxu1 %v1546_v41  ;;  %v1306_v41 = vadd.f32 %v5648_v12, %v4535_v27  ;;  %v584_v58 = vadd.f32 %v5654_v39, %v4527_v38 }
 0x243   :  { %2255 = vmatprep.mubr.f32.mxu1 %v1549_v22  ;;  %v5650_v22 = vld [vmem:[#allocation100_spill] sm:$0xff] }
 0x244   :  { %v1304_v2 = vadd.f32 %v5650_v22, %v4531_v54  ;;  %v1555_v31 = vmul.f32 %v1306_v41, %v572_v28  ;;  %v1316_v28 = vadd.f32 %v4447_v53, %v4531_v54  ;;  %v1559_v41 = vmul.f32 %v1318_v26, %v584_v58  ;;  %v5657_v22 = vld [vmem:[#allocation65_spill] sm:$0xff]  ;;  %v5661_v58 = vld [vmem:[#allocation126_spill] sm:$0xff] }
 0x245   :  { %v1336_v26 = vadd.f32 %v5661_v58, %v4535_v27  ;;  %v5669_v58 = vld [vmem:[#allocation76_spill] sm:$0xff] }
 0x246   :  { %2256 = vmatmul.mubr.f32.gmra.mxu1 %v1548_v15  ;;  %v5651_v15 = vld [vmem:[#allocation62_spill] sm:$0xff]  ;;  %v1554_v49 = vmul.f32 %v1304_v2, %v570_v45  ;;  %v1324_v45 = vadd.f32 %v4477_v25, %v4535_v27  ;;  %v588_v2 = vadd.f32 %v5657_v22, %v4529_v46  ;;  %v5665_v22 = vld [vmem:[#allocation71_spill] sm:$0xff] }
 0x247   :  { %2260 = vmatprep.mubr.f32.mxu1 %v1551_v50  ;;  %v578_v6 = vadd.f32 %v5651_v15, %v4527_v38  ;;  %v5652_v50 = vld [vmem:[#allocation61_spill] sm:$0xff] }
 0x248   :  { %v576_v52 = vadd.f32 %v5652_v50, %v4529_v46  ;;  %v5659_v50 = vld [vmem:[#allocation67_spill] sm:$0xff] }
 0x249   :  { %v1557_v55 = vmul.f32 %v1312_v24, %v578_v6  ;;  %v5658_v6 = vld [vmem:[#allocation68_spill] sm:$0xff] }
 0x24a   :  { %2261 = vmatmul.mubr.f32.gmra.mxu1 %v1550_v19  ;;  %v4855_v19 = vpop.f32.mrf.mxu1  ;;  %v1556_v3 = vmul.f32 %v1310_v62, %v576_v52  ;;  %v596_v24 = vadd.f32 %v5658_v6, %v4527_v38  ;;  %v594_v52 = vadd.f32 %v5659_v50, %v4529_v46  ;;  %v1348_v50 = vadd.f32 %v4565_v63, %v4535_v27 }
 0x24b   :  { %2265 = vmatprep.mubr.f32.mxu1 %v1553_v16  ;;  %v5655_v16 = vld [vmem:[#allocation63_spill] sm:$0xff] }
 0x24c   :  { %v582_v17 = vadd.f32 %v5655_v16, %v4529_v46  ;;  %v4865_v12 = vpop.f32.mrf.mxu1 }
 0x24e   :  { %2266 = vmatmul.mubr.f32.gmra.mxu1 %v1552_v8  ;;  %v5656_v8 = vld [vmem:[#allocation66_spill] sm:$0xff]  ;;  %v1558_v60 = vmul.f32 %v1316_v28, %v582_v17  ;;  %v4875_v15 = vpop.f32.mrf.mxu1  ;;  %v5663_v17 = vld [vmem:[#allocation123_spill] sm:$0xff] }
 0x24f   :  { %2270 = vmatprep.mubr.f32.mxu1 %v1555_v31  ;;  %v590_v5 = vadd.f32 %v5656_v8, %v4527_v38  ;;  %v1322_v31 = vadd.f32 %v4467_v21, %v4531_v54  ;;  %v1334_v28 = vadd.f32 %v5663_v17, %v4531_v54  ;;  %v5664_v8 = vld [vmem:[#allocation72_spill] sm:$0xff]  ;;  %v1352_v17 = vadd.f32 %v4573_v47, %v4531_v54 }
 0x250   :  { %v4885_v62 = vpop.f32.mrf.mxu1 }
 0x251   :  { %v1561_v53 = vmul.f32 %v1324_v45, %v590_v5  ;;  %v1560_v25 = vmul.f32 %v1322_v31, %v588_v2  ;;  %v608_v5 = vadd.f32 %v5664_v8, %v4527_v38  ;;  %v1342_v45 = vadd.f32 %v4549_v43, %v4535_v27  ;;  %v5666_v31 = vld [vmem:[#allocation128_spill] sm:$0xff] }
 0x252   :  { %2271 = vmatmul.mubr.f32.gmra.mxu1 %v1554_v49  ;;  %v1330_v49 = vadd.f32 %v4497_v35, %v4535_v27  ;;  %v1562_v35 = vmul.f32 %v1328_v1, %v594_v52  ;;  %v606_v2 = vadd.f32 %v5665_v22, %v4529_v46  ;;  %v5668_v52 = vld [vmem:[#allocation73_spill] sm:$0xff]  ;;  %v1358_v22 = vadd.f32 %v4589_v51, %v4531_v54 }
 0x253   :  { %2275 = vmatprep.mubr.f32.mxu1 %v1557_v55  ;;  %v5660_v55 = vld [vmem:[#allocation70_spill] sm:$0xff]  ;;  %v612_v1 = vadd.f32 %v5668_v52, %v4529_v46 }
 0x254   :  { %v1563_v21 = vmul.f32 %v1330_v49, %v596_v24  ;;  %v602_v39 = vadd.f32 %v5660_v55, %v4527_v38  ;;  %v1567_v24 = vmul.f32 %v1342_v45, %v608_v5  ;;  %v5667_v49 = vld [vmem:[#allocation74_spill] sm:$0xff]  ;;  %v1360_v5 = vadd.f32 %v4597_v13, %v4535_v27  ;;  %v5672_v45 = vld [vmem:[#allocation77_spill] sm:$0xff] }
 0x255   :  { %v5675_v52 = vld [vmem:[#allocation82_spill] sm:$0xff] }
 0x256   :  { %2276 = vmatmul.mubr.f32.gmra.mxu1 %v1556_v3  ;;  %v5662_v3 = vld [vmem:[#allocation69_spill] sm:$0xff]  ;;  %v1565_v30 = vmul.f32 %v1336_v26, %v602_v39  ;;  %v620_v26 = vadd.f32 %v5669_v58, %v4527_v38 }
 0x257   :  { %2280 = vmatprep.mubr.f32.mxu1 %v1559_v41  ;;  %v600_v16 = vadd.f32 %v5662_v3, %v4529_v46  ;;  %v4895_v41 = vpop.f32.mrf.mxu1  ;;  %v5670_v3 = vld [vmem:[#allocation75_spill] sm:$0xff] }
 0x259   :  { %v4905_v6 = vpop.f32.mrf.mxu1 }
 0x25a   :  { %2281 = vmatmul.mubr.f32.gmra.mxu1 %v1558_v60  ;;  %v1564_v60 = vmul.f32 %v1334_v28, %v600_v16  ;;  %v618_v16 = vadd.f32 %v5670_v3, %v4529_v46 }
 0x25b   :  { %2285 = vmatprep.mubr.f32.mxu1 %v1561_v53  ;;  %v1340_v53 = vadd.f32 %v5666_v31, %v4531_v54  ;;  %v4915_v55 = vpop.f32.mrf.mxu1  ;;  %v5673_v31 = vld [vmem:[#allocation80_spill] sm:$0xff] }
 0x25d   :  { %v1566_v43 = vmul.f32 %v1340_v53, %v606_v2  ;;  %v4925_v28 = vpop.f32.mrf.mxu1  ;;  %v632_v53 = vadd.f32 %v5673_v31, %v4527_v38 }
 0x25e   :  { %2286 = vmatmul.mubr.f32.gmra.mxu1 %v1560_v25  ;;  %v614_v25 = vadd.f32 %v5667_v49, %v4527_v38  ;;  %v5674_v49 = vld [vmem:[#allocation79_spill] sm:$0xff] }
 0x25f   :  { %2290 = vmatprep.mubr.f32.mxu1 %v1563_v21  ;;  %v1346_v21 = vadd.f32 %v4557_v4, %v4531_v54  ;;  %v4935_v2 = vpop.f32.mrf.mxu1 }
 0x260   :  { %v1569_v39 = vmul.f32 %v1348_v50, %v614_v25  ;;  %v630_v25 = vadd.f32 %v5674_v49, %v4529_v46  ;;  %v1364_v50 = vadd.f32 %v4605_v44, %v4531_v54  ;;  %v1390_v49 = vadd.f32 %v4685_v56, %v4535_v27 }
 0x261   :  { %v1568_v63 = vmul.f32 %v1346_v21, %v612_v1  ;;  %v638_v1 = vadd.f32 %v5675_v52, %v4527_v38  ;;  %v1372_v21 = vadd.f32 %v4629_v9, %v4535_v27 }
 0x262   :  { %2291 = vmatmul.mubr.f32.gmra.mxu1 %v1562_v35  ;;  %v1354_v35 = vadd.f32 %v4581_v59, %v4535_v27  ;;  %v1570_v59 = vmul.f32 %v1352_v17, %v618_v16  ;;  %v1378_v16 = vadd.f32 %v4645_v0, %v4535_v27  ;;  %v5678_v17 = vld [vmem:[#allocation83_spill] sm:$0xff] }
 0x263   :  { %2295 = vmatprep.mubr.f32.mxu1 %v1565_v30  ;;  %v5671_v30 = vld [vmem:[#allocation78_spill] sm:$0xff]  ;;  %v1577_v44 = vmul.f32 %v1372_v21, %v638_v1 }
 0x264   :  { %v1571_v4 = vmul.f32 %v1354_v35, %v620_v26  ;;  %v626_v8 = vadd.f32 %v5671_v30, %v4527_v38  ;;  %v1370_v26 = vadd.f32 %v4621_v23, %v4531_v54  ;;  %v1376_v30 = vadd.f32 %v4637_v18, %v4531_v54 }
 0x266   :  { %2296 = vmatmul.mubr.f32.gmra.mxu1 %v1564_v60  ;;  %v624_v60 = vadd.f32 %v5672_v45, %v4529_v46  ;;  %v1573_v47 = vmul.f32 %v1360_v5, %v626_v8  ;;  %v5679_v5 = vld [vmem:[#allocation86_spill] sm:$0xff]  ;;  %v1384_v45 = vadd.f32 %v4661_v42, %v4535_v27 }
 0x267   :  { %2300 = vmatprep.mubr.f32.mxu1 %v1567_v24  ;;  %v1366_v24 = vadd.f32 %v4613_v32, %v4535_v27  ;;  %v1574_v32 = vmul.f32 %v1364_v50, %v630_v25  ;;  %v5683_v25 = vld [vmem:[#allocation87_spill] sm:$0xff] }
 0x268   :  { %v1572_v13 = vmul.f32 %v1358_v22, %v624_v60  ;;  %v5680_v60 = vld [vmem:[#allocation85_spill] sm:$0xff]  ;;  %v654_v50 = vadd.f32 %v5683_v25, %v4529_v46 }
 0x269   :  { %v1575_v51 = vmul.f32 %v1366_v24, %v632_v53  ;;  %v648_v22 = vadd.f32 %v5680_v60, %v4529_v46  ;;  %v5682_v24 = vld [vmem:[#allocation88_spill] sm:$0xff]  ;;  %v5692_v25 = vld [vmem:[#allocation93_spill] sm:$0xff] }
 0x26a   :  { %2301 = vmatmul.mubr.f32.gmra.mxu1 %v1566_v43  ;;  %v4945_v43 = vpop.f32.mrf.mxu1 }
 0x26b   :  { %2305 = vmatprep.mubr.f32.mxu1 %v1569_v39  ;;  %v5676_v39 = vld [vmem:[#allocation81_spill] sm:$0xff] }
 0x26c   :  { %v636_v58 = vadd.f32 %v5676_v39, %v4529_v46  ;;  %v4955_v35 = vpop.f32.mrf.mxu1 }
 0x26e   :  { %2306 = vmatmul.mubr.f32.gmra.mxu1 %v1568_v63  ;;  %v5677_v63 = vld [vmem:[#allocation84_spill] sm:$0xff]  ;;  %v1576_v9 = vmul.f32 %v1370_v26, %v636_v58  ;;  %v4965_v8 = vpop.f32.mrf.mxu1  ;;  %v1396_v58 = vadd.f32 %v4705_v11, %v4535_v27  ;;  %v5686_v26 = vld [vmem:[#allocation89_spill] sm:$0xff] }
 0x26f   :  { %2310 = vmatprep.mubr.f32.mxu1 %v1571_v4  ;;  %v644_v3 = vadd.f32 %v5677_v63, %v4527_v38  ;;  %v642_v4 = vadd.f32 %v5678_v17, %v4529_v46  ;;  %v5687_v63 = vld [vmem:[#allocation5_spill] sm:$0xff] }
 0x270   :  { %v4975_v53 = vpop.f32.mrf.mxu1 }
 0x271   :  { %v1579_v23 = vmul.f32 %v1378_v16, %v644_v3  ;;  %v1578_v0 = vmul.f32 %v1376_v30, %v642_v4  ;;  %v1394_v3 = vadd.f32 %v5687_v63, %v4531_v54  ;;  %v5688_v4 = vld [vmem:[#allocation92_spill] sm:$0xff] }
 0x272   :  { %2311 = vmatmul.mubr.f32.gmra.mxu1 %v1570_v59  ;;  %v650_v59 = vadd.f32 %v5679_v5, %v4527_v38  ;;  %v4985_v1 = vpop.f32.mrf.mxu1  ;;  %v668_v30 = vadd.f32 %v5688_v4, %v4527_v38  ;;  %v5689_v5 = vld [vmem:[#allocation91_spill] sm:$0xff]  ;;  %v5694_v63 = vld [vmem:[#allocation96_spill] sm:$0xff] }
 0x273   :  { %2315 = vmatprep.mubr.f32.mxu1 %v1573_v47  ;;  %v5681_v47 = vld [vmem:[#allocation3_spill] sm:$0xff] }
 0x274   :  { %v1382_v31 = vadd.f32 %v5681_v47, %v4531_v54  ;;  %v1581_v18 = vmul.f32 %v1384_v45, %v650_v59  ;;  %v4995_v16 = vpop.f32.mrf.mxu1  ;;  %v666_v59 = vadd.f32 %v5689_v5, %v4529_v46  ;;  %v5690_v45 = vld [vmem:[#allocation4_spill] sm:$0xff]  ;;  %v1420_v5 = vadd.f32 %v4785_v14, %v4535_v27 }
 0x276   :  { %2316 = vmatmul.mubr.f32.gmra.mxu1 %v1572_v13  ;;  %v656_v13 = vadd.f32 %v5682_v24, %v4527_v38  ;;  %v1580_v42 = vmul.f32 %v1382_v31, %v648_v22  ;;  %v5005_v60 = vpop.f32.mrf.mxu1  ;;  %v5691_v31 = vld [vmem:[#allocation95_spill] sm:$0xff]  ;;  %v1408_v24 = vadd.f32 %v4745_v61, %v4535_v27 }
 0x277   :  { %2320 = vmatprep.mubr.f32.mxu1 %v1575_v51  ;;  %v5684_v51 = vld [vmem:[#allocation2_spill] sm:$0xff] }
 0x278   :  { %v1388_v52 = vadd.f32 %v5684_v51, %v4531_v54  ;;  %v1583_v21 = vmul.f32 %v1390_v49, %v656_v13  ;;  %v5014_v13 = vld [vmem:[%s5452_s8] ss:$0 sm:$0xff]  ;;  %v1406_v51 = vadd.f32 %v4735_v20, %v4531_v54 }
 0x27a   :  { %2321 = vmatmul.mubr.f32.gmra.mxu1 %v1574_v32  ;;  %v5685_v32 = vld [vmem:[#allocation90_spill] sm:$0xff]  ;;  %v1582_v56 = vmul.f32 %v1388_v52, %v654_v50  ;;  %v672_v50 = vadd.f32 %v5692_v25, %v4529_v46 }
 0x27b   :  { %2325 = vmatprep.mubr.f32.mxu1 %v1577_v44  ;;  %v662_v39 = vadd.f32 %v5685_v32, %v4527_v38  ;;  %v660_v44 = vadd.f32 %v5686_v26, %v4529_v46  ;;  %v5693_v32 = vld [vmem:[#allocation98_spill] sm:$0xff] }
 0x27d   :  { %v1585_v17 = vmul.f32 %v1396_v58, %v662_v39  ;;  %v1584_v11 = vmul.f32 %v1394_v3, %v660_v44  ;;  %v680_v39 = vadd.f32 %v5693_v32, %v4527_v38  ;;  %v1414_v58 = vadd.f32 %v4765_v36, %v4535_v27 }
 0x27e   :  { %2326 = vmatmul.mubr.f32.gmra.mxu1 %v1576_v9  ;;  %v2849_v9 = vpop.f32.mrf.mxu0  ;;  %v1588_v44 = vmul.f32 %v1406_v51, %v672_v50  ;;  %v678_v3 = vadd.f32 %v5694_v63, %v4529_v46  ;;  %v5698_v51 = vld [vmem:[#allocation102_spill] sm:$0xff]  ;;  %v5700_v63 = vld [vmem:[#allocation105_spill] sm:$0xff] }
 0x27f   :  { %2330 = vmatprep.mubr.f32.mxu1 %v1579_v23  ;;  %v1402_v23 = vadd.f32 %v4725_v7, %v4535_v27 }
 0x280   :  { %v1722_v22 = vpop.f32.mrf.mxu0 }
 0x281   :  { %v1587_v47 = vmul.f32 %v1402_v23, %v668_v30  ;;  %v1591_v30 = vmul.f32 %v1414_v58, %v680_v39  ;;  %v5695_v23 = vld [vmem:[#allocation101_spill] sm:$0xff]  ;;  %v5699_v58 = vld [vmem:[#allocation107_spill] sm:$0xff] }
 0x282   :  { %2331 = vmatmul.mubr.f32.gmra.mxu1 %v1578_v0  ;;  %v1400_v0 = vadd.f32 %v5690_v45, %v4531_v54 }
 0x283   :  { %2335 = vmatprep.mubr.f32.mxu1 %v1581_v18  ;;  %v674_v18 = vadd.f32 %v5691_v31, %v4527_v38 }
 0x285   :  { %v1589_v61 = vmul.f32 %v1408_v24, %v674_v18  ;;  %v5697_v24 = vld [vmem:[#allocation104_spill] sm:$0xff] }
 0x286   :  { %2336 = vmatmul.mubr.f32.gmra.mxu1 %v1580_v42  ;;  %v1586_v42 = vmul.f32 %v1400_v0, %v666_v59  ;;  %v5696_v0 = vld [vmem:[#allocation99_spill] sm:$0xff] }
 0x287   :  { %2340 = vmatprep.mubr.f32.mxu1 %v1583_v21  ;;  %v2852_v21 = vpop.f32.mrf.mxu0 }
 0x289   :  { %v1732_v36 = vpop.f32.mrf.mxu0 }
 0x28a   :  { %2341 = vmatmul.mubr.f32.gmra.mxu1 %v1582_v56 }
 0x28b   :  { %2345 = vmatprep.mubr.f32.mxu1 %v1585_v17  ;;  %v1412_v17 = vadd.f32 %v4755_v48, %v4531_v54  ;;  %v2855_v14 = vpop.f32.mrf.mxu0 }
 0x28d   :  { %v1590_v48 = vmul.f32 %v1412_v17, %v678_v3  ;;  %v696_v3 = vadd.f32 %v5700_v63, %v4529_v46  ;;  %v1430_v17 = vadd.f32 %v4815_v34, %v4531_v54 }
 0x28e   :  { %v2107_v7 = vpop.f32.mrf.mxu1  ;;  %2346 = vmatmul.mubr.f32.gmra.mxu1 %v1584_v11  ;;  %v686_v11 = vadd.f32 %v5695_v23, %v4527_v38 }
 0x28f   :  { %v2108_v49 = vadd.f32 %v2107_v7, %v1722_v22  ;;  %2350 = vmatprep.mubr.f32.mxu1 %v1587_v47  ;;  %v684_v22 = vadd.f32 %v5696_v0, %v4529_v46  ;;  %v1418_v47 = vadd.f32 %v4775_v29, %v4531_v54  ;;  %v692_v7 = vadd.f32 %v5697_v24, %v4527_v38 }
 0x290   :  { %v2109_v52 = vpop.f32.mrf.mxu1  ;;  %v1593_v18 = vmul.f32 %v1420_v5, %v686_v11  ;;  %v1438_v11 = vadd.f32 %v4845_v33, %v4535_v27  ;;  %v1596_v34 = vmul.f32 %v1430_v17, %v696_v3  ;;  %v1436_v0 = vadd.f32 %v4835_v37, %v4531_v54 }
 0x291   :  { %v2433_v56 = vadd.f32 %v5014_v13, %v2108_v49  ;;  %v1426_v49 = vadd.f32 %v4805_v10, %v4535_v27  ;;  %v1592_v29 = vmul.f32 %v1418_v47, %v684_v22  ;;  %v690_v52 = vadd.f32 %v5698_v51, %v4529_v46  ;;  %v1742_v10 = vpop.f32.mrf.mxu0 }
 0x292   :  { %v2112_v26 = vpop.f32.mrf.mxu1  ;;  %2351 = vmatmul.mubr.f32.gmra.mxu1 %v1586_v42  ;;  %v1444_v24 = vadd.f32 %v4865_v12, %v4535_v27  ;;  %v1456_v3 = vadd.f32 %v4905_v6, %v4535_v27 }
 0x293   :  { %2498 = vst.msk [vmem:[%s5453_s9] sm:$0xff] %vm2497_vm2, %v2433_v56  ;;  %v2113_v20 = vadd.f32 %v2849_v9, %v2112_v26  ;;  %2355 = vmatprep.mubr.f32.mxu1 %v1589_v61  ;;  %v1424_v61 = vadd.f32 %v4795_v57, %v4531_v54  ;;  %v1595_v39 = vmul.f32 %v1426_v49, %v692_v7 }
 0x294   :  { %v2114_v4 = vpop.f32.mrf.mxu1  ;;  %v698_v56 = vadd.f32 %v5699_v58, %v4527_v38  ;;  %v1432_v26 = vadd.f32 %v4825_v40, %v4535_v27  ;;  %v2858_v40 = vpop.f32.mrf.mxu0 }
 0x295   :  { %v2434_v59 = vadd.f32 %v5014_v13, %v2113_v20  ;;  %v1594_v57 = vmul.f32 %v1424_v61, %v690_v52  ;;  %v5705_v52 = vld [vmem:[#allocation113_spill] sm:$0xff] }
 0x296   :  { %v2117_v9 = vpop.f32.mrf.mxu1  ;;  %2356 = vmatmul.mubr.f32.gmra.mxu1 %v1588_v44  ;;  %v1752_v33 = vpop.f32.mrf.mxu0  ;;  %v716_v61 = vadd.f32 %v5705_v52, %v4527_v38  ;;  %v5713_v52 = vld [vmem:[#allocation121_spill] sm:$0xff] }
 0x297   :  { %2499 = vst.msk [vmem:[%s5453_s9 + $0x8] sm:$0xff] %vm2497_vm2, %v2434_v59  ;;  %v2118_v45 = vadd.f32 %v2117_v9, %v1732_v36  ;;  %2360 = vmatprep.mubr.f32.mxu1 %v1591_v30  ;;  %v1597_v36 = vmul.f32 %v1432_v26, %v698_v56  ;;  %v5701_v30 = vld [vmem:[#allocation109_spill] sm:$0xff]  ;;  %v5706_v56 = vld [vmem:[#allocation112_spill] sm:$0xff] }
 0x298   :  { %v2119_v31 = vpop.f32.mrf.mxu1  ;;  %v704_v23 = vadd.f32 %v5701_v30, %v4527_v38  ;;  %v2861_v12 = vpop.f32.mrf.mxu0  ;;  %v714_v26 = vadd.f32 %v5706_v56, %v4529_v46 }
 0x299   :  { %v2435_v42 = vadd.f32 %v5014_v13, %v2118_v45  ;;  %v5702_v45 = vld [vmem:[#allocation108_spill] sm:$0xff]  ;;  %v5703_v31 = vld [vmem:[#allocation111_spill] sm:$0xff] }
 0x29a   :  { %v2122_v25 = vpop.f32.mrf.mxu1  ;;  %2361 = vmatmul.mubr.f32.gmra.mxu1 %v1590_v48  ;;  %v702_v48 = vadd.f32 %v5702_v45, %v4529_v46  ;;  %v1599_v47 = vmul.f32 %v1438_v11, %v704_v23  ;;  %v1454_v23 = vadd.f32 %v4895_v41, %v4531_v54 }
 0x29b   :  { %2500 = vst.msk [vmem:[%s5453_s9 + $0x10] sm:$0xff] %vm2497_vm2, %v2435_v42  ;;  %v2123_v50 = vadd.f32 %v2852_v21, %v2122_v25  ;;  %2365 = vmatprep.mubr.f32.mxu1 %v1593_v18  ;;  %v710_v18 = vadd.f32 %v5703_v31, %v4527_v38  ;;  %v5704_v42 = vld [vmem:[#allocation110_spill] sm:$0xff] }
 0x29c   :  { %v2124_v32 = vpop.f32.mrf.mxu1  ;;  %v1598_v37 = vmul.f32 %v1436_v0, %v702_v48  ;;  %v708_v25 = vadd.f32 %v5704_v42, %v4529_v46 }
 0x29d   :  { %v2436_v20 = vadd.f32 %v5014_v13, %v2123_v50  ;;  %v1442_v50 = vadd.f32 %v4855_v19, %v4531_v54  ;;  %v1601_v51 = vmul.f32 %v1444_v24, %v710_v18  ;;  %v1450_v32 = vadd.f32 %v4885_v62, %v4535_v27  ;;  %v1762_v62 = vpop.f32.mrf.mxu0  ;;  %v5711_v24 = vld [vmem:[#allocation119_spill] sm:$0xff] }
 0x29e   :  { %v2127_v21 = vpop.f32.mrf.mxu1  ;;  %2366 = vmatmul.mubr.f32.gmra.mxu1 %v1592_v29 }
 0x29f   :  { %2501 = vst.msk [vmem:[%s5453_s9 + $0x18] sm:$0xff] %vm2497_vm2, %v2436_v20  ;;  %v2128_v44 = vadd.f32 %v2127_v21, %v1742_v10  ;;  %2370 = vmatprep.mubr.f32.mxu1 %v1595_v39  ;;  %v1600_v19 = vmul.f32 %v1442_v50, %v708_v25  ;;  %v1448_v20 = vadd.f32 %v4875_v15, %v4531_v54  ;;  %v2864_v6 = vpop.f32.mrf.mxu0  ;;  %v5712_v25 = vld [vmem:[#allocation118_spill] sm:$0xff] }
 0x2a0   :  { %v2129_v4 = vpop.f32.mrf.mxu1  ;;  %v732_v50 = vadd.f32 %v5712_v25, %v4529_v46 }
 0x2a1   :  { %v2437_v5 = vadd.f32 %v5014_v13, %v2128_v44  ;;  %v1603_v44 = vmul.f32 %v1450_v32, %v716_v61  ;;  %v1602_v15 = vmul.f32 %v1448_v20, %v714_v26  ;;  %v740_v61 = vadd.f32 %v5713_v52, %v4527_v38 }
 0x2a2   :  { %v2132_v59 = vpop.f32.mrf.mxu1  ;;  %2371 = vmatmul.mubr.f32.gmra.mxu1 %v1594_v57  ;;  %v5707_v57 = vld [vmem:[#allocation115_spill] sm:$0xff]  ;;  %v1474_v32 = vadd.f32 %v4965_v8, %v4535_v27  ;;  %v1472_v26 = vadd.f32 %v4955_v35, %v4531_v54 }
 0x2a3   :  { %2502 = vst.msk [vmem:[%s5453_s9 + $0x20] sm:$0xff] %vm2497_vm2, %v2437_v5  ;;  %v2133_v9 = vadd.f32 %v2855_v14, %v2132_v59  ;;  %2375 = vmatprep.mubr.f32.mxu1 %v1597_v36  ;;  %v722_v63 = vadd.f32 %v5707_v57, %v4527_v38  ;;  %v5708_v36 = vld [vmem:[#allocation114_spill] sm:$0xff]  ;;  %v5709_v59 = vld [vmem:[#allocation117_spill] sm:$0xff]  ;;  %v1480_v57 = vadd.f32 %v4985_v1, %v4535_v27 }
 0x2a4   :  { %v2134_v22 = vpop.f32.mrf.mxu1  ;;  %v720_v30 = vadd.f32 %v5708_v36, %v4529_v46 }
 0x2a5   :  { %v2438_v7 = vadd.f32 %v5014_v13, %v2133_v9  ;;  %v1605_v5 = vmul.f32 %v1456_v3, %v722_v63  ;;  %v728_v9 = vadd.f32 %v5709_v59, %v4527_v38  ;;  %v5710_v22 = vld [vmem:[#allocation116_spill] sm:$0xff] }
 0x2a6   :  { %v2137_v14 = vpop.f32.mrf.mxu1  ;;  %2376 = vmatmul.mubr.f32.gmra.mxu1 %v1596_v34  ;;  %v1462_v34 = vadd.f32 %v4925_v28, %v4535_v27  ;;  %v1604_v41 = vmul.f32 %v1454_v23, %v720_v30  ;;  %v1772_v28 = vpop.f32.mrf.mxu0  ;;  %v5717_v23 = vld [vmem:[#allocation127_spill] sm:$0xff] }
 0x2a7   :  { %2503 = vst.msk [vmem:[%s5453_s9 + $0x28] sm:$0xff] %vm2497_vm2, %v2438_v7  ;;  %v2138_v49 = vadd.f32 %v2137_v14, %v1752_v33  ;;  %2380 = vmatprep.mubr.f32.mxu1 %v1599_v47  ;;  %v726_v33 = vadd.f32 %v5710_v22, %v4529_v46  ;;  %v1460_v47 = vadd.f32 %v4915_v55, %v4531_v54 }
 0x2a8   :  { %v2139_v29 = vpop.f32.mrf.mxu1  ;;  %v1607_v18 = vmul.f32 %v1462_v34, %v728_v9  ;;  %v734_v7 = vadd.f32 %v5711_v24, %v4527_v38  ;;  %v1468_v14 = vadd.f32 %v4945_v43, %v4535_v27  ;;  %v2867_v43 = vpop.f32.mrf.mxu0  ;;  %v5718_v34 = vld [vmem:[#allocation125_spill] sm:$0xff] }
 0x2a9   :  { %v2439_v10 = vadd.f32 %v5014_v13, %v2138_v49  ;;  %v1606_v55 = vmul.f32 %v1460_v47, %v726_v33  ;;  %v1466_v29 = vadd.f32 %v4935_v2, %v4531_v54 }
 0x2aa   :  { %v2142_v39 = vpop.f32.mrf.mxu1  ;;  %2381 = vmatmul.mubr.f32.gmra.mxu1 %v1598_v37  ;;  %v1782_v8 = vpop.f32.mrf.mxu0 }
 0x2ab   :  { %2504 = vst.msk [vmem:[%s5453_s9 + $0x30] sm:$0xff] %vm2497_vm2, %v2439_v10  ;;  %v2143_v58 = vadd.f32 %v2858_v40, %v2142_v39  ;;  %2385 = vmatprep.mubr.f32.mxu1 %v1601_v51  ;;  %v1609_v51 = vmul.f32 %v1468_v14, %v734_v7  ;;  %v1608_v2 = vmul.f32 %v1466_v29, %v732_v50 }
 0x2ac   :  { %v2144_v21 = vpop.f32.mrf.mxu1  ;;  %v2870_v1 = vpop.f32.mrf.mxu0 }
 0x2ad   :  { %v2440_v17 = vadd.f32 %v5014_v13, %v2143_v58  ;;  %v1611_v21 = vmul.f32 %v1474_v32, %v740_v61 }
 0x2ae   :  { %v2147_v4 = vpop.f32.mrf.mxu1  ;;  %2386 = vmatmul.mubr.f32.gmra.mxu1 %v1600_v19  ;;  %v5714_v19 = vld [vmem:[#allocation120_spill] sm:$0xff] }
 0x2af   :  { %2505 = vst.msk [vmem:[%s5453_s9 + $0x38] sm:$0xff] %vm2497_vm2, %v2440_v17  ;;  %v2148_v40 = vadd.f32 %v2147_v4, %v1762_v62  ;;  %2390 = vmatprep.mubr.f32.mxu1 %v1603_v44  ;;  %v738_v56 = vadd.f32 %v5714_v19, %v4529_v46  ;;  %v5715_v62 = vld [vmem:[#allocation124_spill] sm:$0xff]  ;;  %v5716_v4 = vld [vmem:[#allocation122_spill] sm:$0xff] }
 0x2b0   :  { %v2149_v11 = vpop.f32.mrf.mxu1  ;;  %v746_v44 = vadd.f32 %v5715_v62, %v4527_v38 }
 0x2b1   :  { %v2441_v45 = vadd.f32 %v5014_v13, %v2148_v40  ;;  %v1610_v35 = vmul.f32 %v1472_v26, %v738_v56  ;;  %v744_v40 = vadd.f32 %v5716_v4, %v4529_v46  ;;  %v752_v11 = vadd.f32 %v5717_v23, %v4527_v38 }
 0x2b2   :  { %v2152_v48 = vpop.f32.mrf.mxu1  ;;  %2391 = vmatmul.mubr.f32.gmra.mxu1 %v1602_v15  ;;  %v1478_v15 = vadd.f32 %v4975_v53, %v4531_v54  ;;  %v1613_v30 = vmul.f32 %v1480_v57, %v746_v44  ;;  %v1484_v38 = vadd.f32 %v4995_v16, %v4531_v54 }
 0x2b3   :  { %2506 = vst.msk [vmem:[%s5453_s9 + $0x40] sm:$0xff] %vm2497_vm2, %v2441_v45  ;;  %v2153_v0 = vadd.f32 %v2861_v12, %v2152_v48  ;;  %2395 = vmatprep.mubr.f32.mxu1 %v1605_v5  ;;  %v750_v45 = vadd.f32 %v5718_v34, %v4529_v46 }
 0x2b4   :  { %v2154_v31 = vpop.f32.mrf.mxu1  ;;  %v1612_v53 = vmul.f32 %v1478_v15, %v744_v40 }
 0x2b5   :  { %v2442_v49 = vadd.f32 %v5014_v13, %v2153_v0  ;;  %v1614_v33 = vmul.f32 %v1484_v38, %v750_v45 }
 0x2b6   :  { %v2157_v37 = vpop.f32.mrf.mxu1  ;;  %2396 = vmatmul.mubr.f32.gmra.mxu1 %v1604_v41 }
 0x2b7   :  { %2507 = vst.msk [vmem:[%s5453_s9 + $0x48] sm:$0xff] %vm2497_vm2, %v2442_v49  ;;  %v2158_v42 = vadd.f32 %v2157_v37, %v1772_v28  ;;  %2400 = vmatprep.mubr.f32.mxu1 %v1607_v18 }
 0x2b8   :  { %v2159_v12 = vpop.f32.mrf.mxu1 }
 0x2b9   :  { %v2443_v10 = vadd.f32 %v5014_v13, %v2158_v42 }
 0x2ba   :  { %v2162_v39 = vpop.f32.mrf.mxu1  ;;  %2401 = vmatmul.mubr.f32.gmra.mxu1 %v1606_v55 }
 0x2bb   :  { %2508 = vst.msk [vmem:[%s5453_s9 + $0x50] sm:$0xff] %vm2497_vm2, %v2443_v10  ;;  %v2163_v58 = vadd.f32 %v2864_v6, %v2162_v39  ;;  %2405 = vmatprep.mubr.f32.mxu1 %v1609_v51  ;;  %v1486_v6 = vadd.f32 %v5005_v60, %v4535_v27  ;;  %v1792_v27 = vpop.f32.mrf.mxu0 }
 0x2bc   :  { %v2164_v20 = vpop.f32.mrf.mxu1 }
 0x2bd   :  { %v2444_v63 = vadd.f32 %v5014_v13, %v2163_v58  ;;  %v1615_v60 = vmul.f32 %v1486_v6, %v752_v11  ;;  %v2873_v46 = vpop.f32.mrf.mxu0 }
 0x2be   :  { %v2167_v3 = vpop.f32.mrf.mxu1  ;;  %2406 = vmatmul.mubr.f32.gmra.mxu1 %v1608_v2 }
 0x2bf   :  { %2509 = vst.msk [vmem:[%s5453_s9 + $0x58] sm:$0xff] %vm2497_vm2, %v2444_v63  ;;  %v2168_v17 = vadd.f32 %v2167_v3, %v1782_v8  ;;  %2410 = vmatprep.mubr.f32.mxu1 %v1611_v21  ;;  %v1802_v18 = vpop.f32.mrf.mxu0 }
 0x2c0   :  { %v2169_v36 = vpop.f32.mrf.mxu1 }
 0x2c1   :  { %v2445_v5 = vadd.f32 %v5014_v13, %v2168_v17  ;;  %v2876_v37 = vpop.f32.mrf.mxu0 }
 0x2c2   :  { %v2172_v59 = vpop.f32.mrf.mxu1  ;;  %2411 = vmatmul.mubr.f32.gmra.mxu1 %v1610_v35 }
 0x2c3   :  { %2510 = vst.msk [vmem:[%s5453_s9 + $0x60] sm:$0xff] %vm2497_vm2, %v2445_v5  ;;  %v2173_v9 = vadd.f32 %v2867_v43, %v2172_v59  ;;  %2415 = vmatprep.mubr.f32.mxu1 %v1613_v30  ;;  %v1812_v29 = vpop.f32.mrf.mxu0 }
 0x2c4   :  { %v2174_v48 = vpop.f32.mrf.mxu1 }
 0x2c5   :  { %v2446_v0 = vadd.f32 %v5014_v13, %v2173_v9  ;;  %v2879_v61 = vpop.f32.mrf.mxu0 }
 0x2c6   :  { %v2177_v41 = vpop.f32.mrf.mxu1  ;;  %2416 = vmatmul.mubr.f32.gmra.mxu1 %v1612_v53 }
 0x2c7   :  { %2511 = vst.msk [vmem:[%s5453_s9 + $0x68] sm:$0xff] %vm2497_vm2, %v2446_v0  ;;  %v2178_v22 = vadd.f32 %v2177_v41, %v1792_v27  ;;  %2420 = vmatprep.mubr.f32.mxu1 %v1615_v60  ;;  %v1822_v2 = vpop.f32.mrf.mxu0 }
 0x2c8   :  { %v2179_v47 = vpop.f32.mrf.mxu1 }
 0x2c9   :  { %v2447_v31 = vadd.f32 %v5014_v13, %v2178_v22  ;;  %v2882_v8 = vpop.f32.mrf.mxu0 }
 0x2ca   :  { %v2182_v54 = vpop.f32.mrf.mxu1  ;;  %2421 = vmatmul.mubr.f32.gmra.mxu1 %v1614_v33 }
 0x2cb   :  { %2512 = vst.msk [vmem:[%s5453_s9 + $0x70] sm:$0xff] %vm2497_vm2, %v2447_v31  ;;  %v2183_v16 = vadd.f32 %v2870_v1, %v2182_v54  ;;  %v1832_v63 = vpop.f32.mrf.mxu0 }
 0x2cc   :  { %v2184_v28 = vpop.f32.mrf.mxu1 }
 0x2cd   :  { %v2448_v24 = vadd.f32 %v5014_v13, %v2183_v16  ;;  %v2885_v40 = vpop.f32.mrf.mxu0 }
 0x2ce   :  { %v2187_v7 = vpop.f32.mrf.mxu1 }
 0x2cf   :  { %2513 = vst.msk [vmem:[%s5453_s9 + $0x78] sm:$0xff] %vm2497_vm2, %v2448_v24  ;;  %v2188_v14 = vadd.f32 %v2187_v7, %v1802_v18  ;;  %v1842_v23 = vpop.f32.mrf.mxu0 }
 0x2d0   :  { %v2189_v49 = vpop.f32.mrf.mxu1 }
 0x2d1   :  { %v2449_v42 = vadd.f32 %v5014_v13, %v2188_v14  ;;  %v2888_v9 = vpop.f32.mrf.mxu0 }
 0x2d2   :  { %v2192_v55 = vpop.f32.mrf.mxu1 }
 0x2d3   :  { %2514 = vst.msk [vmem:[%s5453_s9 + $0x80] sm:$0xff] %vm2497_vm2, %v2449_v42  ;;  %v2193_v25 = vadd.f32 %v2873_v46, %v2192_v55  ;;  %v1852_v48 = vpop.f32.mrf.mxu0 }
 0x2d4   :  { %v2194_v50 = vpop.f32.mrf.mxu1 }
 0x2d5   :  { %v2450_v12 = vadd.f32 %v5014_v13, %v2193_v25  ;;  %v2891_v22 = vpop.f32.mrf.mxu0 }
 0x2d6   :  { %v2197_v43 = vpop.f32.mrf.mxu1 }
 0x2d7   :  { %2515 = vst.msk [vmem:[%s5453_s9 + $0x88] sm:$0xff] %vm2497_vm2, %v2450_v12  ;;  %v2198_v51 = vadd.f32 %v2197_v43, %v1812_v29  ;;  %v1862_v54 = vpop.f32.mrf.mxu0 }
 0x2d8   :  { %v2199_v52 = vpop.f32.mrf.mxu1 }
 0x2d9   :  { %v2451_v32 = vadd.f32 %v5014_v13, %v2198_v51  ;;  %v2894_v7 = vpop.f32.mrf.mxu0 }
 0x2da   :  { %v2202_v10 = vpop.f32.mrf.mxu1 }
 0x2db   :  { %2516 = vst.msk [vmem:[%s5453_s9 + $0x90] sm:$0xff] %vm2497_vm2, %v2451_v32  ;;  %v2203_v39 = vadd.f32 %v2876_v37, %v2202_v10  ;;  %v1872_v55 = vpop.f32.mrf.mxu0 }
 0x2dc   :  { %v2204_v58 = vpop.f32.mrf.mxu1 }
 0x2dd   :  { %v2452_v19 = vadd.f32 %v5014_v13, %v2203_v39  ;;  %v2897_v43 = vpop.f32.mrf.mxu0 }
 0x2de   :  { %v2207_v56 = vpop.f32.mrf.mxu1 }
 0x2df   :  { %2517 = vst.msk [vmem:[%s5453_s9 + $0x98] sm:$0xff] %vm2497_vm2, %v2452_v19  ;;  %v2208_v26 = vadd.f32 %v2207_v56, %v1822_v2  ;;  %v1882_v10 = vpop.f32.mrf.mxu0 }
 0x2e0   :  { %v2209_v20 = vpop.f32.mrf.mxu1 }
 0x2e1   :  { %v2453_v21 = vadd.f32 %v5014_v13, %v2208_v26  ;;  %v2900_v56 = vpop.f32.mrf.mxu0 }
 0x2e2   :  { %v2212_v62 = vpop.f32.mrf.mxu1 }
 0x2e3   :  { %2518 = vst.msk [vmem:[%s5453_s9 + $0xa0] sm:$0xff] %vm2497_vm2, %v2453_v21  ;;  %v2213_v44 = vadd.f32 %v2879_v61, %v2212_v62  ;;  %v1892_v62 = vpop.f32.mrf.mxu0 }
 0x2e4   :  { %v2214_v57 = vpop.f32.mrf.mxu1 }
 0x2e5   :  { %v2454_v3 = vadd.f32 %v5014_v13, %v2213_v44 }
 0x2e6   :  { %v2217_v17 = vpop.f32.mrf.mxu1 }
 0x2e7   :  { %2519 = vst.msk [vmem:[%s5453_s9 + $0xa8] sm:$0xff] %vm2497_vm2, %v2454_v3  ;;  %v2218_v35 = vadd.f32 %v2217_v17, %v1832_v63  ;;  %v2903_v17 = vpop.f32.mrf.mxu0 }
 0x2e8   :  { %v2219_v4 = vpop.f32.mrf.mxu1 }
 0x2e9   :  { %v2455_v15 = vadd.f32 %v5014_v13, %v2218_v35 }
 0x2ea   :  { %v2222_v36 = vpop.f32.mrf.mxu1 }
 0x2eb   :  { %2520 = vst.msk [vmem:[%s5453_s9 + $0xb0] sm:$0xff] %vm2497_vm2, %v2455_v15  ;;  %v2223_v1 = vadd.f32 %v2882_v8, %v2222_v36  ;;  %v1902_v36 = vpop.f32.mrf.mxu0 }
 0x2ec   :  { %v2224_v30 = vpop.f32.mrf.mxu1 }
 0x2ed   :  { %v2456_v11 = vadd.f32 %v5014_v13, %v2223_v1 }
 0x2ee   :  { %v2227_v6 = vpop.f32.mrf.mxu1 }
 0x2ef   :  { %2521 = vst.msk [vmem:[%s5453_s9 + $0xb8] sm:$0xff] %vm2497_vm2, %v2456_v11  ;;  %v2228_v5 = vadd.f32 %v2227_v6, %v1842_v23  ;;  %v2906_v6 = vpop.f32.mrf.mxu0 }
 0x2f0   :  { %v2229_v59 = vpop.f32.mrf.mxu1 }
 0x2f1   :  { %v2457_v53 = vadd.f32 %v5014_v13, %v2228_v5 }
 0x2f2   :  { %v2232_v34 = vpop.f32.mrf.mxu1 }
 0x2f3   :  { %2522 = vst.msk [vmem:[%s5453_s9 + $0xc0] sm:$0xff] %vm2497_vm2, %v2457_v53  ;;  %v2233_v45 = vadd.f32 %v2885_v40, %v2232_v34  ;;  %v1912_v34 = vpop.f32.mrf.mxu0 }
 0x2f4   :  { %v2234_v38 = vpop.f32.mrf.mxu1 }
 0x2f5   :  { %v2458_v27 = vadd.f32 %v5014_v13, %v2233_v45 }
 0x2f6   :  { %v2237_v60 = vpop.f32.mrf.mxu1 }
 0x2f7   :  { %2523 = vst.msk [vmem:[%s5453_s9 + $0xc8] sm:$0xff] %vm2497_vm2, %v2458_v27  ;;  %v2238_v0 = vadd.f32 %v2237_v60, %v1852_v48  ;;  %v2909_v60 = vpop.f32.mrf.mxu0 }
 0x2f8   :  { %v2239_v41 = vpop.f32.mrf.mxu1 }
 0x2f9   :  { %v2459_v33 = vadd.f32 %v5014_v13, %v2238_v0 }
 0x2fa   :  { %v2242_v47 = vpop.f32.mrf.mxu1 }
 0x2fb   :  { %2524 = vst.msk [vmem:[%s5453_s9 + $0xd0] sm:$0xff] %vm2497_vm2, %v2459_v33  ;;  %v2243_v46 = vadd.f32 %v2888_v9, %v2242_v47  ;;  %v1922_v47 = vpop.f32.mrf.mxu0 }
 0x2fc   :  { %v2244_v31 = vpop.f32.mrf.mxu1 }
 0x2fd   :  { %v2460_v16 = vadd.f32 %v5014_v13, %v2243_v46 }
 0x2fe   :  { %v2247_v28 = vpop.f32.mrf.mxu1 }
 0x2ff   :  { %2525 = vst.msk [vmem:[%s5453_s9 + $0xd8] sm:$0xff] %vm2497_vm2, %v2460_v16  ;;  %v2248_v18 = vadd.f32 %v2247_v28, %v1862_v54  ;;  %v2912_v28 = vpop.f32.mrf.mxu0 }
 0x300   :  { %v2249_v24 = vpop.f32.mrf.mxu1 }
 0x301   :  { %v2461_v14 = vadd.f32 %v5014_v13, %v2248_v18 }
 0x302   :  { %v2252_v49 = vpop.f32.mrf.mxu1 }
 0x303   :  { %2526 = vst.msk [vmem:[%s5453_s9 + $0xe0] sm:$0xff] %vm2497_vm2, %v2461_v14  ;;  %v2253_v37 = vadd.f32 %v2891_v22, %v2252_v49  ;;  %v1932_v49 = vpop.f32.mrf.mxu0 }
 0x304   :  { %v2254_v42 = vpop.f32.mrf.mxu1 }
 0x305   :  { %v2462_v25 = vadd.f32 %v5014_v13, %v2253_v37 }
 0x306   :  { %v2257_v50 = vpop.f32.mrf.mxu1 }
 0x307   :  { %2527 = vst.msk [vmem:[%s5453_s9 + $0xe8] sm:$0xff] %vm2497_vm2, %v2462_v25  ;;  %v2258_v29 = vadd.f32 %v2257_v50, %v1872_v55  ;;  %v2915_v50 = vpop.f32.mrf.mxu0 }
 0x308   :  { %v2259_v12 = vpop.f32.mrf.mxu1 }
 0x309   :  { %v2463_v51 = vadd.f32 %v5014_v13, %v2258_v29 }
 0x30a   :  { %v2262_v52 = vpop.f32.mrf.mxu1 }
 0x30b   :  { %2528 = vst.msk [vmem:[%s5453_s9 + $0xf0] sm:$0xff] %vm2497_vm2, %v2463_v51  ;;  %v2263_v61 = vadd.f32 %v2894_v7, %v2262_v52  ;;  %v1942_v52 = vpop.f32.mrf.mxu0 }
 0x30c   :  { %v2264_v32 = vpop.f32.mrf.mxu1 }
 0x30d   :  { %v2464_v39 = vadd.f32 %v5014_v13, %v2263_v61 }
 0x30e   :  { %v2267_v58 = vpop.f32.mrf.mxu1 }
 0x30f   :  { %2529 = vst.msk [vmem:[%s5453_s9 + $0xf8] sm:$0xff] %vm2497_vm2, %v2464_v39  ;;  %v2268_v2 = vadd.f32 %v2267_v58, %v1882_v10  ;;  %v2918_v58 = vpop.f32.mrf.mxu0 }
 0x310   :  { %v2269_v19 = vpop.f32.mrf.mxu1 }
 0x311   :  { %v2465_v26 = vadd.f32 %v5014_v13, %v2268_v2 }
 0x312   :  { %v2272_v20 = vpop.f32.mrf.mxu1 }
 0x313   :  { %2530 = vst.msk [vmem:[%s5453_s9 + $0x100] sm:$0xff] %vm2497_vm2, %v2465_v26  ;;  %v2273_v8 = vadd.f32 %v2897_v43, %v2272_v20  ;;  %v1952_v20 = vpop.f32.mrf.mxu0 }
 0x314   :  { %v2274_v21 = vpop.f32.mrf.mxu1 }
 0x315   :  { %v2466_v44 = vadd.f32 %v5014_v13, %v2273_v8 }
 0x316   :  { %v2277_v57 = vpop.f32.mrf.mxu1 }
 0x317   :  { %2531 = vst.msk [vmem:[%s5453_s9 + $0x108] sm:$0xff] %vm2497_vm2, %v2466_v44  ;;  %v2278_v63 = vadd.f32 %v2277_v57, %v1892_v62  ;;  %v2921_v57 = vpop.f32.mrf.mxu0 }
 0x318   :  { %v2279_v3 = vpop.f32.mrf.mxu1 }
 0x319   :  { %v2467_v35 = vadd.f32 %v5014_v13, %v2278_v63 }
 0x31a   :  { %v2282_v4 = vpop.f32.mrf.mxu1 }
 0x31b   :  { %2532 = vst.msk [vmem:[%s5453_s9 + $0x110] sm:$0xff] %vm2497_vm2, %v2467_v35  ;;  %v2283_v40 = vadd.f32 %v2900_v56, %v2282_v4  ;;  %v1962_v4 = vpop.f32.mrf.mxu0 }
 0x31c   :  { %v2284_v15 = vpop.f32.mrf.mxu1 }
 0x31d   :  { %v2468_v1 = vadd.f32 %v5014_v13, %v2283_v40 }
 0x31e   :  { %v2287_v30 = vpop.f32.mrf.mxu1 }
 0x31f   :  { %2533 = vst.msk [vmem:[%s5453_s9 + $0x118] sm:$0xff] %vm2497_vm2, %v2468_v1  ;;  %v2288_v23 = vadd.f32 %v2287_v30, %v1902_v36  ;;  %v2924_v30 = vpop.f32.mrf.mxu0 }
 0x320   :  { %v2289_v11 = vpop.f32.mrf.mxu1 }
 0x321   :  { %v2469_v5 = vadd.f32 %v5014_v13, %v2288_v23 }
 0x322   :  { %v2292_v59 = vpop.f32.mrf.mxu1 }
 0x323   :  { %2534 = vst.msk [vmem:[%s5453_s9 + $0x120] sm:$0xff] %vm2497_vm2, %v2469_v5  ;;  %v2293_v9 = vadd.f32 %v2903_v17, %v2292_v59  ;;  %v1972_v59 = vpop.f32.mrf.mxu0 }
 0x324   :  { %v2294_v53 = vpop.f32.mrf.mxu1 }
 0x325   :  { %v2470_v45 = vadd.f32 %v5014_v13, %v2293_v9 }
 0x326   :  { %v2297_v38 = vpop.f32.mrf.mxu1 }
 0x327   :  { %2535 = vst.msk [vmem:[%s5453_s9 + $0x128] sm:$0xff] %vm2497_vm2, %v2470_v45  ;;  %v2298_v48 = vadd.f32 %v2297_v38, %v1912_v34  ;;  %v2927_v38 = vpop.f32.mrf.mxu0 }
 0x328   :  { %v2299_v27 = vpop.f32.mrf.mxu1 }
 0x329   :  { %v2471_v0 = vadd.f32 %v5014_v13, %v2298_v48 }
 0x32a   :  { %v2302_v41 = vpop.f32.mrf.mxu1 }
 0x32b   :  { %2536 = vst.msk [vmem:[%s5453_s9 + $0x130] sm:$0xff] %vm2497_vm2, %v2471_v0  ;;  %v2303_v22 = vadd.f32 %v2906_v6, %v2302_v41  ;;  %v1982_v41 = vpop.f32.mrf.mxu0 }
 0x32c   :  { %v2304_v33 = vpop.f32.mrf.mxu1 }
 0x32d   :  { %v2472_v46 = vadd.f32 %v5014_v13, %v2303_v22 }
 0x32e   :  { %v2307_v31 = vpop.f32.mrf.mxu1 }
 0x32f   :  { %2537 = vst.msk [vmem:[%s5453_s9 + $0x138] sm:$0xff] %vm2497_vm2, %v2472_v46  ;;  %v2308_v54 = vadd.f32 %v2307_v31, %v1922_v47  ;;  %v2930_v31 = vpop.f32.mrf.mxu0 }
 0x330   :  { %v2309_v16 = vpop.f32.mrf.mxu1 }
 0x331   :  { %v2473_v18 = vadd.f32 %v5014_v13, %v2308_v54 }
 0x332   :  { %v2312_v24 = vpop.f32.mrf.mxu1 }
 0x333   :  { %2538 = vst.msk [vmem:[%s5453_s9 + $0x140] sm:$0xff] %vm2497_vm2, %v2473_v18  ;;  %v2313_v7 = vadd.f32 %v2909_v60, %v2312_v24  ;;  %v1992_v24 = vpop.f32.mrf.mxu0 }
 0x334   :  { %v2314_v14 = vpop.f32.mrf.mxu1 }
 0x335   :  { %v2474_v37 = vadd.f32 %v5014_v13, %v2313_v7 }
 0x336   :  { %v2317_v42 = vpop.f32.mrf.mxu1 }
 0x337   :  { %2539 = vst.msk [vmem:[%s5453_s9 + $0x148] sm:$0xff] %vm2497_vm2, %v2474_v37  ;;  %v2318_v55 = vadd.f32 %v2317_v42, %v1932_v49  ;;  %v2933_v42 = vpop.f32.mrf.mxu0 }
 0x338   :  { %v2319_v25 = vpop.f32.mrf.mxu1 }
 0x339   :  { %v2475_v29 = vadd.f32 %v5014_v13, %v2318_v55 }
 0x33a   :  { %v2322_v12 = vpop.f32.mrf.mxu1 }
 0x33b   :  { %2540 = vst.msk [vmem:[%s5453_s9 + $0x150] sm:$0xff] %vm2497_vm2, %v2475_v29  ;;  %v2323_v43 = vadd.f32 %v2912_v28, %v2322_v12  ;;  %v2002_v12 = vpop.f32.mrf.mxu0 }
 0x33c   :  { %v2324_v51 = vpop.f32.mrf.mxu1 }
 0x33d   :  { %v2476_v61 = vadd.f32 %v5014_v13, %v2323_v43 }
 0x33e   :  { %v2327_v32 = vpop.f32.mrf.mxu1 }
 0x33f   :  { %2541 = vst.msk [vmem:[%s5453_s9 + $0x158] sm:$0xff] %vm2497_vm2, %v2476_v61  ;;  %v2328_v10 = vadd.f32 %v2327_v32, %v1942_v52  ;;  %v2936_v32 = vpop.f32.mrf.mxu0 }
 0x340   :  { %v2329_v39 = vpop.f32.mrf.mxu1 }
 0x341   :  { %v2477_v2 = vadd.f32 %v5014_v13, %v2328_v10 }
 0x342   :  { %v2332_v19 = vpop.f32.mrf.mxu1 }
 0x343   :  { %2542 = vst.msk [vmem:[%s5453_s9 + $0x160] sm:$0xff] %vm2497_vm2, %v2477_v2  ;;  %v2333_v56 = vadd.f32 %v2915_v50, %v2332_v19  ;;  %v2012_v19 = vpop.f32.mrf.mxu0 }
 0x344   :  { %v2334_v26 = vpop.f32.mrf.mxu1 }
 0x345   :  { %v2478_v8 = vadd.f32 %v5014_v13, %v2333_v56 }
 0x346   :  { %v2337_v21 = vpop.f32.mrf.mxu1 }
 0x347   :  { %2543 = vst.msk [vmem:[%s5453_s9 + $0x168] sm:$0xff] %vm2497_vm2, %v2478_v8  ;;  %v2338_v62 = vadd.f32 %v2337_v21, %v1952_v20  ;;  %v2939_v21 = vpop.f32.mrf.mxu0 }
 0x348   :  { %v2339_v44 = vpop.f32.mrf.mxu1 }
 0x349   :  { %v2479_v63 = vadd.f32 %v5014_v13, %v2338_v62 }
 0x34a   :  { %v2342_v3 = vpop.f32.mrf.mxu1 }
 0x34b   :  { %2544 = vst.msk [vmem:[%s5453_s9 + $0x170] sm:$0xff] %vm2497_vm2, %v2479_v63  ;;  %v2343_v17 = vadd.f32 %v2918_v58, %v2342_v3  ;;  %v2022_v3 = vpop.f32.mrf.mxu0 }
 0x34c   :  { %v2344_v35 = vpop.f32.mrf.mxu1 }
 0x34d   :  { %v2480_v40 = vadd.f32 %v5014_v13, %v2343_v17 }
 0x34e   :  { %v2347_v15 = vpop.f32.mrf.mxu1 }
 0x34f   :  { %2545 = vst.msk [vmem:[%s5453_s9 + $0x178] sm:$0xff] %vm2497_vm2, %v2480_v40  ;;  %v2348_v36 = vadd.f32 %v2347_v15, %v1962_v4  ;;  %v2942_v15 = vpop.f32.mrf.mxu0 }
 0x350   :  { %v2349_v1 = vpop.f32.mrf.mxu1 }
 0x351   :  { %v2481_v23 = vadd.f32 %v5014_v13, %v2348_v36 }
 0x352   :  { %v2352_v11 = vpop.f32.mrf.mxu1 }
 0x353   :  { %2546 = vst.msk [vmem:[%s5453_s9 + $0x180] sm:$0xff] %vm2497_vm2, %v2481_v23  ;;  %v2353_v6 = vadd.f32 %v2921_v57, %v2352_v11  ;;  %v2032_v11 = vpop.f32.mrf.mxu0 }
 0x354   :  { %v2354_v5 = vpop.f32.mrf.mxu1 }
 0x355   :  { %v2482_v9 = vadd.f32 %v5014_v13, %v2353_v6 }
 0x356   :  { %v2357_v53 = vpop.f32.mrf.mxu1 }
 0x357   :  { %2547 = vst.msk [vmem:[%s5453_s9 + $0x188] sm:$0xff] %vm2497_vm2, %v2482_v9  ;;  %v2358_v34 = vadd.f32 %v2357_v53, %v1972_v59 }
 0x358   :  { %v2359_v45 = vpop.f32.mrf.mxu1 }
 0x359   :  { %v2483_v48 = vadd.f32 %v5014_v13, %v2358_v34 }
 0x35a   :  { %v2362_v27 = vpop.f32.mrf.mxu1 }
 0x35b   :  { %2548 = vst.msk [vmem:[%s5453_s9 + $0x190] sm:$0xff] %vm2497_vm2, %v2483_v48  ;;  %v2363_v60 = vadd.f32 %v2924_v30, %v2362_v27 }
 0x35c   :  { %v2364_v0 = vpop.f32.mrf.mxu1 }
 0x35d   :  { %v2484_v22 = vadd.f32 %v5014_v13, %v2363_v60 }
 0x35e   :  { %v2367_v33 = vpop.f32.mrf.mxu1 }
 0x35f   :  { %2549 = vst.msk [vmem:[%s5453_s9 + $0x198] sm:$0xff] %vm2497_vm2, %v2484_v22  ;;  %v2368_v47 = vadd.f32 %v2367_v33, %v1982_v41 }
 0x360   :  { %v2369_v46 = vpop.f32.mrf.mxu1 }
 0x361   :  { %v2485_v54 = vadd.f32 %v5014_v13, %v2368_v47 }
 0x362   :  { %v2372_v16 = vpop.f32.mrf.mxu1 }
 0x363   :  { %2550 = vst.msk [vmem:[%s5453_s9 + $0x1a0] sm:$0xff] %vm2497_vm2, %v2485_v54  ;;  %v2373_v28 = vadd.f32 %v2927_v38, %v2372_v16 }
 0x364   :  { %v2374_v18 = vpop.f32.mrf.mxu1 }
 0x365   :  { %v2486_v7 = vadd.f32 %v5014_v13, %v2373_v28 }
 0x366   :  { %v2377_v14 = vpop.f32.mrf.mxu1 }
 0x367   :  { %2551 = vst.msk [vmem:[%s5453_s9 + $0x1a8] sm:$0xff] %vm2497_vm2, %v2486_v7  ;;  %v2378_v49 = vadd.f32 %v2377_v14, %v1992_v24 }
 0x368   :  { %v2379_v37 = vpop.f32.mrf.mxu1 }
 0x369   :  { %v2487_v55 = vadd.f32 %v5014_v13, %v2378_v49 }
 0x36a   :  { %v2382_v25 = vpop.f32.mrf.mxu1 }
 0x36b   :  { %2552 = vst.msk [vmem:[%s5453_s9 + $0x1b0] sm:$0xff] %vm2497_vm2, %v2487_v55  ;;  %v2383_v50 = vadd.f32 %v2930_v31, %v2382_v25 }
 0x36c   :  { %v2384_v29 = vpop.f32.mrf.mxu1 }
 0x36d   :  { %v2488_v43 = vadd.f32 %v5014_v13, %v2383_v50 }
 0x36e   :  { %v2387_v51 = vpop.f32.mrf.mxu1 }
 0x36f   :  { %2553 = vst.msk [vmem:[%s5453_s9 + $0x1b8] sm:$0xff] %vm2497_vm2, %v2488_v43  ;;  %v2388_v52 = vadd.f32 %v2387_v51, %v2002_v12 }
 0x370   :  { %v2389_v61 = vpop.f32.mrf.mxu1 }
 0x371   :  { %v2489_v10 = vadd.f32 %v5014_v13, %v2388_v52 }
 0x372   :  { %v2392_v39 = vpop.f32.mrf.mxu1 }
 0x373   :  { %2554 = vst.msk [vmem:[%s5453_s9 + $0x1c0] sm:$0xff] %vm2497_vm2, %v2489_v10  ;;  %v2393_v58 = vadd.f32 %v2933_v42, %v2392_v39 }
 0x374   :  { %v2394_v2 = vpop.f32.mrf.mxu1 }
 0x375   :  { %v2490_v56 = vadd.f32 %v5014_v13, %v2393_v58 }
 0x376   :  { %v2397_v26 = vpop.f32.mrf.mxu1 }
 0x377   :  { %2555 = vst.msk [vmem:[%s5453_s9 + $0x1c8] sm:$0xff] %vm2497_vm2, %v2490_v56  ;;  %v2398_v20 = vadd.f32 %v2397_v26, %v2012_v19 }
 0x378   :  { %v2399_v8 = vpop.f32.mrf.mxu1 }
 0x379   :  { %v2491_v62 = vadd.f32 %v5014_v13, %v2398_v20 }
 0x37a   :  { %v2402_v44 = vpop.f32.mrf.mxu1 }
 0x37b   :  { %2556 = vst.msk [vmem:[%s5453_s9 + $0x1d0] sm:$0xff] %vm2497_vm2, %v2491_v62  ;;  %v2403_v57 = vadd.f32 %v2936_v32, %v2402_v44 }
 0x37c   :  { %v2404_v63 = vpop.f32.mrf.mxu1 }
 0x37d   :  { %v2492_v17 = vadd.f32 %v5014_v13, %v2403_v57 }
 0x37e   :  { %v2407_v35 = vpop.f32.mrf.mxu1 }
 0x37f   :  { %2557 = vst.msk [vmem:[%s5453_s9 + $0x1d8] sm:$0xff] %vm2497_vm2, %v2492_v17  ;;  %v2408_v4 = vadd.f32 %v2407_v35, %v2022_v3 }
 0x380   :  { %v2409_v40 = vpop.f32.mrf.mxu1 }
 0x381   :  { %v2493_v36 = vadd.f32 %v5014_v13, %v2408_v4 }
 0x382   :  { %v2412_v1 = vpop.f32.mrf.mxu1 }
 0x383   :  { %2558 = vst.msk [vmem:[%s5453_s9 + $0x1e0] sm:$0xff] %vm2497_vm2, %v2493_v36  ;;  %v2413_v30 = vadd.f32 %v2939_v21, %v2412_v1 }
 0x384   :  { %v2414_v23 = vpop.f32.mrf.mxu1 }
 0x385   :  { %v2494_v6 = vadd.f32 %v5014_v13, %v2413_v30 }
 0x386   :  { %v2417_v5 = vpop.f32.mrf.mxu1 }
 0x387   :  { %2559 = vst.msk [vmem:[%s5453_s9 + $0x1e8] sm:$0xff] %vm2497_vm2, %v2494_v6  ;;  %v2418_v59 = vadd.f32 %v2417_v5, %v2032_v11 }
 0x388   :  { %v2419_v9 = vpop.f32.mrf.mxu1 }
 0x389   :  { %v2495_v53 = vadd.f32 %v5014_v13, %v2418_v59 }
 0x38a   :  { %v2422_v34 = vpop.f32.mrf.mxu1 }
 0x38b   :  { %2560 = vst.msk [vmem:[%s5453_s9 + $0x1f0] sm:$0xff] %vm2497_vm2, %v2495_v53  ;;  %v2423_v45 = vadd.f32 %v2942_v15, %v2422_v34 }
 0x38c   :  { %v2424_v38 = vpop.f32.mrf.mxu1 }
 0x38d   :  { %v2496_v48 = vadd.f32 %v5014_v13, %v2423_v45 }
 0x38f   :  { %2561 = vst.msk [vmem:[%s5453_s9 + $0x1f8] sm:$0xff] %vm2497_vm2, %v2496_v48 }

</bundles_post_ra>
